<compile_context>
chip_gen: v7x
topology: tpu7x:2x2x1
jax: 0.10.0
libtpu: 0.0.40
codegen_flags: <defaults>
</compile_context>

<pallas_src>
import functools
import jax
import jax.numpy as jnp
from jax import lax
from jax.experimental import pallas as pl
from jax.experimental.pallas import tpu as pltpu

MATMUL_DTYPE = jnp.bfloat16        # MXU operand dtype (f32 accumulation)
STREAM_DTYPE = jnp.bfloat16        # gx / spk HBM streaming dtype
TIME_CHUNK = 32                    # max time steps folded into one grid step
POST_ROW_TILE = 512                # row tile of the batched post kernel
VMEM_LIMIT_BYTES = 48 * 1024 * 1024    # <= v7x 64 MiB physical VMEM
VMEM_CHUNK_BUDGET = 32 * 1024 * 1024   # per-chunk working-set budget


def _round_up(x, m):
    return (x + m - 1) // m * m


def _pick_batch_tile(B, cap=64):
    """Batch tile: full B when small, else a 16-aligned divisor (megacore)."""
    if B <= cap:
        return B
    for bt in range(min(cap, B), 0, -1):
        if B % bt == 0 and bt % 16 == 0:
            return bt
    return B


def _pick_time_chunk(S, b_tile, H, n_out, cap=TIME_CHUNK, budget=VMEM_CHUNK_BUDGET):
    """Largest divisor of S <= cap whose double-buffered chunk fits the budget."""
    # TODO(synk): pad S (per-direction, front-padding the backward stream) instead
    # of letting T degrade toward 1 when S has no good divisors (e.g. prime S).
    def chunk_bytes(T):
        gx = 2 * T * b_tile * 4 * H * 2                      # bf16 gx, 2 buffers
        spk = 2 * T * b_tile * H * 2                         # bf16 spk
        state = 2 * max(n_out - 1, 0) * T * b_tile * H * 4   # f32 syn/mem
        whh = 2 * H * 4 * H * 2                              # bf16 W_hh
        return gx + spk + state + whh
    best = 1
    for T in range(1, min(cap, S) + 1):
        if S % T == 0 and chunk_bytes(T) <= budget:
            best = T
    return best


# ----------------------------------------------------------------------------
# Pallas kernel 1: SLSTM recurrence (time-chunked scan)
# ----------------------------------------------------------------------------
def make_slstm_kernel(T, H, emit_state):
    """SLSTM recurrence over one time chunk.

    Grid = (ndir, n_batch_tiles, num_chunks); the chunk axis is innermost and
    sequential ("arbitrary") so the VMEM state carry is valid; the reset fires
    at chunk 0 of every (direction, batch-tile) instance.  Direction d == 1
    (if present) is processed in reverse time; its outputs are written at
    forward-time positions so no jnp.flip is ever materialized.
    """

    def kernel(thr_ref, gx_ref, whh_ref, *refs):
        if emit_state:
            spk_ref, syn_ref, mem_ref, syn_sc, mem_sc = refs
        else:
            spk_ref, syn_sc, mem_sc = refs

        d = pl.program_id(0)        # direction ("parallel")
        ci = pl.program_id(2)       # time chunk ("arbitrary", sequential)

        @pl.when(ci == 0)
        def _():                    # fresh zero state per (direction, batch-tile)
            syn_sc[...] = jnp.zeros_like(syn_sc)
            mem_sc[...] = jnp.zeros_like(mem_sc)

        thr = thr_ref[d]            # SMEM scalar
        whh = whh_ref[0]            # (H, 4H) resident bf16 weight

        def step(i, carry):
            c_st, h_st = carry
            # forward direction: local index i ; backward direction: T-1-i
            li = (1 - d) * i + d * (T - 1 - i)
            gates = gx_ref[li].astype(jnp.float32) + jnp.dot(
                h_st.astype(whh.dtype), whh, preferred_element_type=jnp.float32)
            # NOTE: for production make H a multiple of 128 so these gate
            # slices are lane-aligned (they are 32-lane slices at H=32 here).
            i_g = jax.nn.sigmoid(gates[:, 0 * H:1 * H])
            f_g = jax.nn.sigmoid(gates[:, 1 * H:2 * H])
            g_g = jnp.tanh(gates[:, 2 * H:3 * H])
            o_g = jax.nn.sigmoid(gates[:, 3 * H:4 * H])
            # TODO(synk): on v6e/v7x the EUP supports bf16 - the nonlinearities
            # could run in bf16 to halve EUP pushes (kept f32 for fidelity).
            c_new = f_g * c_st + i_g * g_g
            h_new = o_g * jnp.tanh(c_new)
            spk_ref[0, li] = (h_new - thr > 0.0).astype(spk_ref.dtype)   # Heaviside
            if emit_state:
                syn_ref[0, li] = c_new
                mem_ref[0, li] = h_new
            return (c_new, h_new)

        # unroll capped at 8 to bound the live gate set (vreg pressure / spills)
        c_fin, h_fin = lax.fori_loop(0, T, step, (syn_sc[...], mem_sc[...]),
                                     unroll=min(T, 8))
        syn_sc[...] = c_fin
        mem_sc[...] = h_fin

    return kernel


def slstm_scan(gx, whh, thr, *, emit_state):
    """Run the SLSTM recurrence for ndir independent parameter sets.

    gx : (S, B, ndir*4H)  hoisted x @ W_ih + (b_ih + b_hh), forward time order
                          (direction sliced on the lane-aligned last dim)
    whh: (ndir, H, 4H)    recurrent weights
    thr: (ndir,)          firing thresholds
    Direction 0 runs forward in time; direction 1 (if present) runs backward,
    with its outputs already re-aligned to forward time order.
    Returns (spk,) [bf16] or (spk, syn, mem) [bf16, f32, f32], each (ndir,S,B,H).
    """
    S, B, Gtot = gx.shape
    ndir, H, G = whh.shape
    assert Gtot == ndir * G and G == 4 * H
    n_out = 3 if emit_state else 1

    BT = _pick_batch_tile(B)
    nb = B // BT
    T = _pick_time_chunk(S, BT, H, n_out)
    nc = S // T

    def blkidx(d, c):
        # chunk block index: forward -> c ; backward -> nc-1-c
        return (1 - d) * c + d * (nc - 1 - c)

    gx_map = lambda d, b, c: (blkidx(d, c), b, d)
    whh_map = lambda d, b, c: (d, 0, 0)
    out_map = lambda d, b, c: (d, blkidx(d, c), b, 0)

    out_shapes = [jax.ShapeDtypeStruct((ndir, S, B, H), STREAM_DTYPE)]      # spk
    out_specs = [pl.BlockSpec((1, T, BT, H), out_map)]
    if emit_state:
        out_shapes += [jax.ShapeDtypeStruct((ndir, S, B, H), jnp.float32)] * 2
        out_specs += [pl.BlockSpec((1, T, BT, H), out_map)] * 2
        # TODO(synk): emit syn/mem directly in (B, S, H) layout to kill the
        # wrapper transpose (needs a sublane-dynamic store; kept simple here).

    outs = pl.pallas_call(
        make_slstm_kernel(T, H, emit_state),
        out_shape=tuple(out_shapes),
        grid=(ndir, nb, nc),
        in_specs=[
            pl.BlockSpec(memory_space=pltpu.MemorySpace.SMEM),   # thr (ndir,)
            pl.BlockSpec((T, BT, G), gx_map),                    # bf16 gx chunk
            pl.BlockSpec((1, H, G), whh_map),                    # W_hh (invariant)
            # TODO(synk): single-buffer the grid-invariant W_hh block
            # (pipeline_mode=pl.Buffered(1)) to free VMEM on v7x.
        ],
        out_specs=tuple(out_specs),
        scratch_shapes=[pltpu.VMEM((BT, H), jnp.float32),        # syn carry
                        pltpu.VMEM((BT, H), jnp.float32)],       # mem carry
        compiler_params=pltpu.CompilerParams(
            dimension_semantics=("parallel", "parallel", "arbitrary"),
            vmem_limit_bytes=VMEM_LIMIT_BYTES),
    )(thr, gx.astype(STREAM_DTYPE), whh.astype(MATMUL_DTYPE))
    return outs
    # TODO(synk): on single-TC chips (v5e/v6e) fuse both directions into one
    # per-chunk instance (block-diagonal W_hh) instead of the "parallel" axis.


# ----------------------------------------------------------------------------
# Pallas kernel 2: batched (linear folded into mixer) -> Dyt
#   out = Dyt( spk @ (w_lin @ w_mix_s) + x @ w_mix_x + (b_lin @ w_mix_s + b_mix) )
# ----------------------------------------------------------------------------
def post_kernel(spk_ref, x_ref, ws_ref, wx_ref, b_ref,
                alpha_ref, gamma_ref, beta_ref, o_ref):
    mixed = (jnp.dot(spk_ref[...], ws_ref[...], preferred_element_type=jnp.float32)
             + jnp.dot(x_ref[...], wx_ref[...], preferred_element_type=jnp.float32)
             + b_ref[...])
    # Dyt norm in f32 (dropout = identity)
    o_ref[...] = gamma_ref[...] * jnp.tanh(alpha_ref[...] * mixed) + beta_ref[...]


def linear_mixer_dyt(spk_2d, x_2d, p):
    """Batched over all S*B rows (matches PyTorch _forward_seq exactly)."""
    rows, H = spk_2d.shape
    D = x_2d.shape[1]
    spk_2d = spk_2d.astype(MATMUL_DTYPE)
    x_2d = x_2d.astype(MATMUL_DTYPE)

    tr = POST_ROW_TILE
    if rows <= tr:
        rows_p = _round_up(rows, 16)      # bf16 sublane alignment
        tr = rows_p
    else:
        rows_p = _round_up(rows, tr)
    if rows_p != rows:
        pad = ((0, rows_p - rows), (0, 0))
        spk_2d = jnp.pad(spk_2d, pad)
        x_2d = jnp.pad(x_2d, pad)

    # fold linear into the mixer (exact up to fp reassociation)
    w_fold = jnp.dot(p["w_lin"], p["w_mix_s"], preferred_element_type=jnp.float32)
    b_fold = (jnp.dot(p["b_lin"], p["w_mix_s"], preferred_element_type=jnp.float32)
              + p["b_mix"])

    def full(shape):
        return pl.BlockSpec(shape, lambda r, n=len(shape): (0,) * n)

    def row(w):
        return pl.BlockSpec((tr, w), lambda r: (r, 0))

    # TODO(synk): fuse the next layer's input-gate matmul (out @ w_ih_next + b)
    # as a second output here to save one HBM round trip per stacked layer.
    out = pl.pallas_call(
        post_kernel,
        out_shape=jax.ShapeDtypeStruct((rows_p, H), jnp.float32),
        grid=(rows_p // tr,),
        in_specs=[
            row(H), row(D),
            full((H, H)), full((D, H)), full((1, H)),    # folded mixer weights
            full((1, 1)), full((1, H)), full((1, H)),    # Dyt alpha/gamma/beta
        ],
        out_specs=row(H),
        compiler_params=pltpu.CompilerParams(
            dimension_semantics=("parallel",),
            vmem_limit_bytes=VMEM_LIMIT_BYTES),
    )(spk_2d, x_2d,
      w_fold.astype(MATMUL_DTYPE), p["w_mix_x"].astype(MATMUL_DTYPE),
      b_fold, p["alpha"], p["gamma"], p["beta"])
    return out[:rows]


# ----------------------------------------------------------------------------
# Wrapper (JAX glue)
# ----------------------------------------------------------------------------
def _input_gates(x2d_mm, w_ih, b):
    """Hoisted x @ W_ih + (b_ih + b_hh): one batched bf16 matmul, f32 accumulate."""
    g = jnp.dot(x2d_mm, w_ih.astype(MATMUL_DTYPE),
                preferred_element_type=jnp.float32)
    return (g + b).astype(STREAM_DTYPE)


def spiking_encoder_forward(src, params, hidden_dim):
    """SpikingEncoder.forward.  src: (B, S) int32 -> (syns, mems) lists of (B, S, H)."""
    H = hidden_dim
    emb = params["embedding"][src]                       # (B, S, E) gather (JAX glue)
    B, S, E = emb.shape
    x = jnp.transpose(emb, (1, 0, 2))                    # time-major (S, B, E)
    # Embedding Dyt norm: trivially fusable elementwise op -> plain JAX.
    x = params["norm_gamma"] * jnp.tanh(params["norm_alpha"] * x) + params["norm_beta"]
    x2d = x.reshape(S * B, E)
    x2d_mm = x2d.astype(MATMUL_DTYPE)

    # --- bidirectional SLSTM stage: both directions in ONE pallas_call -------
    pf, pb = params["f"], params["b"]
    # one (S*B, E) @ (E, 8H) matmul for both directions' gates
    w_cat = jnp.concatenate([pf["w_ih"], pb["w_ih"]], axis=1)   # (E, 8H)
    b_cat = jnp.concatenate([pf["b"], pb["b"]], axis=0)         # (8H,)
    gx = _input_gates(x2d_mm, w_cat, b_cat).reshape(S, B, 8 * H)
    whh = jnp.stack([pf["w_hh"], pb["w_hh"]], axis=0)
    thr = jnp.stack([pf["thr"], pb["thr"]], axis=0)
    spk2 = slstm_scan(gx, whh, thr, emit_state=False)[0]        # (2, S, B, H) bf16
    f_out = linear_mixer_dyt(spk2[0].reshape(S * B, H), x2d_mm, pf)
    b_out = linear_mixer_dyt(spk2[1].reshape(S * B, H), x2d_mm, pb)   # fwd-aligned
    output = jnp.concatenate([f_out.reshape(S, B, H),
                              b_out.reshape(S, B, H)], axis=-1)       # (S, B, 2H)

    # --- stacked unidirectional SpikingLayers --------------------------------
    syns, mems = [], []
    for lp in params["layers"]:
        out2d = output.reshape(S * B, -1)
        out2d_mm = out2d.astype(MATMUL_DTYPE)
        gx = _input_gates(out2d_mm, lp["w_ih"], lp["b"]).reshape(S, B, 4 * H)
        spk, syn, mem = slstm_scan(gx, lp["w_hh"][None], lp["thr"][None],
                                   emit_state=True)
        out_new = linear_mixer_dyt(spk[0].reshape(S * B, H), out2d_mm, lp)
        output = out_new.reshape(S, B, H)
        syns.append(jnp.transpose(syn[0], (1, 0, 2)))            # (B, S, H)
        mems.append(jnp.transpose(mem[0], (1, 0, 2)))
    return syns, mems


# ----------------------------------------------------------------------------
# Deterministic parameter initialization (synthetic, matches module shapes)
# ----------------------------------------------------------------------------
def init_layer_params(key, input_dim, hidden_dim):
    H, D = hidden_dim, input_dim
    ks = jax.random.split(key, 8)
    s = 1.0 / jnp.sqrt(H)
    sm = 1.0 / jnp.sqrt(H + D)
    u = lambda k, shape, sc: jax.random.uniform(k, shape, jnp.float32, -sc, sc)

    w_ih = u(ks[0], (4 * H, D), s)        # LSTMCell weight_ih
    w_hh = u(ks[1], (4 * H, H), s)        # LSTMCell weight_hh
    b_ih = u(ks[2], (4 * H,), s)
    b_hh = u(ks[3], (4 * H,), s)
    w_lin = u(ks[4], (H, H), s)           # nn.Linear(H, H)
    b_lin = u(ks[5], (H,), s)
    w_mix = u(ks[6], (H, H + D), sm)      # nn.Linear(H + D, H)
    b_mix = u(ks[7], (H,), sm)
    w_mix_t = jnp.transpose(w_mix)        # (H + D, H)

    return dict(
        w_ih=jnp.transpose(w_ih),                 # (D, 4H)
        w_hh=jnp.transpose(w_hh),                 # (H, 4H)
        b=b_ih + b_hh,                            # (4H,) folded bias
        thr=jnp.array(1.0, jnp.float32),          # learn_threshold init = 1.0
        w_lin=jnp.transpose(w_lin),               # (H, H)
        b_lin=b_lin.reshape(1, H),
        w_mix_s=w_mix_t[:H],                      # (H, H) applied to linear(spk)
        w_mix_x=w_mix_t[H:],                      # (D, H) applied to x
        b_mix=b_mix.reshape(1, H),
        alpha=jnp.full((1, 1), 0.5, jnp.float32),  # Dyt
        gamma=jnp.ones((1, H), jnp.float32),
        beta=jnp.zeros((1, H), jnp.float32),
    )


def init_encoder_params(key, padding_idx, embedding_dim, vocab_size,
                        hidden_dim, num_layers):
    del padding_idx  # xavier_uniform_ in the reference overwrites the padding row
    E, H = embedding_dim, hidden_dim
    ks = jax.random.split(key, 3 + num_layers)
    bound = jnp.sqrt(6.0 / (vocab_size + E))
    embedding = jax.random.uniform(ks[0], (vocab_size, E), jnp.float32, -bound, bound)
    return dict(
        embedding=embedding,
        norm_alpha=jnp.array(0.5, jnp.float32),
        norm_gamma=jnp.ones((E,), jnp.float32),
        norm_beta=jnp.zeros((E,), jnp.float32),
        f=init_layer_params(ks[1], E, H),
        b=init_layer_params(ks[2], E, H),
        layers=[init_layer_params(ks[3 + i], 2 * H if i == 0 else H, H)
                for i in range(num_layers)],
    )


# ----------------------------------------------------------------------------
if __name__ == "__main__":
    B, S = 2, 8
    vocab_size, embedding_dim, hidden_dim, num_layers = 50, 16, 32, 2
    padding_idx, dropout = 0, 0.1  # dropout unused (eval-mode identity)

    key = jax.random.PRNGKey(0)
    src = jax.random.randint(key, (B, S), 0, vocab_size, dtype=jnp.int32)

    params = init_encoder_params(jax.random.PRNGKey(42), padding_idx,
                                 embedding_dim, vocab_size, hidden_dim, num_layers)

    fwd = jax.jit(functools.partial(spiking_encoder_forward, hidden_dim=hidden_dim))
    syns, mems = fwd(src, params)
    jax.block_until_ready((syns, mems))

    assert len(syns) == num_layers and len(mems) == num_layers
    assert syns[0].shape == (B, S, hidden_dim)
    assert mems[-1].shape == (B, S, hidden_dim)
    assert all(bool(jnp.isfinite(t).all()) for t in syns + mems)
    print("KERNEL_OK")
</pallas_src>

<mosaic_0001>
module attributes {stable_mosaic.version = 11 : i64} {
  func.func @kernel(%arg0: i32, %arg1: i32, %arg2: i32, %arg3: memref<2xf32, #tpu.memory_space<smem>>, %arg4: memref<8x2x128xbf16, #tpu.memory_space<vmem>>, %arg5: memref<1x32x128xbf16, #tpu.memory_space<vmem>>, %arg6: memref<1x8x2x32xbf16, #tpu.memory_space<vmem>>, %arg7: memref<2x32xf32, #tpu.memory_space<vmem>>, %arg8: memref<2x32xf32, #tpu.memory_space<vmem>>) attributes {dimension_semantics = [#tpu.dimension_semantics<parallel>, #tpu.dimension_semantics<parallel>, #tpu.dimension_semantics<arbitrary>], iteration_bounds = array<i64: 2, 1, 1>, scalar_prefetch = 0 : i64, scratch_operands = 2 : i64, tpu.core_type = #tpu.core_type<tc>, window_params = [{transform_indices = @transform_0, window_bounds = array<i64: 2>}, {transform_indices = @transform_1, window_bounds = array<i64: 8, 2, 128>}, {transform_indices = @transform_2, window_bounds = array<i64: 1, 32, 128>}, {transform_indices = @transform_3, window_bounds = array<i64: 1, 8, 2, 32>}]} {
    %c0_i32 = arith.constant 0 : i32
    %0 = arith.cmpi eq, %arg2, %c0_i32 : i32
    %1 = arith.extui %0 : i1 to i32
    %c0_i32_0 = arith.constant 0 : i32
    %2 = arith.cmpi ne, %1, %c0_i32_0 : i32
    scf.if %2 {
      %cst_107 = arith.constant 0.000000e+00 : f32
      %395 = vector.broadcast %cst_107 : f32 to vector<2x32xf32>
      %c0_108 = arith.constant 0 : index
      %c0_109 = arith.constant 0 : index
      %396 = vector.load %arg7[%c0_108, %c0_109] : memref<2x32xf32, #tpu.memory_space<vmem>>, vector<2x32xf32>
      tpu.vector_store %arg7[%c0_108, %c0_109], %395 {strides = array<i32>} : memref<2x32xf32, #tpu.memory_space<vmem>>, vector<2x32xf32>,
      %cst_110 = arith.constant 0.000000e+00 : f32
      %397 = vector.broadcast %cst_110 : f32 to vector<2x32xf32>
      %c0_111 = arith.constant 0 : index
      %c0_112 = arith.constant 0 : index
      %398 = vector.load %arg8[%c0_111, %c0_112] : memref<2x32xf32, #tpu.memory_space<vmem>>, vector<2x32xf32>
      tpu.vector_store %arg8[%c0_111, %c0_112], %397 {strides = array<i32>} : memref<2x32xf32, #tpu.memory_space<vmem>>, vector<2x32xf32>,
    } else {
    }
    %3 = arith.index_cast %arg0 : i32 to index
    %4 = memref.load %arg3[%3] : memref<2xf32, #tpu.memory_space<smem>>
    %c0 = arith.constant 0 : index
    %c0_1 = arith.constant 0 : index
    %c0_2 = arith.constant 0 : index
    %5 = vector.load %arg5[%c0, %c0_1, %c0_2] : memref<1x32x128xbf16, #tpu.memory_space<vmem>>, vector<1x32x128xbf16>
    %6 = vector.shape_cast %5 : vector<1x32x128xbf16> to vector<32x128xbf16>
    %c0_3 = arith.constant 0 : index
    %c0_4 = arith.constant 0 : index
    %7 = vector.load %arg7[%c0_3, %c0_4] : memref<2x32xf32, #tpu.memory_space<vmem>>, vector<2x32xf32>
    %c0_5 = arith.constant 0 : index
    %c0_6 = arith.constant 0 : index
    %8 = vector.load %arg8[%c0_5, %c0_6] : memref<2x32xf32, #tpu.memory_space<vmem>>, vector<2x32xf32>
    %c0_i32_7 = arith.constant 0 : i32
    %c1_i32 = arith.constant 1 : i32
    %9 = arith.subi %c1_i32, %arg0 : i32
    %10 = arith.muli %9, %c0_i32_7 : i32
    %c7_i32 = arith.constant 7 : i32
    %11 = arith.subi %c7_i32, %c0_i32_7 : i32
    %12 = arith.muli %arg0, %11 : i32
    %13 = arith.addi %10, %12 : i32
    %14 = arith.index_cast %13 : i32 to index
    %c0_8 = arith.constant 0 : index
    %c0_9 = arith.constant 0 : index
    %15 = vector.load %arg4[%14, %c0_8, %c0_9] : memref<8x2x128xbf16, #tpu.memory_space<vmem>>, vector<1x2x128xbf16>
    %16 = vector.shape_cast %15 : vector<1x2x128xbf16> to vector<2x128xbf16>
    %17 = arith.extf %16 : vector<2x128xbf16> to vector<2x128xf32>
    %18 = arith.truncf %8 : vector<2x32xf32> to vector<2x32xbf16>
    %cst = arith.constant dense<0.000000e+00> : vector<2x128xf32>
    %19 = tpu.matmul %18, %6, %cst {dimension_numbers = #tpu.dot_dimension_numbers<[1], [0], [0], [1], [0, 0, 1, 1], [], []>} : vector<2x32xbf16>, vector<32x128xbf16>, vector<2x128xf32> -> vector<2x128xf32>
    %20 = arith.addf %17, %19 : vector<2x128xf32>
    %21 = vector.extract_strided_slice %20 {offsets = [0, 0], sizes = [2, 32], strides = [1, 1]} : vector<2x128xf32> to vector<2x32xf32>
    %22 = arith.negf %21 : vector<2x32xf32>
    %23 = math.exp %22 : vector<2x32xf32>
    %cst_10 = arith.constant 1.000000e+00 : f32
    %24 = vector.broadcast %cst_10 : f32 to vector<2x32xf32>
    %25 = arith.addf %24, %23 : vector<2x32xf32>
    %26 = arith.divf %24, %25 : vector<2x32xf32>
    %27 = vector.extract_strided_slice %20 {offsets = [0, 32], sizes = [2, 32], strides = [1, 1]} : vector<2x128xf32> to vector<2x32xf32>
    %28 = arith.negf %27 : vector<2x32xf32>
    %29 = math.exp %28 : vector<2x32xf32>
    %cst_11 = arith.constant 1.000000e+00 : f32
    %30 = vector.broadcast %cst_11 : f32 to vector<2x32xf32>
    %31 = arith.addf %30, %29 : vector<2x32xf32>
    %32 = arith.divf %30, %31 : vector<2x32xf32>
    %33 = vector.extract_strided_slice %20 {offsets = [0, 64], sizes = [2, 32], strides = [1, 1]} : vector<2x128xf32> to vector<2x32xf32>
    %34 = math.tanh %33 : vector<2x32xf32>
    %35 = vector.extract_strided_slice %20 {offsets = [0, 96], sizes = [2, 32], strides = [1, 1]} : vector<2x128xf32> to vector<2x32xf32>
    %36 = arith.negf %35 : vector<2x32xf32>
    %37 = math.exp %36 : vector<2x32xf32>
    %cst_12 = arith.constant 1.000000e+00 : f32
    %38 = vector.broadcast %cst_12 : f32 to vector<2x32xf32>
    %39 = arith.addf %38, %37 : vector<2x32xf32>
    %40 = arith.divf %38, %39 : vector<2x32xf32>
    %41 = arith.mulf %32, %7 : vector<2x32xf32>
    %42 = arith.mulf %26, %34 : vector<2x32xf32>
    %43 = arith.addf %41, %42 : vector<2x32xf32>
    %44 = math.tanh %43 : vector<2x32xf32>
    %45 = arith.mulf %40, %44 : vector<2x32xf32>
    %46 = vector.broadcast %4 : f32 to vector<2x32xf32>
    %47 = arith.subf %45, %46 : vector<2x32xf32>
    %cst_13 = arith.constant 0.000000e+00 : f32
    %48 = vector.broadcast %cst_13 : f32 to vector<2x32xf32>
    %49 = arith.cmpf ogt, %47, %48 : vector<2x32xf32>
    %50 = arith.extui %49 : vector<2x32xi1> to vector<2x32xi32>
    %51 = arith.sitofp %50 : vector<2x32xi32> to vector<2x32xf32>
    %52 = arith.truncf %51 : vector<2x32xf32> to vector<2x32xbf16>
    %c0_14 = arith.constant 0 : index
    %53 = arith.index_cast %13 : i32 to index
    %c0_15 = arith.constant 0 : index
    %c0_16 = arith.constant 0 : index
    %54 = vector.load %arg6[%c0_14, %53, %c0_15, %c0_16] : memref<1x8x2x32xbf16, #tpu.memory_space<vmem>>, vector<1x1x2x32xbf16>
    %55 = vector.shape_cast %54 : vector<1x1x2x32xbf16> to vector<2x32xbf16>
    %56 = vector.shape_cast %52 : vector<2x32xbf16> to vector<1x1x2x32xbf16>
    tpu.vector_store %arg6[%c0_14, %53, %c0_15, %c0_16], %56 {strides = array<i32>} : memref<1x8x2x32xbf16, #tpu.memory_space<vmem>>, vector<1x1x2x32xbf16>,
    %c1_i32_17 = arith.constant 1 : i32
    %c1_i32_18 = arith.constant 1 : i32
    %57 = arith.subi %c1_i32_18, %arg0 : i32
    %58 = arith.muli %57, %c1_i32_17 : i32
    %c7_i32_19 = arith.constant 7 : i32
    %59 = arith.subi %c7_i32_19, %c1_i32_17 : i32
    %60 = arith.muli %arg0, %59 : i32
    %61 = arith.addi %58, %60 : i32
    %62 = arith.index_cast %61 : i32 to index
    %c0_20 = arith.constant 0 : index
    %c0_21 = arith.constant 0 : index
    %63 = vector.load %arg4[%62, %c0_20, %c0_21] : memref<8x2x128xbf16, #tpu.memory_space<vmem>>, vector<1x2x128xbf16>
    %64 = vector.shape_cast %63 : vector<1x2x128xbf16> to vector<2x128xbf16>
    %65 = arith.extf %64 : vector<2x128xbf16> to vector<2x128xf32>
    %66 = arith.truncf %45 : vector<2x32xf32> to vector<2x32xbf16>
    %cst_22 = arith.constant dense<0.000000e+00> : vector<2x128xf32>
    %67 = tpu.matmul %66, %6, %cst_22 {dimension_numbers = #tpu.dot_dimension_numbers<[1], [0], [0], [1], [0, 0, 1, 1], [], []>} : vector<2x32xbf16>, vector<32x128xbf16>, vector<2x128xf32> -> vector<2x128xf32>
    %68 = arith.addf %65, %67 : vector<2x128xf32>
    %69 = vector.extract_strided_slice %68 {offsets = [0, 0], sizes = [2, 32], strides = [1, 1]} : vector<2x128xf32> to vector<2x32xf32>
    %70 = arith.negf %69 : vector<2x32xf32>
    %71 = math.exp %70 : vector<2x32xf32>
    %cst_23 = arith.constant 1.000000e+00 : f32
    %72 = vector.broadcast %cst_23 : f32 to vector<2x32xf32>
    %73 = arith.addf %72, %71 : vector<2x32xf32>
    %74 = arith.divf %72, %73 : vector<2x32xf32>
    %75 = vector.extract_strided_slice %68 {offsets = [0, 32], sizes = [2, 32], strides = [1, 1]} : vector<2x128xf32> to vector<2x32xf32>
    %76 = arith.negf %75 : vector<2x32xf32>
    %77 = math.exp %76 : vector<2x32xf32>
    %cst_24 = arith.constant 1.000000e+00 : f32
    %78 = vector.broadcast %cst_24 : f32 to vector<2x32xf32>
    %79 = arith.addf %78, %77 : vector<2x32xf32>
    %80 = arith.divf %78, %79 : vector<2x32xf32>
    %81 = vector.extract_strided_slice %68 {offsets = [0, 64], sizes = [2, 32], strides = [1, 1]} : vector<2x128xf32> to vector<2x32xf32>
    %82 = math.tanh %81 : vector<2x32xf32>
    %83 = vector.extract_strided_slice %68 {offsets = [0, 96], sizes = [2, 32], strides = [1, 1]} : vector<2x128xf32> to vector<2x32xf32>
    %84 = arith.negf %83 : vector<2x32xf32>
    %85 = math.exp %84 : vector<2x32xf32>
    %cst_25 = arith.constant 1.000000e+00 : f32
    %86 = vector.broadcast %cst_25 : f32 to vector<2x32xf32>
    %87 = arith.addf %86, %85 : vector<2x32xf32>
    %88 = arith.divf %86, %87 : vector<2x32xf32>
    %89 = arith.mulf %80, %43 : vector<2x32xf32>
    %90 = arith.mulf %74, %82 : vector<2x32xf32>
    %91 = arith.addf %89, %90 : vector<2x32xf32>
    %92 = math.tanh %91 : vector<2x32xf32>
    %93 = arith.mulf %88, %92 : vector<2x32xf32>
    %94 = vector.broadcast %4 : f32 to vector<2x32xf32>
    %95 = arith.subf %93, %94 : vector<2x32xf32>
    %cst_26 = arith.constant 0.000000e+00 : f32
    %96 = vector.broadcast %cst_26 : f32 to vector<2x32xf32>
    %97 = arith.cmpf ogt, %95, %96 : vector<2x32xf32>
    %98 = arith.extui %97 : vector<2x32xi1> to vector<2x32xi32>
    %99 = arith.sitofp %98 : vector<2x32xi32> to vector<2x32xf32>
    %100 = arith.truncf %99 : vector<2x32xf32> to vector<2x32xbf16>
    %c0_27 = arith.constant 0 : index
    %101 = arith.index_cast %61 : i32 to index
    %c0_28 = arith.constant 0 : index
    %c0_29 = arith.constant 0 : index
    %102 = vector.load %arg6[%c0_27, %101, %c0_28, %c0_29] : memref<1x8x2x32xbf16, #tpu.memory_space<vmem>>, vector<1x1x2x32xbf16>
    %103 = vector.shape_cast %102 : vector<1x1x2x32xbf16> to vector<2x32xbf16>
    %104 = vector.shape_cast %100 : vector<2x32xbf16> to vector<1x1x2x32xbf16>
    tpu.vector_store %arg6[%c0_27, %101, %c0_28, %c0_29], %104 {strides = array<i32>} : memref<1x8x2x32xbf16, #tpu.memory_space<vmem>>, vector<1x1x2x32xbf16>,
    %c2_i32 = arith.constant 2 : i32
    %c1_i32_30 = arith.constant 1 : i32
    %105 = arith.subi %c1_i32_30, %arg0 : i32
    %106 = arith.muli %105, %c2_i32 : i32
    %c7_i32_31 = arith.constant 7 : i32
    %107 = arith.subi %c7_i32_31, %c2_i32 : i32
    %108 = arith.muli %arg0, %107 : i32
    %109 = arith.addi %106, %108 : i32
    %110 = arith.index_cast %109 : i32 to index
    %c0_32 = arith.constant 0 : index
    %c0_33 = arith.constant 0 : index
    %111 = vector.load %arg4[%110, %c0_32, %c0_33] : memref<8x2x128xbf16, #tpu.memory_space<vmem>>, vector<1x2x128xbf16>
    %112 = vector.shape_cast %111 : vector<1x2x128xbf16> to vector<2x128xbf16>
    %113 = arith.extf %112 : vector<2x128xbf16> to vector<2x128xf32>
    %114 = arith.truncf %93 : vector<2x32xf32> to vector<2x32xbf16>
    %cst_34 = arith.constant dense<0.000000e+00> : vector<2x128xf32>
    %115 = tpu.matmul %114, %6, %cst_34 {dimension_numbers = #tpu.dot_dimension_numbers<[1], [0], [0], [1], [0, 0, 1, 1], [], []>} : vector<2x32xbf16>, vector<32x128xbf16>, vector<2x128xf32> -> vector<2x128xf32>
    %116 = arith.addf %113, %115 : vector<2x128xf32>
    %117 = vector.extract_strided_slice %116 {offsets = [0, 0], sizes = [2, 32], strides = [1, 1]} : vector<2x128xf32> to vector<2x32xf32>
    %118 = arith.negf %117 : vector<2x32xf32>
    %119 = math.exp %118 : vector<2x32xf32>
    %cst_35 = arith.constant 1.000000e+00 : f32
    %120 = vector.broadcast %cst_35 : f32 to vector<2x32xf32>
    %121 = arith.addf %120, %119 : vector<2x32xf32>
    %122 = arith.divf %120, %121 : vector<2x32xf32>
    %123 = vector.extract_strided_slice %116 {offsets = [0, 32], sizes = [2, 32], strides = [1, 1]} : vector<2x128xf32> to vector<2x32xf32>
    %124 = arith.negf %123 : vector<2x32xf32>
    %125 = math.exp %124 : vector<2x32xf32>
    %cst_36 = arith.constant 1.000000e+00 : f32
    %126 = vector.broadcast %cst_36 : f32 to vector<2x32xf32>
    %127 = arith.addf %126, %125 : vector<2x32xf32>
    %128 = arith.divf %126, %127 : vector<2x32xf32>
    %129 = vector.extract_strided_slice %116 {offsets = [0, 64], sizes = [2, 32], strides = [1, 1]} : vector<2x128xf32> to vector<2x32xf32>
    %130 = math.tanh %129 : vector<2x32xf32>
    %131 = vector.extract_strided_slice %116 {offsets = [0, 96], sizes = [2, 32], strides = [1, 1]} : vector<2x128xf32> to vector<2x32xf32>
    %132 = arith.negf %131 : vector<2x32xf32>
    %133 = math.exp %132 : vector<2x32xf32>
    %cst_37 = arith.constant 1.000000e+00 : f32
    %134 = vector.broadcast %cst_37 : f32 to vector<2x32xf32>
    %135 = arith.addf %134, %133 : vector<2x32xf32>
    %136 = arith.divf %134, %135 : vector<2x32xf32>
    %137 = arith.mulf %128, %91 : vector<2x32xf32>
    %138 = arith.mulf %122, %130 : vector<2x32xf32>
    %139 = arith.addf %137, %138 : vector<2x32xf32>
    %140 = math.tanh %139 : vector<2x32xf32>
    %141 = arith.mulf %136, %140 : vector<2x32xf32>
    %142 = vector.broadcast %4 : f32 to vector<2x32xf32>
    %143 = arith.subf %141, %142 : vector<2x32xf32>
    %cst_38 = arith.constant 0.000000e+00 : f32
    %144 = vector.broadcast %cst_38 : f32 to vector<2x32xf32>
    %145 = arith.cmpf ogt, %143, %144 : vector<2x32xf32>
    %146 = arith.extui %145 : vector<2x32xi1> to vector<2x32xi32>
    %147 = arith.sitofp %146 : vector<2x32xi32> to vector<2x32xf32>
    %148 = arith.truncf %147 : vector<2x32xf32> to vector<2x32xbf16>
    %c0_39 = arith.constant 0 : index
    %149 = arith.index_cast %109 : i32 to index
    %c0_40 = arith.constant 0 : index
    %c0_41 = arith.constant 0 : index
    %150 = vector.load %arg6[%c0_39, %149, %c0_40, %c0_41] : memref<1x8x2x32xbf16, #tpu.memory_space<vmem>>, vector<1x1x2x32xbf16>
    %151 = vector.shape_cast %150 : vector<1x1x2x32xbf16> to vector<2x32xbf16>
    %152 = vector.shape_cast %148 : vector<2x32xbf16> to vector<1x1x2x32xbf16>
    tpu.vector_store %arg6[%c0_39, %149, %c0_40, %c0_41], %152 {strides = array<i32>} : memref<1x8x2x32xbf16, #tpu.memory_space<vmem>>, vector<1x1x2x32xbf16>,
    %c3_i32 = arith.constant 3 : i32
    %c1_i32_42 = arith.constant 1 : i32
    %153 = arith.subi %c1_i32_42, %arg0 : i32
    %154 = arith.muli %153, %c3_i32 : i32
    %c7_i32_43 = arith.constant 7 : i32
    %155 = arith.subi %c7_i32_43, %c3_i32 : i32
    %156 = arith.muli %arg0, %155 : i32
    %157 = arith.addi %154, %156 : i32
    %158 = arith.index_cast %157 : i32 to index
    %c0_44 = arith.constant 0 : index
    %c0_45 = arith.constant 0 : index
    %159 = vector.load %arg4[%158, %c0_44, %c0_45] : memref<8x2x128xbf16, #tpu.memory_space<vmem>>, vector<1x2x128xbf16>
    %160 = vector.shape_cast %159 : vector<1x2x128xbf16> to vector<2x128xbf16>
    %161 = arith.extf %160 : vector<2x128xbf16> to vector<2x128xf32>
    %162 = arith.truncf %141 : vector<2x32xf32> to vector<2x32xbf16>
    %cst_46 = arith.constant dense<0.000000e+00> : vector<2x128xf32>
    %163 = tpu.matmul %162, %6, %cst_46 {dimension_numbers = #tpu.dot_dimension_numbers<[1], [0], [0], [1], [0, 0, 1, 1], [], []>} : vector<2x32xbf16>, vector<32x128xbf16>, vector<2x128xf32> -> vector<2x128xf32>
    %164 = arith.addf %161, %163 : vector<2x128xf32>
    %165 = vector.extract_strided_slice %164 {offsets = [0, 0], sizes = [2, 32], strides = [1, 1]} : vector<2x128xf32> to vector<2x32xf32>
    %166 = arith.negf %165 : vector<2x32xf32>
    %167 = math.exp %166 : vector<2x32xf32>
    %cst_47 = arith.constant 1.000000e+00 : f32
    %168 = vector.broadcast %cst_47 : f32 to vector<2x32xf32>
    %169 = arith.addf %168, %167 : vector<2x32xf32>
    %170 = arith.divf %168, %169 : vector<2x32xf32>
    %171 = vector.extract_strided_slice %164 {offsets = [0, 32], sizes = [2, 32], strides = [1, 1]} : vector<2x128xf32> to vector<2x32xf32>
    %172 = arith.negf %171 : vector<2x32xf32>
    %173 = math.exp %172 : vector<2x32xf32>
    %cst_48 = arith.constant 1.000000e+00 : f32
    %174 = vector.broadcast %cst_48 : f32 to vector<2x32xf32>
    %175 = arith.addf %174, %173 : vector<2x32xf32>
    %176 = arith.divf %174, %175 : vector<2x32xf32>
    %177 = vector.extract_strided_slice %164 {offsets = [0, 64], sizes = [2, 32], strides = [1, 1]} : vector<2x128xf32> to vector<2x32xf32>
    %178 = math.tanh %177 : vector<2x32xf32>
    %179 = vector.extract_strided_slice %164 {offsets = [0, 96], sizes = [2, 32], strides = [1, 1]} : vector<2x128xf32> to vector<2x32xf32>
    %180 = arith.negf %179 : vector<2x32xf32>
    %181 = math.exp %180 : vector<2x32xf32>
    %cst_49 = arith.constant 1.000000e+00 : f32
    %182 = vector.broadcast %cst_49 : f32 to vector<2x32xf32>
    %183 = arith.addf %182, %181 : vector<2x32xf32>
    %184 = arith.divf %182, %183 : vector<2x32xf32>
    %185 = arith.mulf %176, %139 : vector<2x32xf32>
    %186 = arith.mulf %170, %178 : vector<2x32xf32>
    %187 = arith.addf %185, %186 : vector<2x32xf32>
    %188 = math.tanh %187 : vector<2x32xf32>
    %189 = arith.mulf %184, %188 : vector<2x32xf32>
    %190 = vector.broadcast %4 : f32 to vector<2x32xf32>
    %191 = arith.subf %189, %190 : vector<2x32xf32>
    %cst_50 = arith.constant 0.000000e+00 : f32
    %192 = vector.broadcast %cst_50 : f32 to vector<2x32xf32>
    %193 = arith.cmpf ogt, %191, %192 : vector<2x32xf32>
    %194 = arith.extui %193 : vector<2x32xi1> to vector<2x32xi32>
    %195 = arith.sitofp %194 : vector<2x32xi32> to vector<2x32xf32>
    %196 = arith.truncf %195 : vector<2x32xf32> to vector<2x32xbf16>
    %c0_51 = arith.constant 0 : index
    %197 = arith.index_cast %157 : i32 to index
    %c0_52 = arith.constant 0 : index
    %c0_53 = arith.constant 0 : index
    %198 = vector.load %arg6[%c0_51, %197, %c0_52, %c0_53] : memref<1x8x2x32xbf16, #tpu.memory_space<vmem>>, vector<1x1x2x32xbf16>
    %199 = vector.shape_cast %198 : vector<1x1x2x32xbf16> to vector<2x32xbf16>
    %200 = vector.shape_cast %196 : vector<2x32xbf16> to vector<1x1x2x32xbf16>
    tpu.vector_store %arg6[%c0_51, %197, %c0_52, %c0_53], %200 {strides = array<i32>} : memref<1x8x2x32xbf16, #tpu.memory_space<vmem>>, vector<1x1x2x32xbf16>,
    %c4_i32 = arith.constant 4 : i32
    %c1_i32_54 = arith.constant 1 : i32
    %201 = arith.subi %c1_i32_54, %arg0 : i32
    %202 = arith.muli %201, %c4_i32 : i32
    %c7_i32_55 = arith.constant 7 : i32
    %203 = arith.subi %c7_i32_55, %c4_i32 : i32
    %204 = arith.muli %arg0, %203 : i32
    %205 = arith.addi %202, %204 : i32
    %206 = arith.index_cast %205 : i32 to index
    %c0_56 = arith.constant 0 : index
    %c0_57 = arith.constant 0 : index
    %207 = vector.load %arg4[%206, %c0_56, %c0_57] : memref<8x2x128xbf16, #tpu.memory_space<vmem>>, vector<1x2x128xbf16>
    %208 = vector.shape_cast %207 : vector<1x2x128xbf16> to vector<2x128xbf16>
    %209 = arith.extf %208 : vector<2x128xbf16> to vector<2x128xf32>
    %210 = arith.truncf %189 : vector<2x32xf32> to vector<2x32xbf16>
    %cst_58 = arith.constant dense<0.000000e+00> : vector<2x128xf32>
    %211 = tpu.matmul %210, %6, %cst_58 {dimension_numbers = #tpu.dot_dimension_numbers<[1], [0], [0], [1], [0, 0, 1, 1], [], []>} : vector<2x32xbf16>, vector<32x128xbf16>, vector<2x128xf32> -> vector<2x128xf32>
    %212 = arith.addf %209, %211 : vector<2x128xf32>
    %213 = vector.extract_strided_slice %212 {offsets = [0, 0], sizes = [2, 32], strides = [1, 1]} : vector<2x128xf32> to vector<2x32xf32>
    %214 = arith.negf %213 : vector<2x32xf32>
    %215 = math.exp %214 : vector<2x32xf32>
    %cst_59 = arith.constant 1.000000e+00 : f32
    %216 = vector.broadcast %cst_59 : f32 to vector<2x32xf32>
    %217 = arith.addf %216, %215 : vector<2x32xf32>
    %218 = arith.divf %216, %217 : vector<2x32xf32>
    %219 = vector.extract_strided_slice %212 {offsets = [0, 32], sizes = [2, 32], strides = [1, 1]} : vector<2x128xf32> to vector<2x32xf32>
    %220 = arith.negf %219 : vector<2x32xf32>
    %221 = math.exp %220 : vector<2x32xf32>
    %cst_60 = arith.constant 1.000000e+00 : f32
    %222 = vector.broadcast %cst_60 : f32 to vector<2x32xf32>
    %223 = arith.addf %222, %221 : vector<2x32xf32>
    %224 = arith.divf %222, %223 : vector<2x32xf32>
    %225 = vector.extract_strided_slice %212 {offsets = [0, 64], sizes = [2, 32], strides = [1, 1]} : vector<2x128xf32> to vector<2x32xf32>
    %226 = math.tanh %225 : vector<2x32xf32>
    %227 = vector.extract_strided_slice %212 {offsets = [0, 96], sizes = [2, 32], strides = [1, 1]} : vector<2x128xf32> to vector<2x32xf32>
    %228 = arith.negf %227 : vector<2x32xf32>
    %229 = math.exp %228 : vector<2x32xf32>
    %cst_61 = arith.constant 1.000000e+00 : f32
    %230 = vector.broadcast %cst_61 : f32 to vector<2x32xf32>
    %231 = arith.addf %230, %229 : vector<2x32xf32>
    %232 = arith.divf %230, %231 : vector<2x32xf32>
    %233 = arith.mulf %224, %187 : vector<2x32xf32>
    %234 = arith.mulf %218, %226 : vector<2x32xf32>
    %235 = arith.addf %233, %234 : vector<2x32xf32>
    %236 = math.tanh %235 : vector<2x32xf32>
    %237 = arith.mulf %232, %236 : vector<2x32xf32>
    %238 = vector.broadcast %4 : f32 to vector<2x32xf32>
    %239 = arith.subf %237, %238 : vector<2x32xf32>
    %cst_62 = arith.constant 0.000000e+00 : f32
    %240 = vector.broadcast %cst_62 : f32 to vector<2x32xf32>
    %241 = arith.cmpf ogt, %239, %240 : vector<2x32xf32>
    %242 = arith.extui %241 : vector<2x32xi1> to vector<2x32xi32>
    %243 = arith.sitofp %242 : vector<2x32xi32> to vector<2x32xf32>
    %244 = arith.truncf %243 : vector<2x32xf32> to vector<2x32xbf16>
    %c0_63 = arith.constant 0 : index
    %245 = arith.index_cast %205 : i32 to index
    %c0_64 = arith.constant 0 : index
    %c0_65 = arith.constant 0 : index
    %246 = vector.load %arg6[%c0_63, %245, %c0_64, %c0_65] : memref<1x8x2x32xbf16, #tpu.memory_space<vmem>>, vector<1x1x2x32xbf16>
    %247 = vector.shape_cast %246 : vector<1x1x2x32xbf16> to vector<2x32xbf16>
    %248 = vector.shape_cast %244 : vector<2x32xbf16> to vector<1x1x2x32xbf16>
    tpu.vector_store %arg6[%c0_63, %245, %c0_64, %c0_65], %248 {strides = array<i32>} : memref<1x8x2x32xbf16, #tpu.memory_space<vmem>>, vector<1x1x2x32xbf16>,
    %c5_i32 = arith.constant 5 : i32
    %c1_i32_66 = arith.constant 1 : i32
    %249 = arith.subi %c1_i32_66, %arg0 : i32
    %250 = arith.muli %249, %c5_i32 : i32
    %c7_i32_67 = arith.constant 7 : i32
    %251 = arith.subi %c7_i32_67, %c5_i32 : i32
    %252 = arith.muli %arg0, %251 : i32
    %253 = arith.addi %250, %252 : i32
    %254 = arith.index_cast %253 : i32 to index
    %c0_68 = arith.constant 0 : index
    %c0_69 = arith.constant 0 : index
    %255 = vector.load %arg4[%254, %c0_68, %c0_69] : memref<8x2x128xbf16, #tpu.memory_space<vmem>>, vector<1x2x128xbf16>
    %256 = vector.shape_cast %255 : vector<1x2x128xbf16> to vector<2x128xbf16>
    %257 = arith.extf %256 : vector<2x128xbf16> to vector<2x128xf32>
    %258 = arith.truncf %237 : vector<2x32xf32> to vector<2x32xbf16>
    %cst_70 = arith.constant dense<0.000000e+00> : vector<2x128xf32>
    %259 = tpu.matmul %258, %6, %cst_70 {dimension_numbers = #tpu.dot_dimension_numbers<[1], [0], [0], [1], [0, 0, 1, 1], [], []>} : vector<2x32xbf16>, vector<32x128xbf16>, vector<2x128xf32> -> vector<2x128xf32>
    %260 = arith.addf %257, %259 : vector<2x128xf32>
    %261 = vector.extract_strided_slice %260 {offsets = [0, 0], sizes = [2, 32], strides = [1, 1]} : vector<2x128xf32> to vector<2x32xf32>
    %262 = arith.negf %261 : vector<2x32xf32>
    %263 = math.exp %262 : vector<2x32xf32>
    %cst_71 = arith.constant 1.000000e+00 : f32
    %264 = vector.broadcast %cst_71 : f32 to vector<2x32xf32>
    %265 = arith.addf %264, %263 : vector<2x32xf32>
    %266 = arith.divf %264, %265 : vector<2x32xf32>
    %267 = vector.extract_strided_slice %260 {offsets = [0, 32], sizes = [2, 32], strides = [1, 1]} : vector<2x128xf32> to vector<2x32xf32>
    %268 = arith.negf %267 : vector<2x32xf32>
    %269 = math.exp %268 : vector<2x32xf32>
    %cst_72 = arith.constant 1.000000e+00 : f32
    %270 = vector.broadcast %cst_72 : f32 to vector<2x32xf32>
    %271 = arith.addf %270, %269 : vector<2x32xf32>
    %272 = arith.divf %270, %271 : vector<2x32xf32>
    %273 = vector.extract_strided_slice %260 {offsets = [0, 64], sizes = [2, 32], strides = [1, 1]} : vector<2x128xf32> to vector<2x32xf32>
    %274 = math.tanh %273 : vector<2x32xf32>
    %275 = vector.extract_strided_slice %260 {offsets = [0, 96], sizes = [2, 32], strides = [1, 1]} : vector<2x128xf32> to vector<2x32xf32>
    %276 = arith.negf %275 : vector<2x32xf32>
    %277 = math.exp %276 : vector<2x32xf32>
    %cst_73 = arith.constant 1.000000e+00 : f32
    %278 = vector.broadcast %cst_73 : f32 to vector<2x32xf32>
    %279 = arith.addf %278, %277 : vector<2x32xf32>
    %280 = arith.divf %278, %279 : vector<2x32xf32>
    %281 = arith.mulf %272, %235 : vector<2x32xf32>
    %282 = arith.mulf %266, %274 : vector<2x32xf32>
    %283 = arith.addf %281, %282 : vector<2x32xf32>
    %284 = math.tanh %283 : vector<2x32xf32>
    %285 = arith.mulf %280, %284 : vector<2x32xf32>
    %286 = vector.broadcast %4 : f32 to vector<2x32xf32>
    %287 = arith.subf %285, %286 : vector<2x32xf32>
    %cst_74 = arith.constant 0.000000e+00 : f32
    %288 = vector.broadcast %cst_74 : f32 to vector<2x32xf32>
    %289 = arith.cmpf ogt, %287, %288 : vector<2x32xf32>
    %290 = arith.extui %289 : vector<2x32xi1> to vector<2x32xi32>
    %291 = arith.sitofp %290 : vector<2x32xi32> to vector<2x32xf32>
    %292 = arith.truncf %291 : vector<2x32xf32> to vector<2x32xbf16>
    %c0_75 = arith.constant 0 : index
    %293 = arith.index_cast %253 : i32 to index
    %c0_76 = arith.constant 0 : index
    %c0_77 = arith.constant 0 : index
    %294 = vector.load %arg6[%c0_75, %293, %c0_76, %c0_77] : memref<1x8x2x32xbf16, #tpu.memory_space<vmem>>, vector<1x1x2x32xbf16>
    %295 = vector.shape_cast %294 : vector<1x1x2x32xbf16> to vector<2x32xbf16>
    %296 = vector.shape_cast %292 : vector<2x32xbf16> to vector<1x1x2x32xbf16>
    tpu.vector_store %arg6[%c0_75, %293, %c0_76, %c0_77], %296 {strides = array<i32>} : memref<1x8x2x32xbf16, #tpu.memory_space<vmem>>, vector<1x1x2x32xbf16>,
    %c6_i32 = arith.constant 6 : i32
    %c1_i32_78 = arith.constant 1 : i32
    %297 = arith.subi %c1_i32_78, %arg0 : i32
    %298 = arith.muli %297, %c6_i32 : i32
    %c7_i32_79 = arith.constant 7 : i32
    %299 = arith.subi %c7_i32_79, %c6_i32 : i32
    %300 = arith.muli %arg0, %299 : i32
    %301 = arith.addi %298, %300 : i32
    %302 = arith.index_cast %301 : i32 to index
    %c0_80 = arith.constant 0 : index
    %c0_81 = arith.constant 0 : index
    %303 = vector.load %arg4[%302, %c0_80, %c0_81] : memref<8x2x128xbf16, #tpu.memory_space<vmem>>, vector<1x2x128xbf16>
    %304 = vector.shape_cast %303 : vector<1x2x128xbf16> to vector<2x128xbf16>
    %305 = arith.extf %304 : vector<2x128xbf16> to vector<2x128xf32>
    %306 = arith.truncf %285 : vector<2x32xf32> to vector<2x32xbf16>
    %cst_82 = arith.constant dense<0.000000e+00> : vector<2x128xf32>
    %307 = tpu.matmul %306, %6, %cst_82 {dimension_numbers = #tpu.dot_dimension_numbers<[1], [0], [0], [1], [0, 0, 1, 1], [], []>} : vector<2x32xbf16>, vector<32x128xbf16>, vector<2x128xf32> -> vector<2x128xf32>
    %308 = arith.addf %305, %307 : vector<2x128xf32>
    %309 = vector.extract_strided_slice %308 {offsets = [0, 0], sizes = [2, 32], strides = [1, 1]} : vector<2x128xf32> to vector<2x32xf32>
    %310 = arith.negf %309 : vector<2x32xf32>
    %311 = math.exp %310 : vector<2x32xf32>
    %cst_83 = arith.constant 1.000000e+00 : f32
    %312 = vector.broadcast %cst_83 : f32 to vector<2x32xf32>
    %313 = arith.addf %312, %311 : vector<2x32xf32>
    %314 = arith.divf %312, %313 : vector<2x32xf32>
    %315 = vector.extract_strided_slice %308 {offsets = [0, 32], sizes = [2, 32], strides = [1, 1]} : vector<2x128xf32> to vector<2x32xf32>
    %316 = arith.negf %315 : vector<2x32xf32>
    %317 = math.exp %316 : vector<2x32xf32>
    %cst_84 = arith.constant 1.000000e+00 : f32
    %318 = vector.broadcast %cst_84 : f32 to vector<2x32xf32>
    %319 = arith.addf %318, %317 : vector<2x32xf32>
    %320 = arith.divf %318, %319 : vector<2x32xf32>
    %321 = vector.extract_strided_slice %308 {offsets = [0, 64], sizes = [2, 32], strides = [1, 1]} : vector<2x128xf32> to vector<2x32xf32>
    %322 = math.tanh %321 : vector<2x32xf32>
    %323 = vector.extract_strided_slice %308 {offsets = [0, 96], sizes = [2, 32], strides = [1, 1]} : vector<2x128xf32> to vector<2x32xf32>
    %324 = arith.negf %323 : vector<2x32xf32>
    %325 = math.exp %324 : vector<2x32xf32>
    %cst_85 = arith.constant 1.000000e+00 : f32
    %326 = vector.broadcast %cst_85 : f32 to vector<2x32xf32>
    %327 = arith.addf %326, %325 : vector<2x32xf32>
    %328 = arith.divf %326, %327 : vector<2x32xf32>
    %329 = arith.mulf %320, %283 : vector<2x32xf32>
    %330 = arith.mulf %314, %322 : vector<2x32xf32>
    %331 = arith.addf %329, %330 : vector<2x32xf32>
    %332 = math.tanh %331 : vector<2x32xf32>
    %333 = arith.mulf %328, %332 : vector<2x32xf32>
    %334 = vector.broadcast %4 : f32 to vector<2x32xf32>
    %335 = arith.subf %333, %334 : vector<2x32xf32>
    %cst_86 = arith.constant 0.000000e+00 : f32
    %336 = vector.broadcast %cst_86 : f32 to vector<2x32xf32>
    %337 = arith.cmpf ogt, %335, %336 : vector<2x32xf32>
    %338 = arith.extui %337 : vector<2x32xi1> to vector<2x32xi32>
    %339 = arith.sitofp %338 : vector<2x32xi32> to vector<2x32xf32>
    %340 = arith.truncf %339 : vector<2x32xf32> to vector<2x32xbf16>
    %c0_87 = arith.constant 0 : index
    %341 = arith.index_cast %301 : i32 to index
    %c0_88 = arith.constant 0 : index
    %c0_89 = arith.constant 0 : index
    %342 = vector.load %arg6[%c0_87, %341, %c0_88, %c0_89] : memref<1x8x2x32xbf16, #tpu.memory_space<vmem>>, vector<1x1x2x32xbf16>
    %343 = vector.shape_cast %342 : vector<1x1x2x32xbf16> to vector<2x32xbf16>
    %344 = vector.shape_cast %340 : vector<2x32xbf16> to vector<1x1x2x32xbf16>
    tpu.vector_store %arg6[%c0_87, %341, %c0_88, %c0_89], %344 {strides = array<i32>} : memref<1x8x2x32xbf16, #tpu.memory_space<vmem>>, vector<1x1x2x32xbf16>,
    %c7_i32_90 = arith.constant 7 : i32
    %c1_i32_91 = arith.constant 1 : i32
    %345 = arith.subi %c1_i32_91, %arg0 : i32
    %346 = arith.muli %345, %c7_i32_90 : i32
    %c7_i32_92 = arith.constant 7 : i32
    %347 = arith.subi %c7_i32_92, %c7_i32_90 : i32
    %348 = arith.muli %arg0, %347 : i32
    %349 = arith.addi %346, %348 : i32
    %350 = arith.index_cast %349 : i32 to index
    %c0_93 = arith.constant 0 : index
    %c0_94 = arith.constant 0 : index
    %351 = vector.load %arg4[%350, %c0_93, %c0_94] : memref<8x2x128xbf16, #tpu.memory_space<vmem>>, vector<1x2x128xbf16>
    %352 = vector.shape_cast %351 : vector<1x2x128xbf16> to vector<2x128xbf16>
    %353 = arith.extf %352 : vector<2x128xbf16> to vector<2x128xf32>
    %354 = arith.truncf %333 : vector<2x32xf32> to vector<2x32xbf16>
    %cst_95 = arith.constant dense<0.000000e+00> : vector<2x128xf32>
    %355 = tpu.matmul %354, %6, %cst_95 {dimension_numbers = #tpu.dot_dimension_numbers<[1], [0], [0], [1], [0, 0, 1, 1], [], []>} : vector<2x32xbf16>, vector<32x128xbf16>, vector<2x128xf32> -> vector<2x128xf32>
    %356 = arith.addf %353, %355 : vector<2x128xf32>
    %357 = vector.extract_strided_slice %356 {offsets = [0, 0], sizes = [2, 32], strides = [1, 1]} : vector<2x128xf32> to vector<2x32xf32>
    %358 = arith.negf %357 : vector<2x32xf32>
    %359 = math.exp %358 : vector<2x32xf32>
    %cst_96 = arith.constant 1.000000e+00 : f32
    %360 = vector.broadcast %cst_96 : f32 to vector<2x32xf32>
    %361 = arith.addf %360, %359 : vector<2x32xf32>
    %362 = arith.divf %360, %361 : vector<2x32xf32>
    %363 = vector.extract_strided_slice %356 {offsets = [0, 32], sizes = [2, 32], strides = [1, 1]} : vector<2x128xf32> to vector<2x32xf32>
    %364 = arith.negf %363 : vector<2x32xf32>
    %365 = math.exp %364 : vector<2x32xf32>
    %cst_97 = arith.constant 1.000000e+00 : f32
    %366 = vector.broadcast %cst_97 : f32 to vector<2x32xf32>
    %367 = arith.addf %366, %365 : vector<2x32xf32>
    %368 = arith.divf %366, %367 : vector<2x32xf32>
    %369 = vector.extract_strided_slice %356 {offsets = [0, 64], sizes = [2, 32], strides = [1, 1]} : vector<2x128xf32> to vector<2x32xf32>
    %370 = math.tanh %369 : vector<2x32xf32>
    %371 = vector.extract_strided_slice %356 {offsets = [0, 96], sizes = [2, 32], strides = [1, 1]} : vector<2x128xf32> to vector<2x32xf32>
    %372 = arith.negf %371 : vector<2x32xf32>
    %373 = math.exp %372 : vector<2x32xf32>
    %cst_98 = arith.constant 1.000000e+00 : f32
    %374 = vector.broadcast %cst_98 : f32 to vector<2x32xf32>
    %375 = arith.addf %374, %373 : vector<2x32xf32>
    %376 = arith.divf %374, %375 : vector<2x32xf32>
    %377 = arith.mulf %368, %331 : vector<2x32xf32>
    %378 = arith.mulf %362, %370 : vector<2x32xf32>
    %379 = arith.addf %377, %378 : vector<2x32xf32>
    %380 = math.tanh %379 : vector<2x32xf32>
    %381 = arith.mulf %376, %380 : vector<2x32xf32>
    %382 = vector.broadcast %4 : f32 to vector<2x32xf32>
    %383 = arith.subf %381, %382 : vector<2x32xf32>
    %cst_99 = arith.constant 0.000000e+00 : f32
    %384 = vector.broadcast %cst_99 : f32 to vector<2x32xf32>
    %385 = arith.cmpf ogt, %383, %384 : vector<2x32xf32>
    %386 = arith.extui %385 : vector<2x32xi1> to vector<2x32xi32>
    %387 = arith.sitofp %386 : vector<2x32xi32> to vector<2x32xf32>
    %388 = arith.truncf %387 : vector<2x32xf32> to vector<2x32xbf16>
    %c0_100 = arith.constant 0 : index
    %389 = arith.index_cast %349 : i32 to index
    %c0_101 = arith.constant 0 : index
    %c0_102 = arith.constant 0 : index
    %390 = vector.load %arg6[%c0_100, %389, %c0_101, %c0_102] : memref<1x8x2x32xbf16, #tpu.memory_space<vmem>>, vector<1x1x2x32xbf16>
    %391 = vector.shape_cast %390 : vector<1x1x2x32xbf16> to vector<2x32xbf16>
    %392 = vector.shape_cast %388 : vector<2x32xbf16> to vector<1x1x2x32xbf16>
    tpu.vector_store %arg6[%c0_100, %389, %c0_101, %c0_102], %392 {strides = array<i32>} : memref<1x8x2x32xbf16, #tpu.memory_space<vmem>>, vector<1x1x2x32xbf16>,
    %c8_i32 = arith.constant 8 : i32
    %c0_103 = arith.constant 0 : index
    %c0_104 = arith.constant 0 : index
    %393 = vector.load %arg7[%c0_103, %c0_104] : memref<2x32xf32, #tpu.memory_space<vmem>>, vector<2x32xf32>
    tpu.vector_store %arg7[%c0_103, %c0_104], %379 {strides = array<i32>} : memref<2x32xf32, #tpu.memory_space<vmem>>, vector<2x32xf32>,
    %c0_105 = arith.constant 0 : index
    %c0_106 = arith.constant 0 : index
    %394 = vector.load %arg8[%c0_105, %c0_106] : memref<2x32xf32, #tpu.memory_space<vmem>>, vector<2x32xf32>
    tpu.vector_store %arg8[%c0_105, %c0_106], %381 {strides = array<i32>} : memref<2x32xf32, #tpu.memory_space<vmem>>, vector<2x32xf32>,
    return
  }
  func.func @transform_0(%arg0: i32, %arg1: i32, %arg2: i32) -> i32 {
    %c0_i32 = arith.constant 0 : i32
    %c0_i32_0 = arith.constant 0 : i32
    return %c0_i32 : i32
  }
  func.func @transform_1(%arg0: i32, %arg1: i32, %arg2: i32) -> (i32, i32, i32) {
    %c1_i32 = arith.constant 1 : i32
    %0 = arith.subi %c1_i32, %arg0 : i32
    %1 = arith.muli %0, %arg2 : i32
    %c0_i32 = arith.constant 0 : i32
    %2 = arith.subi %c0_i32, %arg2 : i32
    %3 = arith.muli %arg0, %2 : i32
    %4 = arith.addi %1, %3 : i32
    %c0_i32_0 = arith.constant 0 : i32
    return %4, %arg1, %arg0 : i32, i32, i32
  }
  func.func @transform_2(%arg0: i32, %arg1: i32, %arg2: i32) -> (i32, i32, i32) {
    %c0_i32 = arith.constant 0 : i32
    %c0_i32_0 = arith.constant 0 : i32
    %c0_i32_1 = arith.constant 0 : i32
    return %arg0, %c0_i32, %c0_i32_0 : i32, i32, i32
  }
  func.func @transform_3(%arg0: i32, %arg1: i32, %arg2: i32) -> (i32, i32, i32, i32) {
    %c1_i32 = arith.constant 1 : i32
    %0 = arith.subi %c1_i32, %arg0 : i32
    %1 = arith.muli %0, %arg2 : i32
    %c0_i32 = arith.constant 0 : i32
    %2 = arith.subi %c0_i32, %arg2 : i32
    %3 = arith.muli %arg0, %2 : i32
    %4 = arith.addi %1, %3 : i32
    %c0_i32_0 = arith.constant 0 : i32
    %c0_i32_1 = arith.constant 0 : i32
    return %arg0, %4, %arg1, %c0_i32_0 : i32, i32, i32, i32
  }
}

module attributes {stable_mosaic.version = 11 : i64} {
  func.func @post_kernel(%arg0: i32, %arg1: memref<16x32xbf16, #tpu.memory_space<vmem>>, %arg2: memref<16x16xbf16, #tpu.memory_space<vmem>>, %arg3: memref<32x32xbf16, #tpu.memory_space<vmem>>, %arg4: memref<16x32xbf16, #tpu.memory_space<vmem>>, %arg5: memref<1x32xf32, #tpu.memory_space<vmem>>, %arg6: memref<1x1xf32, #tpu.memory_space<vmem>>, %arg7: memref<1x32xf32, #tpu.memory_space<vmem>>, %arg8: memref<1x32xf32, #tpu.memory_space<vmem>>, %arg9: memref<16x32xf32, #tpu.memory_space<vmem>>) attributes {dimension_semantics = [#tpu.dimension_semantics<parallel>], iteration_bounds = array<i64: 1>, scalar_prefetch = 0 : i64, scratch_operands = 0 : i64, tpu.core_type = #tpu.core_type<tc>, window_params = [{transform_indices = @transform_0, window_bounds = array<i64: 16, 32>}, {transform_indices = @transform_1, window_bounds = array<i64: 16, 16>}, {pipeline_mode = #tpu.pipeline_mode<synchronous>, transform_indices = @transform_2, window_bounds = array<i64: 32, 32>}, {pipeline_mode = #tpu.pipeline_mode<synchronous>, transform_indices = @transform_3, window_bounds = array<i64: 16, 32>}, {pipeline_mode = #tpu.pipeline_mode<synchronous>, transform_indices = @transform_4, window_bounds = array<i64: 1, 32>}, {pipeline_mode = #tpu.pipeline_mode<synchronous>, transform_indices = @transform_5, window_bounds = array<i64: 1, 1>}, {pipeline_mode = #tpu.pipeline_mode<synchronous>, transform_indices = @transform_6, window_bounds = array<i64: 1, 32>}, {pipeline_mode = #tpu.pipeline_mode<synchronous>, transform_indices = @transform_7, window_bounds = array<i64: 1, 32>}, {transform_indices = @transform_8, window_bounds = array<i64: 16, 32>}]} {
    %c0 = arith.constant 0 : index
    %c0_0 = arith.constant 0 : index
    %0 = vector.load %arg1[%c0, %c0_0] : memref<16x32xbf16, #tpu.memory_space<vmem>>, vector<16x32xbf16>
    %c0_1 = arith.constant 0 : index
    %c0_2 = arith.constant 0 : index
    %1 = vector.load %arg3[%c0_1, %c0_2] : memref<32x32xbf16, #tpu.memory_space<vmem>>, vector<32x32xbf16>
    %cst = arith.constant dense<0.000000e+00> : vector<16x32xf32>
    %2 = tpu.matmul %0, %1, %cst {dimension_numbers = #tpu.dot_dimension_numbers<[1], [0], [0], [1], [0, 0, 1, 1], [], []>} : vector<16x32xbf16>, vector<32x32xbf16>, vector<16x32xf32> -> vector<16x32xf32>
    %c0_3 = arith.constant 0 : index
    %c0_4 = arith.constant 0 : index
    %3 = vector.load %arg2[%c0_3, %c0_4] : memref<16x16xbf16, #tpu.memory_space<vmem>>, vector<16x16xbf16>
    %c0_5 = arith.constant 0 : index
    %c0_6 = arith.constant 0 : index
    %4 = vector.load %arg4[%c0_5, %c0_6] : memref<16x32xbf16, #tpu.memory_space<vmem>>, vector<16x32xbf16>
    %cst_7 = arith.constant dense<0.000000e+00> : vector<16x32xf32>
    %5 = tpu.matmul %3, %4, %cst_7 {dimension_numbers = #tpu.dot_dimension_numbers<[1], [0], [0], [1], [0, 0, 1, 1], [], []>} : vector<16x16xbf16>, vector<16x32xbf16>, vector<16x32xf32> -> vector<16x32xf32>
    %6 = arith.addf %2, %5 : vector<16x32xf32>
    %c0_8 = arith.constant 0 : index
    %c0_9 = arith.constant 0 : index
    %7 = vector.load %arg5[%c0_8, %c0_9] : memref<1x32xf32, #tpu.memory_space<vmem>>, vector<1x32xf32>
    %8 = vector.broadcast %7 : vector<1x32xf32> to vector<16x32xf32>
    %9 = arith.addf %6, %8 : vector<16x32xf32>
    %c0_10 = arith.constant 0 : index
    %c0_11 = arith.constant 0 : index
    %10 = vector.load %arg7[%c0_10, %c0_11] : memref<1x32xf32, #tpu.memory_space<vmem>>, vector<1x32xf32>
    %c0_12 = arith.constant 0 : index
    %c0_13 = arith.constant 0 : index
    %11 = vector.load %arg6[%c0_12, %c0_13] : memref<1x1xf32, #tpu.memory_space<vmem>>, vector<1x1xf32>
    %12 = vector.broadcast %11 : vector<1x1xf32> to vector<16x32xf32>
    %13 = arith.mulf %12, %9 : vector<16x32xf32>
    %14 = math.tanh %13 : vector<16x32xf32>
    %15 = vector.broadcast %10 : vector<1x32xf32> to vector<16x32xf32>
    %16 = arith.mulf %15, %14 : vector<16x32xf32>
    %c0_14 = arith.constant 0 : index
    %c0_15 = arith.constant 0 : index
    %17 = vector.load %arg8[%c0_14, %c0_15] : memref<1x32xf32, #tpu.memory_space<vmem>>, vector<1x32xf32>
    %18 = vector.broadcast %17 : vector<1x32xf32> to vector<16x32xf32>
    %19 = arith.addf %16, %18 : vector<16x32xf32>
    %c0_16 = arith.constant 0 : index
    %c0_17 = arith.constant 0 : index
    %20 = vector.load %arg9[%c0_16, %c0_17] : memref<16x32xf32, #tpu.memory_space<vmem>>, vector<16x32xf32>
    tpu.vector_store %arg9[%c0_16, %c0_17], %19 {strides = array<i32>} : memref<16x32xf32, #tpu.memory_space<vmem>>, vector<16x32xf32>,
    return
  }
  func.func @transform_0(%arg0: i32) -> (i32, i32) {
    %c0_i32 = arith.constant 0 : i32
    %c0_i32_0 = arith.constant 0 : i32
    return %arg0, %c0_i32 : i32, i32
  }
  func.func @transform_1(%arg0: i32) -> (i32, i32) {
    %c0_i32 = arith.constant 0 : i32
    %c0_i32_0 = arith.constant 0 : i32
    return %arg0, %c0_i32 : i32, i32
  }
  func.func @transform_2(%arg0: i32) -> (i32, i32) {
    %c0_i32 = arith.constant 0 : i32
    %c0_i32_0 = arith.constant 0 : i32
    %c0_i32_1 = arith.constant 0 : i32
    return %c0_i32, %c0_i32_0 : i32, i32
  }
  func.func @transform_3(%arg0: i32) -> (i32, i32) {
    %c0_i32 = arith.constant 0 : i32
    %c0_i32_0 = arith.constant 0 : i32
    %c0_i32_1 = arith.constant 0 : i32
    return %c0_i32, %c0_i32_0 : i32, i32
  }
  func.func @transform_4(%arg0: i32) -> (i32, i32) {
    %c0_i32 = arith.constant 0 : i32
    %c0_i32_0 = arith.constant 0 : i32
    %c0_i32_1 = arith.constant 0 : i32
    return %c0_i32, %c0_i32_0 : i32, i32
  }
  func.func @transform_5(%arg0: i32) -> (i32, i32) {
    %c0_i32 = arith.constant 0 : i32
    %c0_i32_0 = arith.constant 0 : i32
    %c0_i32_1 = arith.constant 0 : i32
    return %c0_i32, %c0_i32_0 : i32, i32
  }
  func.func @transform_6(%arg0: i32) -> (i32, i32) {
    %c0_i32 = arith.constant 0 : i32
    %c0_i32_0 = arith.constant 0 : i32
    %c0_i32_1 = arith.constant 0 : i32
    return %c0_i32, %c0_i32_0 : i32, i32
  }
  func.func @transform_7(%arg0: i32) -> (i32, i32) {
    %c0_i32 = arith.constant 0 : i32
    %c0_i32_0 = arith.constant 0 : i32
    %c0_i32_1 = arith.constant 0 : i32
    return %c0_i32, %c0_i32_0 : i32, i32
  }
  func.func @transform_8(%arg0: i32) -> (i32, i32) {
    %c0_i32 = arith.constant 0 : i32
    %c0_i32_0 = arith.constant 0 : i32
    return %arg0, %c0_i32 : i32, i32
  }
}

module attributes {stable_mosaic.version = 11 : i64} {
  func.func @kernel(%arg0: i32, %arg1: i32, %arg2: i32, %arg3: memref<1xf32, #tpu.memory_space<smem>>, %arg4: memref<8x2x128xbf16, #tpu.memory_space<vmem>>, %arg5: memref<1x32x128xbf16, #tpu.memory_space<vmem>>, %arg6: memref<1x8x2x32xbf16, #tpu.memory_space<vmem>>, %arg7: memref<1x8x2x32xf32, #tpu.memory_space<vmem>>, %arg8: memref<1x8x2x32xf32, #tpu.memory_space<vmem>>, %arg9: memref<2x32xf32, #tpu.memory_space<vmem>>, %arg10: memref<2x32xf32, #tpu.memory_space<vmem>>) attributes {dimension_semantics = [#tpu.dimension_semantics<parallel>, #tpu.dimension_semantics<parallel>, #tpu.dimension_semantics<arbitrary>], iteration_bounds = array<i64: 1, 1, 1>, scalar_prefetch = 0 : i64, scratch_operands = 2 : i64, tpu.core_type = #tpu.core_type<tc>, window_params = [{transform_indices = @transform_0, window_bounds = array<i64: 1>}, {transform_indices = @transform_1, window_bounds = array<i64: 8, 2, 128>}, {transform_indices = @transform_2, window_bounds = array<i64: 1, 32, 128>}, {transform_indices = @transform_3, window_bounds = array<i64: 1, 8, 2, 32>}, {transform_indices = @transform_4, window_bounds = array<i64: 1, 8, 2, 32>}, {transform_indices = @transform_5, window_bounds = array<i64: 1, 8, 2, 32>}]} {
    %c0_i32 = arith.constant 0 : i32
    %0 = arith.cmpi eq, %arg2, %c0_i32 : i32
    %1 = arith.extui %0 : i1 to i32
    %c0_i32_0 = arith.constant 0 : i32
    %2 = arith.cmpi ne, %1, %c0_i32_0 : i32
    scf.if %2 {
      %cst_155 = arith.constant 0.000000e+00 : f32
      %459 = vector.broadcast %cst_155 : f32 to vector<2x32xf32>
      %c0_156 = arith.constant 0 : index
      %c0_157 = arith.constant 0 : index
      %460 = vector.load %arg9[%c0_156, %c0_157] : memref<2x32xf32, #tpu.memory_space<vmem>>, vector<2x32xf32>
      tpu.vector_store %arg9[%c0_156, %c0_157], %459 {strides = array<i32>} : memref<2x32xf32, #tpu.memory_space<vmem>>, vector<2x32xf32>,
      %cst_158 = arith.constant 0.000000e+00 : f32
      %461 = vector.broadcast %cst_158 : f32 to vector<2x32xf32>
      %c0_159 = arith.constant 0 : index
      %c0_160 = arith.constant 0 : index
      %462 = vector.load %arg10[%c0_159, %c0_160] : memref<2x32xf32, #tpu.memory_space<vmem>>, vector<2x32xf32>
      tpu.vector_store %arg10[%c0_159, %c0_160], %461 {strides = array<i32>} : memref<2x32xf32, #tpu.memory_space<vmem>>, vector<2x32xf32>,
    } else {
    }
    %3 = arith.index_cast %arg0 : i32 to index
    %4 = memref.load %arg3[%3] : memref<1xf32, #tpu.memory_space<smem>>
    %c0 = arith.constant 0 : index
    %c0_1 = arith.constant 0 : index
    %c0_2 = arith.constant 0 : index
    %5 = vector.load %arg5[%c0, %c0_1, %c0_2] : memref<1x32x128xbf16, #tpu.memory_space<vmem>>, vector<1x32x128xbf16>
    %6 = vector.shape_cast %5 : vector<1x32x128xbf16> to vector<32x128xbf16>
    %c0_3 = arith.constant 0 : index
    %c0_4 = arith.constant 0 : index
    %7 = vector.load %arg9[%c0_3, %c0_4] : memref<2x32xf32, #tpu.memory_space<vmem>>, vector<2x32xf32>
    %c0_5 = arith.constant 0 : index
    %c0_6 = arith.constant 0 : index
    %8 = vector.load %arg10[%c0_5, %c0_6] : memref<2x32xf32, #tpu.memory_space<vmem>>, vector<2x32xf32>
    %c0_i32_7 = arith.constant 0 : i32
    %c1_i32 = arith.constant 1 : i32
    %9 = arith.subi %c1_i32, %arg0 : i32
    %10 = arith.muli %9, %c0_i32_7 : i32
    %c7_i32 = arith.constant 7 : i32
    %11 = arith.subi %c7_i32, %c0_i32_7 : i32
    %12 = arith.muli %arg0, %11 : i32
    %13 = arith.addi %10, %12 : i32
    %14 = arith.index_cast %13 : i32 to index
    %c0_8 = arith.constant 0 : index
    %c0_9 = arith.constant 0 : index
    %15 = vector.load %arg4[%14, %c0_8, %c0_9] : memref<8x2x128xbf16, #tpu.memory_space<vmem>>, vector<1x2x128xbf16>
    %16 = vector.shape_cast %15 : vector<1x2x128xbf16> to vector<2x128xbf16>
    %17 = arith.extf %16 : vector<2x128xbf16> to vector<2x128xf32>
    %18 = arith.truncf %8 : vector<2x32xf32> to vector<2x32xbf16>
    %cst = arith.constant dense<0.000000e+00> : vector<2x128xf32>
    %19 = tpu.matmul %18, %6, %cst {dimension_numbers = #tpu.dot_dimension_numbers<[1], [0], [0], [1], [0, 0, 1, 1], [], []>} : vector<2x32xbf16>, vector<32x128xbf16>, vector<2x128xf32> -> vector<2x128xf32>
    %20 = arith.addf %17, %19 : vector<2x128xf32>
    %21 = vector.extract_strided_slice %20 {offsets = [0, 0], sizes = [2, 32], strides = [1, 1]} : vector<2x128xf32> to vector<2x32xf32>
    %22 = arith.negf %21 : vector<2x32xf32>
    %23 = math.exp %22 : vector<2x32xf32>
    %cst_10 = arith.constant 1.000000e+00 : f32
    %24 = vector.broadcast %cst_10 : f32 to vector<2x32xf32>
    %25 = arith.addf %24, %23 : vector<2x32xf32>
    %26 = arith.divf %24, %25 : vector<2x32xf32>
    %27 = vector.extract_strided_slice %20 {offsets = [0, 32], sizes = [2, 32], strides = [1, 1]} : vector<2x128xf32> to vector<2x32xf32>
    %28 = arith.negf %27 : vector<2x32xf32>
    %29 = math.exp %28 : vector<2x32xf32>
    %cst_11 = arith.constant 1.000000e+00 : f32
    %30 = vector.broadcast %cst_11 : f32 to vector<2x32xf32>
    %31 = arith.addf %30, %29 : vector<2x32xf32>
    %32 = arith.divf %30, %31 : vector<2x32xf32>
    %33 = vector.extract_strided_slice %20 {offsets = [0, 64], sizes = [2, 32], strides = [1, 1]} : vector<2x128xf32> to vector<2x32xf32>
    %34 = math.tanh %33 : vector<2x32xf32>
    %35 = vector.extract_strided_slice %20 {offsets = [0, 96], sizes = [2, 32], strides = [1, 1]} : vector<2x128xf32> to vector<2x32xf32>
    %36 = arith.negf %35 : vector<2x32xf32>
    %37 = math.exp %36 : vector<2x32xf32>
    %cst_12 = arith.constant 1.000000e+00 : f32
    %38 = vector.broadcast %cst_12 : f32 to vector<2x32xf32>
    %39 = arith.addf %38, %37 : vector<2x32xf32>
    %40 = arith.divf %38, %39 : vector<2x32xf32>
    %41 = arith.mulf %32, %7 : vector<2x32xf32>
    %42 = arith.mulf %26, %34 : vector<2x32xf32>
    %43 = arith.addf %41, %42 : vector<2x32xf32>
    %44 = math.tanh %43 : vector<2x32xf32>
    %45 = arith.mulf %40, %44 : vector<2x32xf32>
    %46 = vector.broadcast %4 : f32 to vector<2x32xf32>
    %47 = arith.subf %45, %46 : vector<2x32xf32>
    %cst_13 = arith.constant 0.000000e+00 : f32
    %48 = vector.broadcast %cst_13 : f32 to vector<2x32xf32>
    %49 = arith.cmpf ogt, %47, %48 : vector<2x32xf32>
    %50 = arith.extui %49 : vector<2x32xi1> to vector<2x32xi32>
    %51 = arith.sitofp %50 : vector<2x32xi32> to vector<2x32xf32>
    %52 = arith.truncf %51 : vector<2x32xf32> to vector<2x32xbf16>
    %c0_14 = arith.constant 0 : index
    %53 = arith.index_cast %13 : i32 to index
    %c0_15 = arith.constant 0 : index
    %c0_16 = arith.constant 0 : index
    %54 = vector.load %arg6[%c0_14, %53, %c0_15, %c0_16] : memref<1x8x2x32xbf16, #tpu.memory_space<vmem>>, vector<1x1x2x32xbf16>
    %55 = vector.shape_cast %54 : vector<1x1x2x32xbf16> to vector<2x32xbf16>
    %56 = vector.shape_cast %52 : vector<2x32xbf16> to vector<1x1x2x32xbf16>
    tpu.vector_store %arg6[%c0_14, %53, %c0_15, %c0_16], %56 {strides = array<i32>} : memref<1x8x2x32xbf16, #tpu.memory_space<vmem>>, vector<1x1x2x32xbf16>,
    %c0_17 = arith.constant 0 : index
    %57 = arith.index_cast %13 : i32 to index
    %c0_18 = arith.constant 0 : index
    %c0_19 = arith.constant 0 : index
    %58 = vector.load %arg7[%c0_17, %57, %c0_18, %c0_19] : memref<1x8x2x32xf32, #tpu.memory_space<vmem>>, vector<1x1x2x32xf32>
    %59 = vector.shape_cast %58 : vector<1x1x2x32xf32> to vector<2x32xf32>
    %60 = vector.shape_cast %43 : vector<2x32xf32> to vector<1x1x2x32xf32>
    tpu.vector_store %arg7[%c0_17, %57, %c0_18, %c0_19], %60 {strides = array<i32>} : memref<1x8x2x32xf32, #tpu.memory_space<vmem>>, vector<1x1x2x32xf32>,
    %c0_20 = arith.constant 0 : index
    %61 = arith.index_cast %13 : i32 to index
    %c0_21 = arith.constant 0 : index
    %c0_22 = arith.constant 0 : index
    %62 = vector.load %arg8[%c0_20, %61, %c0_21, %c0_22] : memref<1x8x2x32xf32, #tpu.memory_space<vmem>>, vector<1x1x2x32xf32>
    %63 = vector.shape_cast %62 : vector<1x1x2x32xf32> to vector<2x32xf32>
    %64 = vector.shape_cast %45 : vector<2x32xf32> to vector<1x1x2x32xf32>
    tpu.vector_store %arg8[%c0_20, %61, %c0_21, %c0_22], %64 {strides = array<i32>} : memref<1x8x2x32xf32, #tpu.memory_space<vmem>>, vector<1x1x2x32xf32>,
    %c1_i32_23 = arith.constant 1 : i32
    %c1_i32_24 = arith.constant 1 : i32
    %65 = arith.subi %c1_i32_24, %arg0 : i32
    %66 = arith.muli %65, %c1_i32_23 : i32
    %c7_i32_25 = arith.constant 7 : i32
    %67 = arith.subi %c7_i32_25, %c1_i32_23 : i32
    %68 = arith.muli %arg0, %67 : i32
    %69 = arith.addi %66, %68 : i32
    %70 = arith.index_cast %69 : i32 to index
    %c0_26 = arith.constant 0 : index
    %c0_27 = arith.constant 0 : index
    %71 = vector.load %arg4[%70, %c0_26, %c0_27] : memref<8x2x128xbf16, #tpu.memory_space<vmem>>, vector<1x2x128xbf16>
    %72 = vector.shape_cast %71 : vector<1x2x128xbf16> to vector<2x128xbf16>
    %73 = arith.extf %72 : vector<2x128xbf16> to vector<2x128xf32>
    %74 = arith.truncf %45 : vector<2x32xf32> to vector<2x32xbf16>
    %cst_28 = arith.constant dense<0.000000e+00> : vector<2x128xf32>
    %75 = tpu.matmul %74, %6, %cst_28 {dimension_numbers = #tpu.dot_dimension_numbers<[1], [0], [0], [1], [0, 0, 1, 1], [], []>} : vector<2x32xbf16>, vector<32x128xbf16>, vector<2x128xf32> -> vector<2x128xf32>
    %76 = arith.addf %73, %75 : vector<2x128xf32>
    %77 = vector.extract_strided_slice %76 {offsets = [0, 0], sizes = [2, 32], strides = [1, 1]} : vector<2x128xf32> to vector<2x32xf32>
    %78 = arith.negf %77 : vector<2x32xf32>
    %79 = math.exp %78 : vector<2x32xf32>
    %cst_29 = arith.constant 1.000000e+00 : f32
    %80 = vector.broadcast %cst_29 : f32 to vector<2x32xf32>
    %81 = arith.addf %80, %79 : vector<2x32xf32>
    %82 = arith.divf %80, %81 : vector<2x32xf32>
    %83 = vector.extract_strided_slice %76 {offsets = [0, 32], sizes = [2, 32], strides = [1, 1]} : vector<2x128xf32> to vector<2x32xf32>
    %84 = arith.negf %83 : vector<2x32xf32>
    %85 = math.exp %84 : vector<2x32xf32>
    %cst_30 = arith.constant 1.000000e+00 : f32
    %86 = vector.broadcast %cst_30 : f32 to vector<2x32xf32>
    %87 = arith.addf %86, %85 : vector<2x32xf32>
    %88 = arith.divf %86, %87 : vector<2x32xf32>
    %89 = vector.extract_strided_slice %76 {offsets = [0, 64], sizes = [2, 32], strides = [1, 1]} : vector<2x128xf32> to vector<2x32xf32>
    %90 = math.tanh %89 : vector<2x32xf32>
    %91 = vector.extract_strided_slice %76 {offsets = [0, 96], sizes = [2, 32], strides = [1, 1]} : vector<2x128xf32> to vector<2x32xf32>
    %92 = arith.negf %91 : vector<2x32xf32>
    %93 = math.exp %92 : vector<2x32xf32>
    %cst_31 = arith.constant 1.000000e+00 : f32
    %94 = vector.broadcast %cst_31 : f32 to vector<2x32xf32>
    %95 = arith.addf %94, %93 : vector<2x32xf32>
    %96 = arith.divf %94, %95 : vector<2x32xf32>
    %97 = arith.mulf %88, %43 : vector<2x32xf32>
    %98 = arith.mulf %82, %90 : vector<2x32xf32>
    %99 = arith.addf %97, %98 : vector<2x32xf32>
    %100 = math.tanh %99 : vector<2x32xf32>
    %101 = arith.mulf %96, %100 : vector<2x32xf32>
    %102 = vector.broadcast %4 : f32 to vector<2x32xf32>
    %103 = arith.subf %101, %102 : vector<2x32xf32>
    %cst_32 = arith.constant 0.000000e+00 : f32
    %104 = vector.broadcast %cst_32 : f32 to vector<2x32xf32>
    %105 = arith.cmpf ogt, %103, %104 : vector<2x32xf32>
    %106 = arith.extui %105 : vector<2x32xi1> to vector<2x32xi32>
    %107 = arith.sitofp %106 : vector<2x32xi32> to vector<2x32xf32>
    %108 = arith.truncf %107 : vector<2x32xf32> to vector<2x32xbf16>
    %c0_33 = arith.constant 0 : index
    %109 = arith.index_cast %69 : i32 to index
    %c0_34 = arith.constant 0 : index
    %c0_35 = arith.constant 0 : index
    %110 = vector.load %arg6[%c0_33, %109, %c0_34, %c0_35] : memref<1x8x2x32xbf16, #tpu.memory_space<vmem>>, vector<1x1x2x32xbf16>
    %111 = vector.shape_cast %110 : vector<1x1x2x32xbf16> to vector<2x32xbf16>
    %112 = vector.shape_cast %108 : vector<2x32xbf16> to vector<1x1x2x32xbf16>
    tpu.vector_store %arg6[%c0_33, %109, %c0_34, %c0_35], %112 {strides = array<i32>} : memref<1x8x2x32xbf16, #tpu.memory_space<vmem>>, vector<1x1x2x32xbf16>,
    %c0_36 = arith.constant 0 : index
    %113 = arith.index_cast %69 : i32 to index
    %c0_37 = arith.constant 0 : index
    %c0_38 = arith.constant 0 : index
    %114 = vector.load %arg7[%c0_36, %113, %c0_37, %c0_38] : memref<1x8x2x32xf32, #tpu.memory_space<vmem>>, vector<1x1x2x32xf32>
    %115 = vector.shape_cast %114 : vector<1x1x2x32xf32> to vector<2x32xf32>
    %116 = vector.shape_cast %99 : vector<2x32xf32> to vector<1x1x2x32xf32>
    tpu.vector_store %arg7[%c0_36, %113, %c0_37, %c0_38], %116 {strides = array<i32>} : memref<1x8x2x32xf32, #tpu.memory_space<vmem>>, vector<1x1x2x32xf32>,
    %c0_39 = arith.constant 0 : index
    %117 = arith.index_cast %69 : i32 to index
    %c0_40 = arith.constant 0 : index
    %c0_41 = arith.constant 0 : index
    %118 = vector.load %arg8[%c0_39, %117, %c0_40, %c0_41] : memref<1x8x2x32xf32, #tpu.memory_space<vmem>>, vector<1x1x2x32xf32>
    %119 = vector.shape_cast %118 : vector<1x1x2x32xf32> to vector<2x32xf32>
    %120 = vector.shape_cast %101 : vector<2x32xf32> to vector<1x1x2x32xf32>
    tpu.vector_store %arg8[%c0_39, %117, %c0_40, %c0_41], %120 {strides = array<i32>} : memref<1x8x2x32xf32, #tpu.memory_space<vmem>>, vector<1x1x2x32xf32>,
    %c2_i32 = arith.constant 2 : i32
    %c1_i32_42 = arith.constant 1 : i32
    %121 = arith.subi %c1_i32_42, %arg0 : i32
    %122 = arith.muli %121, %c2_i32 : i32
    %c7_i32_43 = arith.constant 7 : i32
    %123 = arith.subi %c7_i32_43, %c2_i32 : i32
    %124 = arith.muli %arg0, %123 : i32
    %125 = arith.addi %122, %124 : i32
    %126 = arith.index_cast %125 : i32 to index
    %c0_44 = arith.constant 0 : index
    %c0_45 = arith.constant 0 : index
    %127 = vector.load %arg4[%126, %c0_44, %c0_45] : memref<8x2x128xbf16, #tpu.memory_space<vmem>>, vector<1x2x128xbf16>
    %128 = vector.shape_cast %127 : vector<1x2x128xbf16> to vector<2x128xbf16>
    %129 = arith.extf %128 : vector<2x128xbf16> to vector<2x128xf32>
    %130 = arith.truncf %101 : vector<2x32xf32> to vector<2x32xbf16>
    %cst_46 = arith.constant dense<0.000000e+00> : vector<2x128xf32>
    %131 = tpu.matmul %130, %6, %cst_46 {dimension_numbers = #tpu.dot_dimension_numbers<[1], [0], [0], [1], [0, 0, 1, 1], [], []>} : vector<2x32xbf16>, vector<32x128xbf16>, vector<2x128xf32> -> vector<2x128xf32>
    %132 = arith.addf %129, %131 : vector<2x128xf32>
    %133 = vector.extract_strided_slice %132 {offsets = [0, 0], sizes = [2, 32], strides = [1, 1]} : vector<2x128xf32> to vector<2x32xf32>
    %134 = arith.negf %133 : vector<2x32xf32>
    %135 = math.exp %134 : vector<2x32xf32>
    %cst_47 = arith.constant 1.000000e+00 : f32
    %136 = vector.broadcast %cst_47 : f32 to vector<2x32xf32>
    %137 = arith.addf %136, %135 : vector<2x32xf32>
    %138 = arith.divf %136, %137 : vector<2x32xf32>
    %139 = vector.extract_strided_slice %132 {offsets = [0, 32], sizes = [2, 32], strides = [1, 1]} : vector<2x128xf32> to vector<2x32xf32>
    %140 = arith.negf %139 : vector<2x32xf32>
    %141 = math.exp %140 : vector<2x32xf32>
    %cst_48 = arith.constant 1.000000e+00 : f32
    %142 = vector.broadcast %cst_48 : f32 to vector<2x32xf32>
    %143 = arith.addf %142, %141 : vector<2x32xf32>
    %144 = arith.divf %142, %143 : vector<2x32xf32>
    %145 = vector.extract_strided_slice %132 {offsets = [0, 64], sizes = [2, 32], strides = [1, 1]} : vector<2x128xf32> to vector<2x32xf32>
    %146 = math.tanh %145 : vector<2x32xf32>
    %147 = vector.extract_strided_slice %132 {offsets = [0, 96], sizes = [2, 32], strides = [1, 1]} : vector<2x128xf32> to vector<2x32xf32>
    %148 = arith.negf %147 : vector<2x32xf32>
    %149 = math.exp %148 : vector<2x32xf32>
    %cst_49 = arith.constant 1.000000e+00 : f32
    %150 = vector.broadcast %cst_49 : f32 to vector<2x32xf32>
    %151 = arith.addf %150, %149 : vector<2x32xf32>
    %152 = arith.divf %150, %151 : vector<2x32xf32>
    %153 = arith.mulf %144, %99 : vector<2x32xf32>
    %154 = arith.mulf %138, %146 : vector<2x32xf32>
    %155 = arith.addf %153, %154 : vector<2x32xf32>
    %156 = math.tanh %155 : vector<2x32xf32>
    %157 = arith.mulf %152, %156 : vector<2x32xf32>
    %158 = vector.broadcast %4 : f32 to vector<2x32xf32>
    %159 = arith.subf %157, %158 : vector<2x32xf32>
    %cst_50 = arith.constant 0.000000e+00 : f32
    %160 = vector.broadcast %cst_50 : f32 to vector<2x32xf32>
    %161 = arith.cmpf ogt, %159, %160 : vector<2x32xf32>
    %162 = arith.extui %161 : vector<2x32xi1> to vector<2x32xi32>
    %163 = arith.sitofp %162 : vector<2x32xi32> to vector<2x32xf32>
    %164 = arith.truncf %163 : vector<2x32xf32> to vector<2x32xbf16>
    %c0_51 = arith.constant 0 : index
    %165 = arith.index_cast %125 : i32 to index
    %c0_52 = arith.constant 0 : index
    %c0_53 = arith.constant 0 : index
    %166 = vector.load %arg6[%c0_51, %165, %c0_52, %c0_53] : memref<1x8x2x32xbf16, #tpu.memory_space<vmem>>, vector<1x1x2x32xbf16>
    %167 = vector.shape_cast %166 : vector<1x1x2x32xbf16> to vector<2x32xbf16>
    %168 = vector.shape_cast %164 : vector<2x32xbf16> to vector<1x1x2x32xbf16>
    tpu.vector_store %arg6[%c0_51, %165, %c0_52, %c0_53], %168 {strides = array<i32>} : memref<1x8x2x32xbf16, #tpu.memory_space<vmem>>, vector<1x1x2x32xbf16>,
    %c0_54 = arith.constant 0 : index
    %169 = arith.index_cast %125 : i32 to index
    %c0_55 = arith.constant 0 : index
    %c0_56 = arith.constant 0 : index
    %170 = vector.load %arg7[%c0_54, %169, %c0_55, %c0_56] : memref<1x8x2x32xf32, #tpu.memory_space<vmem>>, vector<1x1x2x32xf32>
    %171 = vector.shape_cast %170 : vector<1x1x2x32xf32> to vector<2x32xf32>
    %172 = vector.shape_cast %155 : vector<2x32xf32> to vector<1x1x2x32xf32>
    tpu.vector_store %arg7[%c0_54, %169, %c0_55, %c0_56], %172 {strides = array<i32>} : memref<1x8x2x32xf32, #tpu.memory_space<vmem>>, vector<1x1x2x32xf32>,
    %c0_57 = arith.constant 0 : index
    %173 = arith.index_cast %125 : i32 to index
    %c0_58 = arith.constant 0 : index
    %c0_59 = arith.constant 0 : index
    %174 = vector.load %arg8[%c0_57, %173, %c0_58, %c0_59] : memref<1x8x2x32xf32, #tpu.memory_space<vmem>>, vector<1x1x2x32xf32>
    %175 = vector.shape_cast %174 : vector<1x1x2x32xf32> to vector<2x32xf32>
    %176 = vector.shape_cast %157 : vector<2x32xf32> to vector<1x1x2x32xf32>
    tpu.vector_store %arg8[%c0_57, %173, %c0_58, %c0_59], %176 {strides = array<i32>} : memref<1x8x2x32xf32, #tpu.memory_space<vmem>>, vector<1x1x2x32xf32>,
    %c3_i32 = arith.constant 3 : i32
    %c1_i32_60 = arith.constant 1 : i32
    %177 = arith.subi %c1_i32_60, %arg0 : i32
    %178 = arith.muli %177, %c3_i32 : i32
    %c7_i32_61 = arith.constant 7 : i32
    %179 = arith.subi %c7_i32_61, %c3_i32 : i32
    %180 = arith.muli %arg0, %179 : i32
    %181 = arith.addi %178, %180 : i32
    %182 = arith.index_cast %181 : i32 to index
    %c0_62 = arith.constant 0 : index
    %c0_63 = arith.constant 0 : index
    %183 = vector.load %arg4[%182, %c0_62, %c0_63] : memref<8x2x128xbf16, #tpu.memory_space<vmem>>, vector<1x2x128xbf16>
    %184 = vector.shape_cast %183 : vector<1x2x128xbf16> to vector<2x128xbf16>
    %185 = arith.extf %184 : vector<2x128xbf16> to vector<2x128xf32>
    %186 = arith.truncf %157 : vector<2x32xf32> to vector<2x32xbf16>
    %cst_64 = arith.constant dense<0.000000e+00> : vector<2x128xf32>
    %187 = tpu.matmul %186, %6, %cst_64 {dimension_numbers = #tpu.dot_dimension_numbers<[1], [0], [0], [1], [0, 0, 1, 1], [], []>} : vector<2x32xbf16>, vector<32x128xbf16>, vector<2x128xf32> -> vector<2x128xf32>
    %188 = arith.addf %185, %187 : vector<2x128xf32>
    %189 = vector.extract_strided_slice %188 {offsets = [0, 0], sizes = [2, 32], strides = [1, 1]} : vector<2x128xf32> to vector<2x32xf32>
    %190 = arith.negf %189 : vector<2x32xf32>
    %191 = math.exp %190 : vector<2x32xf32>
    %cst_65 = arith.constant 1.000000e+00 : f32
    %192 = vector.broadcast %cst_65 : f32 to vector<2x32xf32>
    %193 = arith.addf %192, %191 : vector<2x32xf32>
    %194 = arith.divf %192, %193 : vector<2x32xf32>
    %195 = vector.extract_strided_slice %188 {offsets = [0, 32], sizes = [2, 32], strides = [1, 1]} : vector<2x128xf32> to vector<2x32xf32>
    %196 = arith.negf %195 : vector<2x32xf32>
    %197 = math.exp %196 : vector<2x32xf32>
    %cst_66 = arith.constant 1.000000e+00 : f32
    %198 = vector.broadcast %cst_66 : f32 to vector<2x32xf32>
    %199 = arith.addf %198, %197 : vector<2x32xf32>
    %200 = arith.divf %198, %199 : vector<2x32xf32>
    %201 = vector.extract_strided_slice %188 {offsets = [0, 64], sizes = [2, 32], strides = [1, 1]} : vector<2x128xf32> to vector<2x32xf32>
    %202 = math.tanh %201 : vector<2x32xf32>
    %203 = vector.extract_strided_slice %188 {offsets = [0, 96], sizes = [2, 32], strides = [1, 1]} : vector<2x128xf32> to vector<2x32xf32>
    %204 = arith.negf %203 : vector<2x32xf32>
    %205 = math.exp %204 : vector<2x32xf32>
    %cst_67 = arith.constant 1.000000e+00 : f32
    %206 = vector.broadcast %cst_67 : f32 to vector<2x32xf32>
    %207 = arith.addf %206, %205 : vector<2x32xf32>
    %208 = arith.divf %206, %207 : vector<2x32xf32>
    %209 = arith.mulf %200, %155 : vector<2x32xf32>
    %210 = arith.mulf %194, %202 : vector<2x32xf32>
    %211 = arith.addf %209, %210 : vector<2x32xf32>
    %212 = math.tanh %211 : vector<2x32xf32>
    %213 = arith.mulf %208, %212 : vector<2x32xf32>
    %214 = vector.broadcast %4 : f32 to vector<2x32xf32>
    %215 = arith.subf %213, %214 : vector<2x32xf32>
    %cst_68 = arith.constant 0.000000e+00 : f32
    %216 = vector.broadcast %cst_68 : f32 to vector<2x32xf32>
    %217 = arith.cmpf ogt, %215, %216 : vector<2x32xf32>
    %218 = arith.extui %217 : vector<2x32xi1> to vector<2x32xi32>
    %219 = arith.sitofp %218 : vector<2x32xi32> to vector<2x32xf32>
    %220 = arith.truncf %219 : vector<2x32xf32> to vector<2x32xbf16>
    %c0_69 = arith.constant 0 : index
    %221 = arith.index_cast %181 : i32 to index
    %c0_70 = arith.constant 0 : index
    %c0_71 = arith.constant 0 : index
    %222 = vector.load %arg6[%c0_69, %221, %c0_70, %c0_71] : memref<1x8x2x32xbf16, #tpu.memory_space<vmem>>, vector<1x1x2x32xbf16>
    %223 = vector.shape_cast %222 : vector<1x1x2x32xbf16> to vector<2x32xbf16>
    %224 = vector.shape_cast %220 : vector<2x32xbf16> to vector<1x1x2x32xbf16>
    tpu.vector_store %arg6[%c0_69, %221, %c0_70, %c0_71], %224 {strides = array<i32>} : memref<1x8x2x32xbf16, #tpu.memory_space<vmem>>, vector<1x1x2x32xbf16>,
    %c0_72 = arith.constant 0 : index
    %225 = arith.index_cast %181 : i32 to index
    %c0_73 = arith.constant 0 : index
    %c0_74 = arith.constant 0 : index
    %226 = vector.load %arg7[%c0_72, %225, %c0_73, %c0_74] : memref<1x8x2x32xf32, #tpu.memory_space<vmem>>, vector<1x1x2x32xf32>
    %227 = vector.shape_cast %226 : vector<1x1x2x32xf32> to vector<2x32xf32>
    %228 = vector.shape_cast %211 : vector<2x32xf32> to vector<1x1x2x32xf32>
    tpu.vector_store %arg7[%c0_72, %225, %c0_73, %c0_74], %228 {strides = array<i32>} : memref<1x8x2x32xf32, #tpu.memory_space<vmem>>, vector<1x1x2x32xf32>,
    %c0_75 = arith.constant 0 : index
    %229 = arith.index_cast %181 : i32 to index
    %c0_76 = arith.constant 0 : index
    %c0_77 = arith.constant 0 : index
    %230 = vector.load %arg8[%c0_75, %229, %c0_76, %c0_77] : memref<1x8x2x32xf32, #tpu.memory_space<vmem>>, vector<1x1x2x32xf32>
    %231 = vector.shape_cast %230 : vector<1x1x2x32xf32> to vector<2x32xf32>
    %232 = vector.shape_cast %213 : vector<2x32xf32> to vector<1x1x2x32xf32>
    tpu.vector_store %arg8[%c0_75, %229, %c0_76, %c0_77], %232 {strides = array<i32>} : memref<1x8x2x32xf32, #tpu.memory_space<vmem>>, vector<1x1x2x32xf32>,
    %c4_i32 = arith.constant 4 : i32
    %c1_i32_78 = arith.constant 1 : i32
    %233 = arith.subi %c1_i32_78, %arg0 : i32
    %234 = arith.muli %233, %c4_i32 : i32
    %c7_i32_79 = arith.constant 7 : i32
    %235 = arith.subi %c7_i32_79, %c4_i32 : i32
    %236 = arith.muli %arg0, %235 : i32
    %237 = arith.addi %234, %236 : i32
    %238 = arith.index_cast %237 : i32 to index
    %c0_80 = arith.constant 0 : index
    %c0_81 = arith.constant 0 : index
    %239 = vector.load %arg4[%238, %c0_80, %c0_81] : memref<8x2x128xbf16, #tpu.memory_space<vmem>>, vector<1x2x128xbf16>
    %240 = vector.shape_cast %239 : vector<1x2x128xbf16> to vector<2x128xbf16>
    %241 = arith.extf %240 : vector<2x128xbf16> to vector<2x128xf32>
    %242 = arith.truncf %213 : vector<2x32xf32> to vector<2x32xbf16>
    %cst_82 = arith.constant dense<0.000000e+00> : vector<2x128xf32>
    %243 = tpu.matmul %242, %6, %cst_82 {dimension_numbers = #tpu.dot_dimension_numbers<[1], [0], [0], [1], [0, 0, 1, 1], [], []>} : vector<2x32xbf16>, vector<32x128xbf16>, vector<2x128xf32> -> vector<2x128xf32>
    %244 = arith.addf %241, %243 : vector<2x128xf32>
    %245 = vector.extract_strided_slice %244 {offsets = [0, 0], sizes = [2, 32], strides = [1, 1]} : vector<2x128xf32> to vector<2x32xf32>
    %246 = arith.negf %245 : vector<2x32xf32>
    %247 = math.exp %246 : vector<2x32xf32>
    %cst_83 = arith.constant 1.000000e+00 : f32
    %248 = vector.broadcast %cst_83 : f32 to vector<2x32xf32>
    %249 = arith.addf %248, %247 : vector<2x32xf32>
    %250 = arith.divf %248, %249 : vector<2x32xf32>
    %251 = vector.extract_strided_slice %244 {offsets = [0, 32], sizes = [2, 32], strides = [1, 1]} : vector<2x128xf32> to vector<2x32xf32>
    %252 = arith.negf %251 : vector<2x32xf32>
    %253 = math.exp %252 : vector<2x32xf32>
    %cst_84 = arith.constant 1.000000e+00 : f32
    %254 = vector.broadcast %cst_84 : f32 to vector<2x32xf32>
    %255 = arith.addf %254, %253 : vector<2x32xf32>
    %256 = arith.divf %254, %255 : vector<2x32xf32>
    %257 = vector.extract_strided_slice %244 {offsets = [0, 64], sizes = [2, 32], strides = [1, 1]} : vector<2x128xf32> to vector<2x32xf32>
    %258 = math.tanh %257 : vector<2x32xf32>
    %259 = vector.extract_strided_slice %244 {offsets = [0, 96], sizes = [2, 32], strides = [1, 1]} : vector<2x128xf32> to vector<2x32xf32>
    %260 = arith.negf %259 : vector<2x32xf32>
    %261 = math.exp %260 : vector<2x32xf32>
    %cst_85 = arith.constant 1.000000e+00 : f32
    %262 = vector.broadcast %cst_85 : f32 to vector<2x32xf32>
    %263 = arith.addf %262, %261 : vector<2x32xf32>
    %264 = arith.divf %262, %263 : vector<2x32xf32>
    %265 = arith.mulf %256, %211 : vector<2x32xf32>
    %266 = arith.mulf %250, %258 : vector<2x32xf32>
    %267 = arith.addf %265, %266 : vector<2x32xf32>
    %268 = math.tanh %267 : vector<2x32xf32>
    %269 = arith.mulf %264, %268 : vector<2x32xf32>
    %270 = vector.broadcast %4 : f32 to vector<2x32xf32>
    %271 = arith.subf %269, %270 : vector<2x32xf32>
    %cst_86 = arith.constant 0.000000e+00 : f32
    %272 = vector.broadcast %cst_86 : f32 to vector<2x32xf32>
    %273 = arith.cmpf ogt, %271, %272 : vector<2x32xf32>
    %274 = arith.extui %273 : vector<2x32xi1> to vector<2x32xi32>
    %275 = arith.sitofp %274 : vector<2x32xi32> to vector<2x32xf32>
    %276 = arith.truncf %275 : vector<2x32xf32> to vector<2x32xbf16>
    %c0_87 = arith.constant 0 : index
    %277 = arith.index_cast %237 : i32 to index
    %c0_88 = arith.constant 0 : index
    %c0_89 = arith.constant 0 : index
    %278 = vector.load %arg6[%c0_87, %277, %c0_88, %c0_89] : memref<1x8x2x32xbf16, #tpu.memory_space<vmem>>, vector<1x1x2x32xbf16>
    %279 = vector.shape_cast %278 : vector<1x1x2x32xbf16> to vector<2x32xbf16>
    %280 = vector.shape_cast %276 : vector<2x32xbf16> to vector<1x1x2x32xbf16>
    tpu.vector_store %arg6[%c0_87, %277, %c0_88, %c0_89], %280 {strides = array<i32>} : memref<1x8x2x32xbf16, #tpu.memory_space<vmem>>, vector<1x1x2x32xbf16>,
    %c0_90 = arith.constant 0 : index
    %281 = arith.index_cast %237 : i32 to index
    %c0_91 = arith.constant 0 : index
    %c0_92 = arith.constant 0 : index
    %282 = vector.load %arg7[%c0_90, %281, %c0_91, %c0_92] : memref<1x8x2x32xf32, #tpu.memory_space<vmem>>, vector<1x1x2x32xf32>
    %283 = vector.shape_cast %282 : vector<1x1x2x32xf32> to vector<2x32xf32>
    %284 = vector.shape_cast %267 : vector<2x32xf32> to vector<1x1x2x32xf32>
    tpu.vector_store %arg7[%c0_90, %281, %c0_91, %c0_92], %284 {strides = array<i32>} : memref<1x8x2x32xf32, #tpu.memory_space<vmem>>, vector<1x1x2x32xf32>,
    %c0_93 = arith.constant 0 : index
    %285 = arith.index_cast %237 : i32 to index
    %c0_94 = arith.constant 0 : index
    %c0_95 = arith.constant 0 : index
    %286 = vector.load %arg8[%c0_93, %285, %c0_94, %c0_95] : memref<1x8x2x32xf32, #tpu.memory_space<vmem>>, vector<1x1x2x32xf32>
    %287 = vector.shape_cast %286 : vector<1x1x2x32xf32> to vector<2x32xf32>
    %288 = vector.shape_cast %269 : vector<2x32xf32> to vector<1x1x2x32xf32>
    tpu.vector_store %arg8[%c0_93, %285, %c0_94, %c0_95], %288 {strides = array<i32>} : memref<1x8x2x32xf32, #tpu.memory_space<vmem>>, vector<1x1x2x32xf32>,
    %c5_i32 = arith.constant 5 : i32
    %c1_i32_96 = arith.constant 1 : i32
    %289 = arith.subi %c1_i32_96, %arg0 : i32
    %290 = arith.muli %289, %c5_i32 : i32
    %c7_i32_97 = arith.constant 7 : i32
    %291 = arith.subi %c7_i32_97, %c5_i32 : i32
    %292 = arith.muli %arg0, %291 : i32
    %293 = arith.addi %290, %292 : i32
    %294 = arith.index_cast %293 : i32 to index
    %c0_98 = arith.constant 0 : index
    %c0_99 = arith.constant 0 : index
    %295 = vector.load %arg4[%294, %c0_98, %c0_99] : memref<8x2x128xbf16, #tpu.memory_space<vmem>>, vector<1x2x128xbf16>
    %296 = vector.shape_cast %295 : vector<1x2x128xbf16> to vector<2x128xbf16>
    %297 = arith.extf %296 : vector<2x128xbf16> to vector<2x128xf32>
    %298 = arith.truncf %269 : vector<2x32xf32> to vector<2x32xbf16>
    %cst_100 = arith.constant dense<0.000000e+00> : vector<2x128xf32>
    %299 = tpu.matmul %298, %6, %cst_100 {dimension_numbers = #tpu.dot_dimension_numbers<[1], [0], [0], [1], [0, 0, 1, 1], [], []>} : vector<2x32xbf16>, vector<32x128xbf16>, vector<2x128xf32> -> vector<2x128xf32>
    %300 = arith.addf %297, %299 : vector<2x128xf32>
    %301 = vector.extract_strided_slice %300 {offsets = [0, 0], sizes = [2, 32], strides = [1, 1]} : vector<2x128xf32> to vector<2x32xf32>
    %302 = arith.negf %301 : vector<2x32xf32>
    %303 = math.exp %302 : vector<2x32xf32>
    %cst_101 = arith.constant 1.000000e+00 : f32
    %304 = vector.broadcast %cst_101 : f32 to vector<2x32xf32>
    %305 = arith.addf %304, %303 : vector<2x32xf32>
    %306 = arith.divf %304, %305 : vector<2x32xf32>
    %307 = vector.extract_strided_slice %300 {offsets = [0, 32], sizes = [2, 32], strides = [1, 1]} : vector<2x128xf32> to vector<2x32xf32>
    %308 = arith.negf %307 : vector<2x32xf32>
    %309 = math.exp %308 : vector<2x32xf32>
    %cst_102 = arith.constant 1.000000e+00 : f32
    %310 = vector.broadcast %cst_102 : f32 to vector<2x32xf32>
    %311 = arith.addf %310, %309 : vector<2x32xf32>
    %312 = arith.divf %310, %311 : vector<2x32xf32>
    %313 = vector.extract_strided_slice %300 {offsets = [0, 64], sizes = [2, 32], strides = [1, 1]} : vector<2x128xf32> to vector<2x32xf32>
    %314 = math.tanh %313 : vector<2x32xf32>
    %315 = vector.extract_strided_slice %300 {offsets = [0, 96], sizes = [2, 32], strides = [1, 1]} : vector<2x128xf32> to vector<2x32xf32>
    %316 = arith.negf %315 : vector<2x32xf32>
    %317 = math.exp %316 : vector<2x32xf32>
    %cst_103 = arith.constant 1.000000e+00 : f32
    %318 = vector.broadcast %cst_103 : f32 to vector<2x32xf32>
    %319 = arith.addf %318, %317 : vector<2x32xf32>
    %320 = arith.divf %318, %319 : vector<2x32xf32>
    %321 = arith.mulf %312, %267 : vector<2x32xf32>
    %322 = arith.mulf %306, %314 : vector<2x32xf32>
    %323 = arith.addf %321, %322 : vector<2x32xf32>
    %324 = math.tanh %323 : vector<2x32xf32>
    %325 = arith.mulf %320, %324 : vector<2x32xf32>
    %326 = vector.broadcast %4 : f32 to vector<2x32xf32>
    %327 = arith.subf %325, %326 : vector<2x32xf32>
    %cst_104 = arith.constant 0.000000e+00 : f32
    %328 = vector.broadcast %cst_104 : f32 to vector<2x32xf32>
    %329 = arith.cmpf ogt, %327, %328 : vector<2x32xf32>
    %330 = arith.extui %329 : vector<2x32xi1> to vector<2x32xi32>
    %331 = arith.sitofp %330 : vector<2x32xi32> to vector<2x32xf32>
    %332 = arith.truncf %331 : vector<2x32xf32> to vector<2x32xbf16>
    %c0_105 = arith.constant 0 : index
    %333 = arith.index_cast %293 : i32 to index
    %c0_106 = arith.constant 0 : index
    %c0_107 = arith.constant 0 : index
    %334 = vector.load %arg6[%c0_105, %333, %c0_106, %c0_107] : memref<1x8x2x32xbf16, #tpu.memory_space<vmem>>, vector<1x1x2x32xbf16>
    %335 = vector.shape_cast %334 : vector<1x1x2x32xbf16> to vector<2x32xbf16>
    %336 = vector.shape_cast %332 : vector<2x32xbf16> to vector<1x1x2x32xbf16>
    tpu.vector_store %arg6[%c0_105, %333, %c0_106, %c0_107], %336 {strides = array<i32>} : memref<1x8x2x32xbf16, #tpu.memory_space<vmem>>, vector<1x1x2x32xbf16>,
    %c0_108 = arith.constant 0 : index
    %337 = arith.index_cast %293 : i32 to index
    %c0_109 = arith.constant 0 : index
    %c0_110 = arith.constant 0 : index
    %338 = vector.load %arg7[%c0_108, %337, %c0_109, %c0_110] : memref<1x8x2x32xf32, #tpu.memory_space<vmem>>, vector<1x1x2x32xf32>
    %339 = vector.shape_cast %338 : vector<1x1x2x32xf32> to vector<2x32xf32>
    %340 = vector.shape_cast %323 : vector<2x32xf32> to vector<1x1x2x32xf32>
    tpu.vector_store %arg7[%c0_108, %337, %c0_109, %c0_110], %340 {strides = array<i32>} : memref<1x8x2x32xf32, #tpu.memory_space<vmem>>, vector<1x1x2x32xf32>,
    %c0_111 = arith.constant 0 : index
    %341 = arith.index_cast %293 : i32 to index
    %c0_112 = arith.constant 0 : index
    %c0_113 = arith.constant 0 : index
    %342 = vector.load %arg8[%c0_111, %341, %c0_112, %c0_113] : memref<1x8x2x32xf32, #tpu.memory_space<vmem>>, vector<1x1x2x32xf32>
    %343 = vector.shape_cast %342 : vector<1x1x2x32xf32> to vector<2x32xf32>
    %344 = vector.shape_cast %325 : vector<2x32xf32> to vector<1x1x2x32xf32>
    tpu.vector_store %arg8[%c0_111, %341, %c0_112, %c0_113], %344 {strides = array<i32>} : memref<1x8x2x32xf32, #tpu.memory_space<vmem>>, vector<1x1x2x32xf32>,
    %c6_i32 = arith.constant 6 : i32
    %c1_i32_114 = arith.constant 1 : i32
    %345 = arith.subi %c1_i32_114, %arg0 : i32
    %346 = arith.muli %345, %c6_i32 : i32
    %c7_i32_115 = arith.constant 7 : i32
    %347 = arith.subi %c7_i32_115, %c6_i32 : i32
    %348 = arith.muli %arg0, %347 : i32
    %349 = arith.addi %346, %348 : i32
    %350 = arith.index_cast %349 : i32 to index
    %c0_116 = arith.constant 0 : index
    %c0_117 = arith.constant 0 : index
    %351 = vector.load %arg4[%350, %c0_116, %c0_117] : memref<8x2x128xbf16, #tpu.memory_space<vmem>>, vector<1x2x128xbf16>
    %352 = vector.shape_cast %351 : vector<1x2x128xbf16> to vector<2x128xbf16>
    %353 = arith.extf %352 : vector<2x128xbf16> to vector<2x128xf32>
    %354 = arith.truncf %325 : vector<2x32xf32> to vector<2x32xbf16>
    %cst_118 = arith.constant dense<0.000000e+00> : vector<2x128xf32>
    %355 = tpu.matmul %354, %6, %cst_118 {dimension_numbers = #tpu.dot_dimension_numbers<[1], [0], [0], [1], [0, 0, 1, 1], [], []>} : vector<2x32xbf16>, vector<32x128xbf16>, vector<2x128xf32> -> vector<2x128xf32>
    %356 = arith.addf %353, %355 : vector<2x128xf32>
    %357 = vector.extract_strided_slice %356 {offsets = [0, 0], sizes = [2, 32], strides = [1, 1]} : vector<2x128xf32> to vector<2x32xf32>
    %358 = arith.negf %357 : vector<2x32xf32>
    %359 = math.exp %358 : vector<2x32xf32>
    %cst_119 = arith.constant 1.000000e+00 : f32
    %360 = vector.broadcast %cst_119 : f32 to vector<2x32xf32>
    %361 = arith.addf %360, %359 : vector<2x32xf32>
    %362 = arith.divf %360, %361 : vector<2x32xf32>
    %363 = vector.extract_strided_slice %356 {offsets = [0, 32], sizes = [2, 32], strides = [1, 1]} : vector<2x128xf32> to vector<2x32xf32>
    %364 = arith.negf %363 : vector<2x32xf32>
    %365 = math.exp %364 : vector<2x32xf32>
    %cst_120 = arith.constant 1.000000e+00 : f32
    %366 = vector.broadcast %cst_120 : f32 to vector<2x32xf32>
    %367 = arith.addf %366, %365 : vector<2x32xf32>
    %368 = arith.divf %366, %367 : vector<2x32xf32>
    %369 = vector.extract_strided_slice %356 {offsets = [0, 64], sizes = [2, 32], strides = [1, 1]} : vector<2x128xf32> to vector<2x32xf32>
    %370 = math.tanh %369 : vector<2x32xf32>
    %371 = vector.extract_strided_slice %356 {offsets = [0, 96], sizes = [2, 32], strides = [1, 1]} : vector<2x128xf32> to vector<2x32xf32>
    %372 = arith.negf %371 : vector<2x32xf32>
    %373 = math.exp %372 : vector<2x32xf32>
    %cst_121 = arith.constant 1.000000e+00 : f32
    %374 = vector.broadcast %cst_121 : f32 to vector<2x32xf32>
    %375 = arith.addf %374, %373 : vector<2x32xf32>
    %376 = arith.divf %374, %375 : vector<2x32xf32>
    %377 = arith.mulf %368, %323 : vector<2x32xf32>
    %378 = arith.mulf %362, %370 : vector<2x32xf32>
    %379 = arith.addf %377, %378 : vector<2x32xf32>
    %380 = math.tanh %379 : vector<2x32xf32>
    %381 = arith.mulf %376, %380 : vector<2x32xf32>
    %382 = vector.broadcast %4 : f32 to vector<2x32xf32>
    %383 = arith.subf %381, %382 : vector<2x32xf32>
    %cst_122 = arith.constant 0.000000e+00 : f32
    %384 = vector.broadcast %cst_122 : f32 to vector<2x32xf32>
    %385 = arith.cmpf ogt, %383, %384 : vector<2x32xf32>
    %386 = arith.extui %385 : vector<2x32xi1> to vector<2x32xi32>
    %387 = arith.sitofp %386 : vector<2x32xi32> to vector<2x32xf32>
    %388 = arith.truncf %387 : vector<2x32xf32> to vector<2x32xbf16>
    %c0_123 = arith.constant 0 : index
    %389 = arith.index_cast %349 : i32 to index
    %c0_124 = arith.constant 0 : index
    %c0_125 = arith.constant 0 : index
    %390 = vector.load %arg6[%c0_123, %389, %c0_124, %c0_125] : memref<1x8x2x32xbf16, #tpu.memory_space<vmem>>, vector<1x1x2x32xbf16>
    %391 = vector.shape_cast %390 : vector<1x1x2x32xbf16> to vector<2x32xbf16>
    %392 = vector.shape_cast %388 : vector<2x32xbf16> to vector<1x1x2x32xbf16>
    tpu.vector_store %arg6[%c0_123, %389, %c0_124, %c0_125], %392 {strides = array<i32>} : memref<1x8x2x32xbf16, #tpu.memory_space<vmem>>, vector<1x1x2x32xbf16>,
    %c0_126 = arith.constant 0 : index
    %393 = arith.index_cast %349 : i32 to index
    %c0_127 = arith.constant 0 : index
    %c0_128 = arith.constant 0 : index
    %394 = vector.load %arg7[%c0_126, %393, %c0_127, %c0_128] : memref<1x8x2x32xf32, #tpu.memory_space<vmem>>, vector<1x1x2x32xf32>
    %395 = vector.shape_cast %394 : vector<1x1x2x32xf32> to vector<2x32xf32>
    %396 = vector.shape_cast %379 : vector<2x32xf32> to vector<1x1x2x32xf32>
    tpu.vector_store %arg7[%c0_126, %393, %c0_127, %c0_128], %396 {strides = array<i32>} : memref<1x8x2x32xf32, #tpu.memory_space<vmem>>, vector<1x1x2x32xf32>,
    %c0_129 = arith.constant 0 : index
    %397 = arith.index_cast %349 : i32 to index
    %c0_130 = arith.constant 0 : index
    %c0_131 = arith.constant 0 : index
    %398 = vector.load %arg8[%c0_129, %397, %c0_130, %c0_131] : memref<1x8x2x32xf32, #tpu.memory_space<vmem>>, vector<1x1x2x32xf32>
    %399 = vector.shape_cast %398 : vector<1x1x2x32xf32> to vector<2x32xf32>
    %400 = vector.shape_cast %381 : vector<2x32xf32> to vector<1x1x2x32xf32>
    tpu.vector_store %arg8[%c0_129, %397, %c0_130, %c0_131], %400 {strides = array<i32>} : memref<1x8x2x32xf32, #tpu.memory_space<vmem>>, vector<1x1x2x32xf32>,
    %c7_i32_132 = arith.constant 7 : i32
    %c1_i32_133 = arith.constant 1 : i32
    %401 = arith.subi %c1_i32_133, %arg0 : i32
    %402 = arith.muli %401, %c7_i32_132 : i32
    %c7_i32_134 = arith.constant 7 : i32
    %403 = arith.subi %c7_i32_134, %c7_i32_132 : i32
    %404 = arith.muli %arg0, %403 : i32
    %405 = arith.addi %402, %404 : i32
    %406 = arith.index_cast %405 : i32 to index
    %c0_135 = arith.constant 0 : index
    %c0_136 = arith.constant 0 : index
    %407 = vector.load %arg4[%406, %c0_135, %c0_136] : memref<8x2x128xbf16, #tpu.memory_space<vmem>>, vector<1x2x128xbf16>
    %408 = vector.shape_cast %407 : vector<1x2x128xbf16> to vector<2x128xbf16>
    %409 = arith.extf %408 : vector<2x128xbf16> to vector<2x128xf32>
    %410 = arith.truncf %381 : vector<2x32xf32> to vector<2x32xbf16>
    %cst_137 = arith.constant dense<0.000000e+00> : vector<2x128xf32>
    %411 = tpu.matmul %410, %6, %cst_137 {dimension_numbers = #tpu.dot_dimension_numbers<[1], [0], [0], [1], [0, 0, 1, 1], [], []>} : vector<2x32xbf16>, vector<32x128xbf16>, vector<2x128xf32> -> vector<2x128xf32>
    %412 = arith.addf %409, %411 : vector<2x128xf32>
    %413 = vector.extract_strided_slice %412 {offsets = [0, 0], sizes = [2, 32], strides = [1, 1]} : vector<2x128xf32> to vector<2x32xf32>
    %414 = arith.negf %413 : vector<2x32xf32>
    %415 = math.exp %414 : vector<2x32xf32>
    %cst_138 = arith.constant 1.000000e+00 : f32
    %416 = vector.broadcast %cst_138 : f32 to vector<2x32xf32>
    %417 = arith.addf %416, %415 : vector<2x32xf32>
    %418 = arith.divf %416, %417 : vector<2x32xf32>
    %419 = vector.extract_strided_slice %412 {offsets = [0, 32], sizes = [2, 32], strides = [1, 1]} : vector<2x128xf32> to vector<2x32xf32>
    %420 = arith.negf %419 : vector<2x32xf32>
    %421 = math.exp %420 : vector<2x32xf32>
    %cst_139 = arith.constant 1.000000e+00 : f32
    %422 = vector.broadcast %cst_139 : f32 to vector<2x32xf32>
    %423 = arith.addf %422, %421 : vector<2x32xf32>
    %424 = arith.divf %422, %423 : vector<2x32xf32>
    %425 = vector.extract_strided_slice %412 {offsets = [0, 64], sizes = [2, 32], strides = [1, 1]} : vector<2x128xf32> to vector<2x32xf32>
    %426 = math.tanh %425 : vector<2x32xf32>
    %427 = vector.extract_strided_slice %412 {offsets = [0, 96], sizes = [2, 32], strides = [1, 1]} : vector<2x128xf32> to vector<2x32xf32>
    %428 = arith.negf %427 : vector<2x32xf32>
    %429 = math.exp %428 : vector<2x32xf32>
    %cst_140 = arith.constant 1.000000e+00 : f32
    %430 = vector.broadcast %cst_140 : f32 to vector<2x32xf32>
    %431 = arith.addf %430, %429 : vector<2x32xf32>
    %432 = arith.divf %430, %431 : vector<2x32xf32>
    %433 = arith.mulf %424, %379 : vector<2x32xf32>
    %434 = arith.mulf %418, %426 : vector<2x32xf32>
    %435 = arith.addf %433, %434 : vector<2x32xf32>
    %436 = math.tanh %435 : vector<2x32xf32>
    %437 = arith.mulf %432, %436 : vector<2x32xf32>
    %438 = vector.broadcast %4 : f32 to vector<2x32xf32>
    %439 = arith.subf %437, %438 : vector<2x32xf32>
    %cst_141 = arith.constant 0.000000e+00 : f32
    %440 = vector.broadcast %cst_141 : f32 to vector<2x32xf32>
    %441 = arith.cmpf ogt, %439, %440 : vector<2x32xf32>
    %442 = arith.extui %441 : vector<2x32xi1> to vector<2x32xi32>
    %443 = arith.sitofp %442 : vector<2x32xi32> to vector<2x32xf32>
    %444 = arith.truncf %443 : vector<2x32xf32> to vector<2x32xbf16>
    %c0_142 = arith.constant 0 : index
    %445 = arith.index_cast %405 : i32 to index
    %c0_143 = arith.constant 0 : index
    %c0_144 = arith.constant 0 : index
    %446 = vector.load %arg6[%c0_142, %445, %c0_143, %c0_144] : memref<1x8x2x32xbf16, #tpu.memory_space<vmem>>, vector<1x1x2x32xbf16>
    %447 = vector.shape_cast %446 : vector<1x1x2x32xbf16> to vector<2x32xbf16>
    %448 = vector.shape_cast %444 : vector<2x32xbf16> to vector<1x1x2x32xbf16>
    tpu.vector_store %arg6[%c0_142, %445, %c0_143, %c0_144], %448 {strides = array<i32>} : memref<1x8x2x32xbf16, #tpu.memory_space<vmem>>, vector<1x1x2x32xbf16>,
    %c0_145 = arith.constant 0 : index
    %449 = arith.index_cast %405 : i32 to index
    %c0_146 = arith.constant 0 : index
    %c0_147 = arith.constant 0 : index
    %450 = vector.load %arg7[%c0_145, %449, %c0_146, %c0_147] : memref<1x8x2x32xf32, #tpu.memory_space<vmem>>, vector<1x1x2x32xf32>
    %451 = vector.shape_cast %450 : vector<1x1x2x32xf32> to vector<2x32xf32>
    %452 = vector.shape_cast %435 : vector<2x32xf32> to vector<1x1x2x32xf32>
    tpu.vector_store %arg7[%c0_145, %449, %c0_146, %c0_147], %452 {strides = array<i32>} : memref<1x8x2x32xf32, #tpu.memory_space<vmem>>, vector<1x1x2x32xf32>,
    %c0_148 = arith.constant 0 : index
    %453 = arith.index_cast %405 : i32 to index
    %c0_149 = arith.constant 0 : index
    %c0_150 = arith.constant 0 : index
    %454 = vector.load %arg8[%c0_148, %453, %c0_149, %c0_150] : memref<1x8x2x32xf32, #tpu.memory_space<vmem>>, vector<1x1x2x32xf32>
    %455 = vector.shape_cast %454 : vector<1x1x2x32xf32> to vector<2x32xf32>
    %456 = vector.shape_cast %437 : vector<2x32xf32> to vector<1x1x2x32xf32>
    tpu.vector_store %arg8[%c0_148, %453, %c0_149, %c0_150], %456 {strides = array<i32>} : memref<1x8x2x32xf32, #tpu.memory_space<vmem>>, vector<1x1x2x32xf32>,
    %c8_i32 = arith.constant 8 : i32
    %c0_151 = arith.constant 0 : index
    %c0_152 = arith.constant 0 : index
    %457 = vector.load %arg9[%c0_151, %c0_152] : memref<2x32xf32, #tpu.memory_space<vmem>>, vector<2x32xf32>
    tpu.vector_store %arg9[%c0_151, %c0_152], %435 {strides = array<i32>} : memref<2x32xf32, #tpu.memory_space<vmem>>, vector<2x32xf32>,
    %c0_153 = arith.constant 0 : index
    %c0_154 = arith.constant 0 : index
    %458 = vector.load %arg10[%c0_153, %c0_154] : memref<2x32xf32, #tpu.memory_space<vmem>>, vector<2x32xf32>
    tpu.vector_store %arg10[%c0_153, %c0_154], %437 {strides = array<i32>} : memref<2x32xf32, #tpu.memory_space<vmem>>, vector<2x32xf32>,
    return
  }
  func.func @transform_0(%arg0: i32, %arg1: i32, %arg2: i32) -> i32 {
    %c0_i32 = arith.constant 0 : i32
    %c0_i32_0 = arith.constant 0 : i32
    return %c0_i32 : i32
  }
  func.func @transform_1(%arg0: i32, %arg1: i32, %arg2: i32) -> (i32, i32, i32) {
    %c1_i32 = arith.constant 1 : i32
    %0 = arith.subi %c1_i32, %arg0 : i32
    %1 = arith.muli %0, %arg2 : i32
    %c0_i32 = arith.constant 0 : i32
    %2 = arith.subi %c0_i32, %arg2 : i32
    %3 = arith.muli %arg0, %2 : i32
    %4 = arith.addi %1, %3 : i32
    %c0_i32_0 = arith.constant 0 : i32
    return %4, %arg1, %arg0 : i32, i32, i32
  }
  func.func @transform_2(%arg0: i32, %arg1: i32, %arg2: i32) -> (i32, i32, i32) {
    %c0_i32 = arith.constant 0 : i32
    %c0_i32_0 = arith.constant 0 : i32
    %c0_i32_1 = arith.constant 0 : i32
    return %arg0, %c0_i32, %c0_i32_0 : i32, i32, i32
  }
  func.func @transform_3(%arg0: i32, %arg1: i32, %arg2: i32) -> (i32, i32, i32, i32) {
    %c1_i32 = arith.constant 1 : i32
    %0 = arith.subi %c1_i32, %arg0 : i32
    %1 = arith.muli %0, %arg2 : i32
    %c0_i32 = arith.constant 0 : i32
    %2 = arith.subi %c0_i32, %arg2 : i32
    %3 = arith.muli %arg0, %2 : i32
    %4 = arith.addi %1, %3 : i32
    %c0_i32_0 = arith.constant 0 : i32
    %c0_i32_1 = arith.constant 0 : i32
    return %arg0, %4, %arg1, %c0_i32_0 : i32, i32, i32, i32
  }
  func.func @transform_4(%arg0: i32, %arg1: i32, %arg2: i32) -> (i32, i32, i32, i32) {
    %c1_i32 = arith.constant 1 : i32
    %0 = arith.subi %c1_i32, %arg0 : i32
    %1 = arith.muli %0, %arg2 : i32
    %c0_i32 = arith.constant 0 : i32
    %2 = arith.subi %c0_i32, %arg2 : i32
    %3 = arith.muli %arg0, %2 : i32
    %4 = arith.addi %1, %3 : i32
    %c0_i32_0 = arith.constant 0 : i32
    %c0_i32_1 = arith.constant 0 : i32
    return %arg0, %4, %arg1, %c0_i32_0 : i32, i32, i32, i32
  }
  func.func @transform_5(%arg0: i32, %arg1: i32, %arg2: i32) -> (i32, i32, i32, i32) {
    %c1_i32 = arith.constant 1 : i32
    %0 = arith.subi %c1_i32, %arg0 : i32
    %1 = arith.muli %0, %arg2 : i32
    %c0_i32 = arith.constant 0 : i32
    %2 = arith.subi %c0_i32, %arg2 : i32
    %3 = arith.muli %arg0, %2 : i32
    %4 = arith.addi %1, %3 : i32
    %c0_i32_0 = arith.constant 0 : i32
    %c0_i32_1 = arith.constant 0 : i32
    return %arg0, %4, %arg1, %c0_i32_0 : i32, i32, i32, i32
  }
}

module attributes {stable_mosaic.version = 11 : i64} {
  func.func @post_kernel(%arg0: i32, %arg1: memref<16x32xbf16, #tpu.memory_space<vmem>>, %arg2: memref<16x64xbf16, #tpu.memory_space<vmem>>, %arg3: memref<32x32xbf16, #tpu.memory_space<vmem>>, %arg4: memref<64x32xbf16, #tpu.memory_space<vmem>>, %arg5: memref<1x32xf32, #tpu.memory_space<vmem>>, %arg6: memref<1x1xf32, #tpu.memory_space<vmem>>, %arg7: memref<1x32xf32, #tpu.memory_space<vmem>>, %arg8: memref<1x32xf32, #tpu.memory_space<vmem>>, %arg9: memref<16x32xf32, #tpu.memory_space<vmem>>) attributes {dimension_semantics = [#tpu.dimension_semantics<parallel>], iteration_bounds = array<i64: 1>, scalar_prefetch = 0 : i64, scratch_operands = 0 : i64, tpu.core_type = #tpu.core_type<tc>, window_params = [{transform_indices = @transform_0, window_bounds = array<i64: 16, 32>}, {transform_indices = @transform_1, window_bounds = array<i64: 16, 64>}, {pipeline_mode = #tpu.pipeline_mode<synchronous>, transform_indices = @transform_2, window_bounds = array<i64: 32, 32>}, {pipeline_mode = #tpu.pipeline_mode<synchronous>, transform_indices = @transform_3, window_bounds = array<i64: 64, 32>}, {pipeline_mode = #tpu.pipeline_mode<synchronous>, transform_indices = @transform_4, window_bounds = array<i64: 1, 32>}, {pipeline_mode = #tpu.pipeline_mode<synchronous>, transform_indices = @transform_5, window_bounds = array<i64: 1, 1>}, {pipeline_mode = #tpu.pipeline_mode<synchronous>, transform_indices = @transform_6, window_bounds = array<i64: 1, 32>}, {pipeline_mode = #tpu.pipeline_mode<synchronous>, transform_indices = @transform_7, window_bounds = array<i64: 1, 32>}, {transform_indices = @transform_8, window_bounds = array<i64: 16, 32>}]} {
    %c0 = arith.constant 0 : index
    %c0_0 = arith.constant 0 : index
    %0 = vector.load %arg1[%c0, %c0_0] : memref<16x32xbf16, #tpu.memory_space<vmem>>, vector<16x32xbf16>
    %c0_1 = arith.constant 0 : index
    %c0_2 = arith.constant 0 : index
    %1 = vector.load %arg3[%c0_1, %c0_2] : memref<32x32xbf16, #tpu.memory_space<vmem>>, vector<32x32xbf16>
    %cst = arith.constant dense<0.000000e+00> : vector<16x32xf32>
    %2 = tpu.matmul %0, %1, %cst {dimension_numbers = #tpu.dot_dimension_numbers<[1], [0], [0], [1], [0, 0, 1, 1], [], []>} : vector<16x32xbf16>, vector<32x32xbf16>, vector<16x32xf32> -> vector<16x32xf32>
    %c0_3 = arith.constant 0 : index
    %c0_4 = arith.constant 0 : index
    %3 = vector.load %arg2[%c0_3, %c0_4] : memref<16x64xbf16, #tpu.memory_space<vmem>>, vector<16x64xbf16>
    %c0_5 = arith.constant 0 : index
    %c0_6 = arith.constant 0 : index
    %4 = vector.load %arg4[%c0_5, %c0_6] : memref<64x32xbf16, #tpu.memory_space<vmem>>, vector<64x32xbf16>
    %cst_7 = arith.constant dense<0.000000e+00> : vector<16x32xf32>
    %5 = tpu.matmul %3, %4, %cst_7 {dimension_numbers = #tpu.dot_dimension_numbers<[1], [0], [0], [1], [0, 0, 1, 1], [], []>} : vector<16x64xbf16>, vector<64x32xbf16>, vector<16x32xf32> -> vector<16x32xf32>
    %6 = arith.addf %2, %5 : vector<16x32xf32>
    %c0_8 = arith.constant 0 : index
    %c0_9 = arith.constant 0 : index
    %7 = vector.load %arg5[%c0_8, %c0_9] : memref<1x32xf32, #tpu.memory_space<vmem>>, vector<1x32xf32>
    %8 = vector.broadcast %7 : vector<1x32xf32> to vector<16x32xf32>
    %9 = arith.addf %6, %8 : vector<16x32xf32>
    %c0_10 = arith.constant 0 : index
    %c0_11 = arith.constant 0 : index
    %10 = vector.load %arg7[%c0_10, %c0_11] : memref<1x32xf32, #tpu.memory_space<vmem>>, vector<1x32xf32>
    %c0_12 = arith.constant 0 : index
    %c0_13 = arith.constant 0 : index
    %11 = vector.load %arg6[%c0_12, %c0_13] : memref<1x1xf32, #tpu.memory_space<vmem>>, vector<1x1xf32>
    %12 = vector.broadcast %11 : vector<1x1xf32> to vector<16x32xf32>
    %13 = arith.mulf %12, %9 : vector<16x32xf32>
    %14 = math.tanh %13 : vector<16x32xf32>
    %15 = vector.broadcast %10 : vector<1x32xf32> to vector<16x32xf32>
    %16 = arith.mulf %15, %14 : vector<16x32xf32>
    %c0_14 = arith.constant 0 : index
    %c0_15 = arith.constant 0 : index
    %17 = vector.load %arg8[%c0_14, %c0_15] : memref<1x32xf32, #tpu.memory_space<vmem>>, vector<1x32xf32>
    %18 = vector.broadcast %17 : vector<1x32xf32> to vector<16x32xf32>
    %19 = arith.addf %16, %18 : vector<16x32xf32>
    %c0_16 = arith.constant 0 : index
    %c0_17 = arith.constant 0 : index
    %20 = vector.load %arg9[%c0_16, %c0_17] : memref<16x32xf32, #tpu.memory_space<vmem>>, vector<16x32xf32>
    tpu.vector_store %arg9[%c0_16, %c0_17], %19 {strides = array<i32>} : memref<16x32xf32, #tpu.memory_space<vmem>>, vector<16x32xf32>,
    return
  }
  func.func @transform_0(%arg0: i32) -> (i32, i32) {
    %c0_i32 = arith.constant 0 : i32
    %c0_i32_0 = arith.constant 0 : i32
    return %arg0, %c0_i32 : i32, i32
  }
  func.func @transform_1(%arg0: i32) -> (i32, i32) {
    %c0_i32 = arith.constant 0 : i32
    %c0_i32_0 = arith.constant 0 : i32
    return %arg0, %c0_i32 : i32, i32
  }
  func.func @transform_2(%arg0: i32) -> (i32, i32) {
    %c0_i32 = arith.constant 0 : i32
    %c0_i32_0 = arith.constant 0 : i32
    %c0_i32_1 = arith.constant 0 : i32
    return %c0_i32, %c0_i32_0 : i32, i32
  }
  func.func @transform_3(%arg0: i32) -> (i32, i32) {
    %c0_i32 = arith.constant 0 : i32
    %c0_i32_0 = arith.constant 0 : i32
    %c0_i32_1 = arith.constant 0 : i32
    return %c0_i32, %c0_i32_0 : i32, i32
  }
  func.func @transform_4(%arg0: i32) -> (i32, i32) {
    %c0_i32 = arith.constant 0 : i32
    %c0_i32_0 = arith.constant 0 : i32
    %c0_i32_1 = arith.constant 0 : i32
    return %c0_i32, %c0_i32_0 : i32, i32
  }
  func.func @transform_5(%arg0: i32) -> (i32, i32) {
    %c0_i32 = arith.constant 0 : i32
    %c0_i32_0 = arith.constant 0 : i32
    %c0_i32_1 = arith.constant 0 : i32
    return %c0_i32, %c0_i32_0 : i32, i32
  }
  func.func @transform_6(%arg0: i32) -> (i32, i32) {
    %c0_i32 = arith.constant 0 : i32
    %c0_i32_0 = arith.constant 0 : i32
    %c0_i32_1 = arith.constant 0 : i32
    return %c0_i32, %c0_i32_0 : i32, i32
  }
  func.func @transform_7(%arg0: i32) -> (i32, i32) {
    %c0_i32 = arith.constant 0 : i32
    %c0_i32_0 = arith.constant 0 : i32
    %c0_i32_1 = arith.constant 0 : i32
    return %c0_i32, %c0_i32_0 : i32, i32
  }
  func.func @transform_8(%arg0: i32) -> (i32, i32) {
    %c0_i32 = arith.constant 0 : i32
    %c0_i32_0 = arith.constant 0 : i32
    return %arg0, %c0_i32 : i32, i32
  }
}

module attributes {stable_mosaic.version = 11 : i64} {
  func.func @kernel(%arg0: i32, %arg1: i32, %arg2: i32, %arg3: memref<1xf32, #tpu.memory_space<smem>>, %arg4: memref<8x2x128xbf16, #tpu.memory_space<vmem>>, %arg5: memref<1x32x128xbf16, #tpu.memory_space<vmem>>, %arg6: memref<1x8x2x32xbf16, #tpu.memory_space<vmem>>, %arg7: memref<1x8x2x32xf32, #tpu.memory_space<vmem>>, %arg8: memref<1x8x2x32xf32, #tpu.memory_space<vmem>>, %arg9: memref<2x32xf32, #tpu.memory_space<vmem>>, %arg10: memref<2x32xf32, #tpu.memory_space<vmem>>) attributes {dimension_semantics = [#tpu.dimension_semantics<parallel>, #tpu.dimension_semantics<parallel>, #tpu.dimension_semantics<arbitrary>], iteration_bounds = array<i64: 1, 1, 1>, scalar_prefetch = 0 : i64, scratch_operands = 2 : i64, tpu.core_type = #tpu.core_type<tc>, window_params = [{transform_indices = @transform_0, window_bounds = array<i64: 1>}, {transform_indices = @transform_1, window_bounds = array<i64: 8, 2, 128>}, {transform_indices = @transform_2, window_bounds = array<i64: 1, 32, 128>}, {transform_indices = @transform_3, window_bounds = array<i64: 1, 8, 2, 32>}, {transform_indices = @transform_4, window_bounds = array<i64: 1, 8, 2, 32>}, {transform_indices = @transform_5, window_bounds = array<i64: 1, 8, 2, 32>}]} {
    %c0_i32 = arith.constant 0 : i32
    %0 = arith.cmpi eq, %arg2, %c0_i32 : i32
    %1 = arith.extui %0 : i1 to i32
    %c0_i32_0 = arith.constant 0 : i32
    %2 = arith.cmpi ne, %1, %c0_i32_0 : i32
    scf.if %2 {
      %cst_155 = arith.constant 0.000000e+00 : f32
      %459 = vector.broadcast %cst_155 : f32 to vector<2x32xf32>
      %c0_156 = arith.constant 0 : index
      %c0_157 = arith.constant 0 : index
      %460 = vector.load %arg9[%c0_156, %c0_157] : memref<2x32xf32, #tpu.memory_space<vmem>>, vector<2x32xf32>
      tpu.vector_store %arg9[%c0_156, %c0_157], %459 {strides = array<i32>} : memref<2x32xf32, #tpu.memory_space<vmem>>, vector<2x32xf32>,
      %cst_158 = arith.constant 0.000000e+00 : f32
      %461 = vector.broadcast %cst_158 : f32 to vector<2x32xf32>
      %c0_159 = arith.constant 0 : index
      %c0_160 = arith.constant 0 : index
      %462 = vector.load %arg10[%c0_159, %c0_160] : memref<2x32xf32, #tpu.memory_space<vmem>>, vector<2x32xf32>
      tpu.vector_store %arg10[%c0_159, %c0_160], %461 {strides = array<i32>} : memref<2x32xf32, #tpu.memory_space<vmem>>, vector<2x32xf32>,
    } else {
    }
    %3 = arith.index_cast %arg0 : i32 to index
    %4 = memref.load %arg3[%3] : memref<1xf32, #tpu.memory_space<smem>>
    %c0 = arith.constant 0 : index
    %c0_1 = arith.constant 0 : index
    %c0_2 = arith.constant 0 : index
    %5 = vector.load %arg5[%c0, %c0_1, %c0_2] : memref<1x32x128xbf16, #tpu.memory_space<vmem>>, vector<1x32x128xbf16>
    %6 = vector.shape_cast %5 : vector<1x32x128xbf16> to vector<32x128xbf16>
    %c0_3 = arith.constant 0 : index
    %c0_4 = arith.constant 0 : index
    %7 = vector.load %arg9[%c0_3, %c0_4] : memref<2x32xf32, #tpu.memory_space<vmem>>, vector<2x32xf32>
    %c0_5 = arith.constant 0 : index
    %c0_6 = arith.constant 0 : index
    %8 = vector.load %arg10[%c0_5, %c0_6] : memref<2x32xf32, #tpu.memory_space<vmem>>, vector<2x32xf32>
    %c0_i32_7 = arith.constant 0 : i32
    %c1_i32 = arith.constant 1 : i32
    %9 = arith.subi %c1_i32, %arg0 : i32
    %10 = arith.muli %9, %c0_i32_7 : i32
    %c7_i32 = arith.constant 7 : i32
    %11 = arith.subi %c7_i32, %c0_i32_7 : i32
    %12 = arith.muli %arg0, %11 : i32
    %13 = arith.addi %10, %12 : i32
    %14 = arith.index_cast %13 : i32 to index
    %c0_8 = arith.constant 0 : index
    %c0_9 = arith.constant 0 : index
    %15 = vector.load %arg4[%14, %c0_8, %c0_9] : memref<8x2x128xbf16, #tpu.memory_space<vmem>>, vector<1x2x128xbf16>
    %16 = vector.shape_cast %15 : vector<1x2x128xbf16> to vector<2x128xbf16>
    %17 = arith.extf %16 : vector<2x128xbf16> to vector<2x128xf32>
    %18 = arith.truncf %8 : vector<2x32xf32> to vector<2x32xbf16>
    %cst = arith.constant dense<0.000000e+00> : vector<2x128xf32>
    %19 = tpu.matmul %18, %6, %cst {dimension_numbers = #tpu.dot_dimension_numbers<[1], [0], [0], [1], [0, 0, 1, 1], [], []>} : vector<2x32xbf16>, vector<32x128xbf16>, vector<2x128xf32> -> vector<2x128xf32>
    %20 = arith.addf %17, %19 : vector<2x128xf32>
    %21 = vector.extract_strided_slice %20 {offsets = [0, 0], sizes = [2, 32], strides = [1, 1]} : vector<2x128xf32> to vector<2x32xf32>
    %22 = arith.negf %21 : vector<2x32xf32>
    %23 = math.exp %22 : vector<2x32xf32>
    %cst_10 = arith.constant 1.000000e+00 : f32
    %24 = vector.broadcast %cst_10 : f32 to vector<2x32xf32>
    %25 = arith.addf %24, %23 : vector<2x32xf32>
    %26 = arith.divf %24, %25 : vector<2x32xf32>
    %27 = vector.extract_strided_slice %20 {offsets = [0, 32], sizes = [2, 32], strides = [1, 1]} : vector<2x128xf32> to vector<2x32xf32>
    %28 = arith.negf %27 : vector<2x32xf32>
    %29 = math.exp %28 : vector<2x32xf32>
    %cst_11 = arith.constant 1.000000e+00 : f32
    %30 = vector.broadcast %cst_11 : f32 to vector<2x32xf32>
    %31 = arith.addf %30, %29 : vector<2x32xf32>
    %32 = arith.divf %30, %31 : vector<2x32xf32>
    %33 = vector.extract_strided_slice %20 {offsets = [0, 64], sizes = [2, 32], strides = [1, 1]} : vector<2x128xf32> to vector<2x32xf32>
    %34 = math.tanh %33 : vector<2x32xf32>
    %35 = vector.extract_strided_slice %20 {offsets = [0, 96], sizes = [2, 32], strides = [1, 1]} : vector<2x128xf32> to vector<2x32xf32>
    %36 = arith.negf %35 : vector<2x32xf32>
    %37 = math.exp %36 : vector<2x32xf32>
    %cst_12 = arith.constant 1.000000e+00 : f32
    %38 = vector.broadcast %cst_12 : f32 to vector<2x32xf32>
    %39 = arith.addf %38, %37 : vector<2x32xf32>
    %40 = arith.divf %38, %39 : vector<2x32xf32>
    %41 = arith.mulf %32, %7 : vector<2x32xf32>
    %42 = arith.mulf %26, %34 : vector<2x32xf32>
    %43 = arith.addf %41, %42 : vector<2x32xf32>
    %44 = math.tanh %43 : vector<2x32xf32>
    %45 = arith.mulf %40, %44 : vector<2x32xf32>
    %46 = vector.broadcast %4 : f32 to vector<2x32xf32>
    %47 = arith.subf %45, %46 : vector<2x32xf32>
    %cst_13 = arith.constant 0.000000e+00 : f32
    %48 = vector.broadcast %cst_13 : f32 to vector<2x32xf32>
    %49 = arith.cmpf ogt, %47, %48 : vector<2x32xf32>
    %50 = arith.extui %49 : vector<2x32xi1> to vector<2x32xi32>
    %51 = arith.sitofp %50 : vector<2x32xi32> to vector<2x32xf32>
    %52 = arith.truncf %51 : vector<2x32xf32> to vector<2x32xbf16>
    %c0_14 = arith.constant 0 : index
    %53 = arith.index_cast %13 : i32 to index
    %c0_15 = arith.constant 0 : index
    %c0_16 = arith.constant 0 : index
    %54 = vector.load %arg6[%c0_14, %53, %c0_15, %c0_16] : memref<1x8x2x32xbf16, #tpu.memory_space<vmem>>, vector<1x1x2x32xbf16>
    %55 = vector.shape_cast %54 : vector<1x1x2x32xbf16> to vector<2x32xbf16>
    %56 = vector.shape_cast %52 : vector<2x32xbf16> to vector<1x1x2x32xbf16>
    tpu.vector_store %arg6[%c0_14, %53, %c0_15, %c0_16], %56 {strides = array<i32>} : memref<1x8x2x32xbf16, #tpu.memory_space<vmem>>, vector<1x1x2x32xbf16>,
    %c0_17 = arith.constant 0 : index
    %57 = arith.index_cast %13 : i32 to index
    %c0_18 = arith.constant 0 : index
    %c0_19 = arith.constant 0 : index
    %58 = vector.load %arg7[%c0_17, %57, %c0_18, %c0_19] : memref<1x8x2x32xf32, #tpu.memory_space<vmem>>, vector<1x1x2x32xf32>
    %59 = vector.shape_cast %58 : vector<1x1x2x32xf32> to vector<2x32xf32>
    %60 = vector.shape_cast %43 : vector<2x32xf32> to vector<1x1x2x32xf32>
    tpu.vector_store %arg7[%c0_17, %57, %c0_18, %c0_19], %60 {strides = array<i32>} : memref<1x8x2x32xf32, #tpu.memory_space<vmem>>, vector<1x1x2x32xf32>,
    %c0_20 = arith.constant 0 : index
    %61 = arith.index_cast %13 : i32 to index
    %c0_21 = arith.constant 0 : index
    %c0_22 = arith.constant 0 : index
    %62 = vector.load %arg8[%c0_20, %61, %c0_21, %c0_22] : memref<1x8x2x32xf32, #tpu.memory_space<vmem>>, vector<1x1x2x32xf32>
    %63 = vector.shape_cast %62 : vector<1x1x2x32xf32> to vector<2x32xf32>
    %64 = vector.shape_cast %45 : vector<2x32xf32> to vector<1x1x2x32xf32>
    tpu.vector_store %arg8[%c0_20, %61, %c0_21, %c0_22], %64 {strides = array<i32>} : memref<1x8x2x32xf32, #tpu.memory_space<vmem>>, vector<1x1x2x32xf32>,
    %c1_i32_23 = arith.constant 1 : i32
    %c1_i32_24 = arith.constant 1 : i32
    %65 = arith.subi %c1_i32_24, %arg0 : i32
    %66 = arith.muli %65, %c1_i32_23 : i32
    %c7_i32_25 = arith.constant 7 : i32
    %67 = arith.subi %c7_i32_25, %c1_i32_23 : i32
    %68 = arith.muli %arg0, %67 : i32
    %69 = arith.addi %66, %68 : i32
    %70 = arith.index_cast %69 : i32 to index
    %c0_26 = arith.constant 0 : index
    %c0_27 = arith.constant 0 : index
    %71 = vector.load %arg4[%70, %c0_26, %c0_27] : memref<8x2x128xbf16, #tpu.memory_space<vmem>>, vector<1x2x128xbf16>
    %72 = vector.shape_cast %71 : vector<1x2x128xbf16> to vector<2x128xbf16>
    %73 = arith.extf %72 : vector<2x128xbf16> to vector<2x128xf32>
    %74 = arith.truncf %45 : vector<2x32xf32> to vector<2x32xbf16>
    %cst_28 = arith.constant dense<0.000000e+00> : vector<2x128xf32>
    %75 = tpu.matmul %74, %6, %cst_28 {dimension_numbers = #tpu.dot_dimension_numbers<[1], [0], [0], [1], [0, 0, 1, 1], [], []>} : vector<2x32xbf16>, vector<32x128xbf16>, vector<2x128xf32> -> vector<2x128xf32>
    %76 = arith.addf %73, %75 : vector<2x128xf32>
    %77 = vector.extract_strided_slice %76 {offsets = [0, 0], sizes = [2, 32], strides = [1, 1]} : vector<2x128xf32> to vector<2x32xf32>
    %78 = arith.negf %77 : vector<2x32xf32>
    %79 = math.exp %78 : vector<2x32xf32>
    %cst_29 = arith.constant 1.000000e+00 : f32
    %80 = vector.broadcast %cst_29 : f32 to vector<2x32xf32>
    %81 = arith.addf %80, %79 : vector<2x32xf32>
    %82 = arith.divf %80, %81 : vector<2x32xf32>
    %83 = vector.extract_strided_slice %76 {offsets = [0, 32], sizes = [2, 32], strides = [1, 1]} : vector<2x128xf32> to vector<2x32xf32>
    %84 = arith.negf %83 : vector<2x32xf32>
    %85 = math.exp %84 : vector<2x32xf32>
    %cst_30 = arith.constant 1.000000e+00 : f32
    %86 = vector.broadcast %cst_30 : f32 to vector<2x32xf32>
    %87 = arith.addf %86, %85 : vector<2x32xf32>
    %88 = arith.divf %86, %87 : vector<2x32xf32>
    %89 = vector.extract_strided_slice %76 {offsets = [0, 64], sizes = [2, 32], strides = [1, 1]} : vector<2x128xf32> to vector<2x32xf32>
    %90 = math.tanh %89 : vector<2x32xf32>
    %91 = vector.extract_strided_slice %76 {offsets = [0, 96], sizes = [2, 32], strides = [1, 1]} : vector<2x128xf32> to vector<2x32xf32>
    %92 = arith.negf %91 : vector<2x32xf32>
    %93 = math.exp %92 : vector<2x32xf32>
    %cst_31 = arith.constant 1.000000e+00 : f32
    %94 = vector.broadcast %cst_31 : f32 to vector<2x32xf32>
    %95 = arith.addf %94, %93 : vector<2x32xf32>
    %96 = arith.divf %94, %95 : vector<2x32xf32>
    %97 = arith.mulf %88, %43 : vector<2x32xf32>
    %98 = arith.mulf %82, %90 : vector<2x32xf32>
    %99 = arith.addf %97, %98 : vector<2x32xf32>
    %100 = math.tanh %99 : vector<2x32xf32>
    %101 = arith.mulf %96, %100 : vector<2x32xf32>
    %102 = vector.broadcast %4 : f32 to vector<2x32xf32>
    %103 = arith.subf %101, %102 : vector<2x32xf32>
    %cst_32 = arith.constant 0.000000e+00 : f32
    %104 = vector.broadcast %cst_32 : f32 to vector<2x32xf32>
    %105 = arith.cmpf ogt, %103, %104 : vector<2x32xf32>
    %106 = arith.extui %105 : vector<2x32xi1> to vector<2x32xi32>
    %107 = arith.sitofp %106 : vector<2x32xi32> to vector<2x32xf32>
    %108 = arith.truncf %107 : vector<2x32xf32> to vector<2x32xbf16>
    %c0_33 = arith.constant 0 : index
    %109 = arith.index_cast %69 : i32 to index
    %c0_34 = arith.constant 0 : index
    %c0_35 = arith.constant 0 : index
    %110 = vector.load %arg6[%c0_33, %109, %c0_34, %c0_35] : memref<1x8x2x32xbf16, #tpu.memory_space<vmem>>, vector<1x1x2x32xbf16>
    %111 = vector.shape_cast %110 : vector<1x1x2x32xbf16> to vector<2x32xbf16>
    %112 = vector.shape_cast %108 : vector<2x32xbf16> to vector<1x1x2x32xbf16>
    tpu.vector_store %arg6[%c0_33, %109, %c0_34, %c0_35], %112 {strides = array<i32>} : memref<1x8x2x32xbf16, #tpu.memory_space<vmem>>, vector<1x1x2x32xbf16>,
    %c0_36 = arith.constant 0 : index
    %113 = arith.index_cast %69 : i32 to index
    %c0_37 = arith.constant 0 : index
    %c0_38 = arith.constant 0 : index
    %114 = vector.load %arg7[%c0_36, %113, %c0_37, %c0_38] : memref<1x8x2x32xf32, #tpu.memory_space<vmem>>, vector<1x1x2x32xf32>
    %115 = vector.shape_cast %114 : vector<1x1x2x32xf32> to vector<2x32xf32>
    %116 = vector.shape_cast %99 : vector<2x32xf32> to vector<1x1x2x32xf32>
    tpu.vector_store %arg7[%c0_36, %113, %c0_37, %c0_38], %116 {strides = array<i32>} : memref<1x8x2x32xf32, #tpu.memory_space<vmem>>, vector<1x1x2x32xf32>,
    %c0_39 = arith.constant 0 : index
    %117 = arith.index_cast %69 : i32 to index
    %c0_40 = arith.constant 0 : index
    %c0_41 = arith.constant 0 : index
    %118 = vector.load %arg8[%c0_39, %117, %c0_40, %c0_41] : memref<1x8x2x32xf32, #tpu.memory_space<vmem>>, vector<1x1x2x32xf32>
    %119 = vector.shape_cast %118 : vector<1x1x2x32xf32> to vector<2x32xf32>
    %120 = vector.shape_cast %101 : vector<2x32xf32> to vector<1x1x2x32xf32>
    tpu.vector_store %arg8[%c0_39, %117, %c0_40, %c0_41], %120 {strides = array<i32>} : memref<1x8x2x32xf32, #tpu.memory_space<vmem>>, vector<1x1x2x32xf32>,
    %c2_i32 = arith.constant 2 : i32
    %c1_i32_42 = arith.constant 1 : i32
    %121 = arith.subi %c1_i32_42, %arg0 : i32
    %122 = arith.muli %121, %c2_i32 : i32
    %c7_i32_43 = arith.constant 7 : i32
    %123 = arith.subi %c7_i32_43, %c2_i32 : i32
    %124 = arith.muli %arg0, %123 : i32
    %125 = arith.addi %122, %124 : i32
    %126 = arith.index_cast %125 : i32 to index
    %c0_44 = arith.constant 0 : index
    %c0_45 = arith.constant 0 : index
    %127 = vector.load %arg4[%126, %c0_44, %c0_45] : memref<8x2x128xbf16, #tpu.memory_space<vmem>>, vector<1x2x128xbf16>
    %128 = vector.shape_cast %127 : vector<1x2x128xbf16> to vector<2x128xbf16>
    %129 = arith.extf %128 : vector<2x128xbf16> to vector<2x128xf32>
    %130 = arith.truncf %101 : vector<2x32xf32> to vector<2x32xbf16>
    %cst_46 = arith.constant dense<0.000000e+00> : vector<2x128xf32>
    %131 = tpu.matmul %130, %6, %cst_46 {dimension_numbers = #tpu.dot_dimension_numbers<[1], [0], [0], [1], [0, 0, 1, 1], [], []>} : vector<2x32xbf16>, vector<32x128xbf16>, vector<2x128xf32> -> vector<2x128xf32>
    %132 = arith.addf %129, %131 : vector<2x128xf32>
    %133 = vector.extract_strided_slice %132 {offsets = [0, 0], sizes = [2, 32], strides = [1, 1]} : vector<2x128xf32> to vector<2x32xf32>
    %134 = arith.negf %133 : vector<2x32xf32>
    %135 = math.exp %134 : vector<2x32xf32>
    %cst_47 = arith.constant 1.000000e+00 : f32
    %136 = vector.broadcast %cst_47 : f32 to vector<2x32xf32>
    %137 = arith.addf %136, %135 : vector<2x32xf32>
    %138 = arith.divf %136, %137 : vector<2x32xf32>
    %139 = vector.extract_strided_slice %132 {offsets = [0, 32], sizes = [2, 32], strides = [1, 1]} : vector<2x128xf32> to vector<2x32xf32>
    %140 = arith.negf %139 : vector<2x32xf32>
    %141 = math.exp %140 : vector<2x32xf32>
    %cst_48 = arith.constant 1.000000e+00 : f32
    %142 = vector.broadcast %cst_48 : f32 to vector<2x32xf32>
    %143 = arith.addf %142, %141 : vector<2x32xf32>
    %144 = arith.divf %142, %143 : vector<2x32xf32>
    %145 = vector.extract_strided_slice %132 {offsets = [0, 64], sizes = [2, 32], strides = [1, 1]} : vector<2x128xf32> to vector<2x32xf32>
    %146 = math.tanh %145 : vector<2x32xf32>
    %147 = vector.extract_strided_slice %132 {offsets = [0, 96], sizes = [2, 32], strides = [1, 1]} : vector<2x128xf32> to vector<2x32xf32>
    %148 = arith.negf %147 : vector<2x32xf32>
    %149 = math.exp %148 : vector<2x32xf32>
    %cst_49 = arith.constant 1.000000e+00 : f32
    %150 = vector.broadcast %cst_49 : f32 to vector<2x32xf32>
    %151 = arith.addf %150, %149 : vector<2x32xf32>
    %152 = arith.divf %150, %151 : vector<2x32xf32>
    %153 = arith.mulf %144, %99 : vector<2x32xf32>
    %154 = arith.mulf %138, %146 : vector<2x32xf32>
    %155 = arith.addf %153, %154 : vector<2x32xf32>
    %156 = math.tanh %155 : vector<2x32xf32>
    %157 = arith.mulf %152, %156 : vector<2x32xf32>
    %158 = vector.broadcast %4 : f32 to vector<2x32xf32>
    %159 = arith.subf %157, %158 : vector<2x32xf32>
    %cst_50 = arith.constant 0.000000e+00 : f32
    %160 = vector.broadcast %cst_50 : f32 to vector<2x32xf32>
    %161 = arith.cmpf ogt, %159, %160 : vector<2x32xf32>
    %162 = arith.extui %161 : vector<2x32xi1> to vector<2x32xi32>
    %163 = arith.sitofp %162 : vector<2x32xi32> to vector<2x32xf32>
    %164 = arith.truncf %163 : vector<2x32xf32> to vector<2x32xbf16>
    %c0_51 = arith.constant 0 : index
    %165 = arith.index_cast %125 : i32 to index
    %c0_52 = arith.constant 0 : index
    %c0_53 = arith.constant 0 : index
    %166 = vector.load %arg6[%c0_51, %165, %c0_52, %c0_53] : memref<1x8x2x32xbf16, #tpu.memory_space<vmem>>, vector<1x1x2x32xbf16>
    %167 = vector.shape_cast %166 : vector<1x1x2x32xbf16> to vector<2x32xbf16>
    %168 = vector.shape_cast %164 : vector<2x32xbf16> to vector<1x1x2x32xbf16>
    tpu.vector_store %arg6[%c0_51, %165, %c0_52, %c0_53], %168 {strides = array<i32>} : memref<1x8x2x32xbf16, #tpu.memory_space<vmem>>, vector<1x1x2x32xbf16>,
    %c0_54 = arith.constant 0 : index
    %169 = arith.index_cast %125 : i32 to index
    %c0_55 = arith.constant 0 : index
    %c0_56 = arith.constant 0 : index
    %170 = vector.load %arg7[%c0_54, %169, %c0_55, %c0_56] : memref<1x8x2x32xf32, #tpu.memory_space<vmem>>, vector<1x1x2x32xf32>
    %171 = vector.shape_cast %170 : vector<1x1x2x32xf32> to vector<2x32xf32>
    %172 = vector.shape_cast %155 : vector<2x32xf32> to vector<1x1x2x32xf32>
    tpu.vector_store %arg7[%c0_54, %169, %c0_55, %c0_56], %172 {strides = array<i32>} : memref<1x8x2x32xf32, #tpu.memory_space<vmem>>, vector<1x1x2x32xf32>,
    %c0_57 = arith.constant 0 : index
    %173 = arith.index_cast %125 : i32 to index
    %c0_58 = arith.constant 0 : index
    %c0_59 = arith.constant 0 : index
    %174 = vector.load %arg8[%c0_57, %173, %c0_58, %c0_59] : memref<1x8x2x32xf32, #tpu.memory_space<vmem>>, vector<1x1x2x32xf32>
    %175 = vector.shape_cast %174 : vector<1x1x2x32xf32> to vector<2x32xf32>
    %176 = vector.shape_cast %157 : vector<2x32xf32> to vector<1x1x2x32xf32>
    tpu.vector_store %arg8[%c0_57, %173, %c0_58, %c0_59], %176 {strides = array<i32>} : memref<1x8x2x32xf32, #tpu.memory_space<vmem>>, vector<1x1x2x32xf32>,
    %c3_i32 = arith.constant 3 : i32
    %c1_i32_60 = arith.constant 1 : i32
    %177 = arith.subi %c1_i32_60, %arg0 : i32
    %178 = arith.muli %177, %c3_i32 : i32
    %c7_i32_61 = arith.constant 7 : i32
    %179 = arith.subi %c7_i32_61, %c3_i32 : i32
    %180 = arith.muli %arg0, %179 : i32
    %181 = arith.addi %178, %180 : i32
    %182 = arith.index_cast %181 : i32 to index
    %c0_62 = arith.constant 0 : index
    %c0_63 = arith.constant 0 : index
    %183 = vector.load %arg4[%182, %c0_62, %c0_63] : memref<8x2x128xbf16, #tpu.memory_space<vmem>>, vector<1x2x128xbf16>
    %184 = vector.shape_cast %183 : vector<1x2x128xbf16> to vector<2x128xbf16>
    %185 = arith.extf %184 : vector<2x128xbf16> to vector<2x128xf32>
    %186 = arith.truncf %157 : vector<2x32xf32> to vector<2x32xbf16>
    %cst_64 = arith.constant dense<0.000000e+00> : vector<2x128xf32>
    %187 = tpu.matmul %186, %6, %cst_64 {dimension_numbers = #tpu.dot_dimension_numbers<[1], [0], [0], [1], [0, 0, 1, 1], [], []>} : vector<2x32xbf16>, vector<32x128xbf16>, vector<2x128xf32> -> vector<2x128xf32>
    %188 = arith.addf %185, %187 : vector<2x128xf32>
    %189 = vector.extract_strided_slice %188 {offsets = [0, 0], sizes = [2, 32], strides = [1, 1]} : vector<2x128xf32> to vector<2x32xf32>
    %190 = arith.negf %189 : vector<2x32xf32>
    %191 = math.exp %190 : vector<2x32xf32>
    %cst_65 = arith.constant 1.000000e+00 : f32
    %192 = vector.broadcast %cst_65 : f32 to vector<2x32xf32>
    %193 = arith.addf %192, %191 : vector<2x32xf32>
    %194 = arith.divf %192, %193 : vector<2x32xf32>
    %195 = vector.extract_strided_slice %188 {offsets = [0, 32], sizes = [2, 32], strides = [1, 1]} : vector<2x128xf32> to vector<2x32xf32>
    %196 = arith.negf %195 : vector<2x32xf32>
    %197 = math.exp %196 : vector<2x32xf32>
    %cst_66 = arith.constant 1.000000e+00 : f32
    %198 = vector.broadcast %cst_66 : f32 to vector<2x32xf32>
    %199 = arith.addf %198, %197 : vector<2x32xf32>
    %200 = arith.divf %198, %199 : vector<2x32xf32>
    %201 = vector.extract_strided_slice %188 {offsets = [0, 64], sizes = [2, 32], strides = [1, 1]} : vector<2x128xf32> to vector<2x32xf32>
    %202 = math.tanh %201 : vector<2x32xf32>
    %203 = vector.extract_strided_slice %188 {offsets = [0, 96], sizes = [2, 32], strides = [1, 1]} : vector<2x128xf32> to vector<2x32xf32>
    %204 = arith.negf %203 : vector<2x32xf32>
    %205 = math.exp %204 : vector<2x32xf32>
    %cst_67 = arith.constant 1.000000e+00 : f32
    %206 = vector.broadcast %cst_67 : f32 to vector<2x32xf32>
    %207 = arith.addf %206, %205 : vector<2x32xf32>
    %208 = arith.divf %206, %207 : vector<2x32xf32>
    %209 = arith.mulf %200, %155 : vector<2x32xf32>
    %210 = arith.mulf %194, %202 : vector<2x32xf32>
    %211 = arith.addf %209, %210 : vector<2x32xf32>
    %212 = math.tanh %211 : vector<2x32xf32>
    %213 = arith.mulf %208, %212 : vector<2x32xf32>
    %214 = vector.broadcast %4 : f32 to vector<2x32xf32>
    %215 = arith.subf %213, %214 : vector<2x32xf32>
    %cst_68 = arith.constant 0.000000e+00 : f32
    %216 = vector.broadcast %cst_68 : f32 to vector<2x32xf32>
    %217 = arith.cmpf ogt, %215, %216 : vector<2x32xf32>
    %218 = arith.extui %217 : vector<2x32xi1> to vector<2x32xi32>
    %219 = arith.sitofp %218 : vector<2x32xi32> to vector<2x32xf32>
    %220 = arith.truncf %219 : vector<2x32xf32> to vector<2x32xbf16>
    %c0_69 = arith.constant 0 : index
    %221 = arith.index_cast %181 : i32 to index
    %c0_70 = arith.constant 0 : index
    %c0_71 = arith.constant 0 : index
    %222 = vector.load %arg6[%c0_69, %221, %c0_70, %c0_71] : memref<1x8x2x32xbf16, #tpu.memory_space<vmem>>, vector<1x1x2x32xbf16>
    %223 = vector.shape_cast %222 : vector<1x1x2x32xbf16> to vector<2x32xbf16>
    %224 = vector.shape_cast %220 : vector<2x32xbf16> to vector<1x1x2x32xbf16>
    tpu.vector_store %arg6[%c0_69, %221, %c0_70, %c0_71], %224 {strides = array<i32>} : memref<1x8x2x32xbf16, #tpu.memory_space<vmem>>, vector<1x1x2x32xbf16>,
    %c0_72 = arith.constant 0 : index
    %225 = arith.index_cast %181 : i32 to index
    %c0_73 = arith.constant 0 : index
    %c0_74 = arith.constant 0 : index
    %226 = vector.load %arg7[%c0_72, %225, %c0_73, %c0_74] : memref<1x8x2x32xf32, #tpu.memory_space<vmem>>, vector<1x1x2x32xf32>
    %227 = vector.shape_cast %226 : vector<1x1x2x32xf32> to vector<2x32xf32>
    %228 = vector.shape_cast %211 : vector<2x32xf32> to vector<1x1x2x32xf32>
    tpu.vector_store %arg7[%c0_72, %225, %c0_73, %c0_74], %228 {strides = array<i32>} : memref<1x8x2x32xf32, #tpu.memory_space<vmem>>, vector<1x1x2x32xf32>,
    %c0_75 = arith.constant 0 : index
    %229 = arith.index_cast %181 : i32 to index
    %c0_76 = arith.constant 0 : index
    %c0_77 = arith.constant 0 : index
    %230 = vector.load %arg8[%c0_75, %229, %c0_76, %c0_77] : memref<1x8x2x32xf32, #tpu.memory_space<vmem>>, vector<1x1x2x32xf32>
    %231 = vector.shape_cast %230 : vector<1x1x2x32xf32> to vector<2x32xf32>
    %232 = vector.shape_cast %213 : vector<2x32xf32> to vector<1x1x2x32xf32>
    tpu.vector_store %arg8[%c0_75, %229, %c0_76, %c0_77], %232 {strides = array<i32>} : memref<1x8x2x32xf32, #tpu.memory_space<vmem>>, vector<1x1x2x32xf32>,
    %c4_i32 = arith.constant 4 : i32
    %c1_i32_78 = arith.constant 1 : i32
    %233 = arith.subi %c1_i32_78, %arg0 : i32
    %234 = arith.muli %233, %c4_i32 : i32
    %c7_i32_79 = arith.constant 7 : i32
    %235 = arith.subi %c7_i32_79, %c4_i32 : i32
    %236 = arith.muli %arg0, %235 : i32
    %237 = arith.addi %234, %236 : i32
    %238 = arith.index_cast %237 : i32 to index
    %c0_80 = arith.constant 0 : index
    %c0_81 = arith.constant 0 : index
    %239 = vector.load %arg4[%238, %c0_80, %c0_81] : memref<8x2x128xbf16, #tpu.memory_space<vmem>>, vector<1x2x128xbf16>
    %240 = vector.shape_cast %239 : vector<1x2x128xbf16> to vector<2x128xbf16>
    %241 = arith.extf %240 : vector<2x128xbf16> to vector<2x128xf32>
    %242 = arith.truncf %213 : vector<2x32xf32> to vector<2x32xbf16>
    %cst_82 = arith.constant dense<0.000000e+00> : vector<2x128xf32>
    %243 = tpu.matmul %242, %6, %cst_82 {dimension_numbers = #tpu.dot_dimension_numbers<[1], [0], [0], [1], [0, 0, 1, 1], [], []>} : vector<2x32xbf16>, vector<32x128xbf16>, vector<2x128xf32> -> vector<2x128xf32>
    %244 = arith.addf %241, %243 : vector<2x128xf32>
    %245 = vector.extract_strided_slice %244 {offsets = [0, 0], sizes = [2, 32], strides = [1, 1]} : vector<2x128xf32> to vector<2x32xf32>
    %246 = arith.negf %245 : vector<2x32xf32>
    %247 = math.exp %246 : vector<2x32xf32>
    %cst_83 = arith.constant 1.000000e+00 : f32
    %248 = vector.broadcast %cst_83 : f32 to vector<2x32xf32>
    %249 = arith.addf %248, %247 : vector<2x32xf32>
    %250 = arith.divf %248, %249 : vector<2x32xf32>
    %251 = vector.extract_strided_slice %244 {offsets = [0, 32], sizes = [2, 32], strides = [1, 1]} : vector<2x128xf32> to vector<2x32xf32>
    %252 = arith.negf %251 : vector<2x32xf32>
    %253 = math.exp %252 : vector<2x32xf32>
    %cst_84 = arith.constant 1.000000e+00 : f32
    %254 = vector.broadcast %cst_84 : f32 to vector<2x32xf32>
    %255 = arith.addf %254, %253 : vector<2x32xf32>
    %256 = arith.divf %254, %255 : vector<2x32xf32>
    %257 = vector.extract_strided_slice %244 {offsets = [0, 64], sizes = [2, 32], strides = [1, 1]} : vector<2x128xf32> to vector<2x32xf32>
    %258 = math.tanh %257 : vector<2x32xf32>
    %259 = vector.extract_strided_slice %244 {offsets = [0, 96], sizes = [2, 32], strides = [1, 1]} : vector<2x128xf32> to vector<2x32xf32>
    %260 = arith.negf %259 : vector<2x32xf32>
    %261 = math.exp %260 : vector<2x32xf32>
    %cst_85 = arith.constant 1.000000e+00 : f32
    %262 = vector.broadcast %cst_85 : f32 to vector<2x32xf32>
    %263 = arith.addf %262, %261 : vector<2x32xf32>
    %264 = arith.divf %262, %263 : vector<2x32xf32>
    %265 = arith.mulf %256, %211 : vector<2x32xf32>
    %266 = arith.mulf %250, %258 : vector<2x32xf32>
    %267 = arith.addf %265, %266 : vector<2x32xf32>
    %268 = math.tanh %267 : vector<2x32xf32>
    %269 = arith.mulf %264, %268 : vector<2x32xf32>
    %270 = vector.broadcast %4 : f32 to vector<2x32xf32>
    %271 = arith.subf %269, %270 : vector<2x32xf32>
    %cst_86 = arith.constant 0.000000e+00 : f32
    %272 = vector.broadcast %cst_86 : f32 to vector<2x32xf32>
    %273 = arith.cmpf ogt, %271, %272 : vector<2x32xf32>
    %274 = arith.extui %273 : vector<2x32xi1> to vector<2x32xi32>
    %275 = arith.sitofp %274 : vector<2x32xi32> to vector<2x32xf32>
    %276 = arith.truncf %275 : vector<2x32xf32> to vector<2x32xbf16>
    %c0_87 = arith.constant 0 : index
    %277 = arith.index_cast %237 : i32 to index
    %c0_88 = arith.constant 0 : index
    %c0_89 = arith.constant 0 : index
    %278 = vector.load %arg6[%c0_87, %277, %c0_88, %c0_89] : memref<1x8x2x32xbf16, #tpu.memory_space<vmem>>, vector<1x1x2x32xbf16>
    %279 = vector.shape_cast %278 : vector<1x1x2x32xbf16> to vector<2x32xbf16>
    %280 = vector.shape_cast %276 : vector<2x32xbf16> to vector<1x1x2x32xbf16>
    tpu.vector_store %arg6[%c0_87, %277, %c0_88, %c0_89], %280 {strides = array<i32>} : memref<1x8x2x32xbf16, #tpu.memory_space<vmem>>, vector<1x1x2x32xbf16>,
    %c0_90 = arith.constant 0 : index
    %281 = arith.index_cast %237 : i32 to index
    %c0_91 = arith.constant 0 : index
    %c0_92 = arith.constant 0 : index
    %282 = vector.load %arg7[%c0_90, %281, %c0_91, %c0_92] : memref<1x8x2x32xf32, #tpu.memory_space<vmem>>, vector<1x1x2x32xf32>
    %283 = vector.shape_cast %282 : vector<1x1x2x32xf32> to vector<2x32xf32>
    %284 = vector.shape_cast %267 : vector<2x32xf32> to vector<1x1x2x32xf32>
    tpu.vector_store %arg7[%c0_90, %281, %c0_91, %c0_92], %284 {strides = array<i32>} : memref<1x8x2x32xf32, #tpu.memory_space<vmem>>, vector<1x1x2x32xf32>,
    %c0_93 = arith.constant 0 : index
    %285 = arith.index_cast %237 : i32 to index
    %c0_94 = arith.constant 0 : index
    %c0_95 = arith.constant 0 : index
    %286 = vector.load %arg8[%c0_93, %285, %c0_94, %c0_95] : memref<1x8x2x32xf32, #tpu.memory_space<vmem>>, vector<1x1x2x32xf32>
    %287 = vector.shape_cast %286 : vector<1x1x2x32xf32> to vector<2x32xf32>
    %288 = vector.shape_cast %269 : vector<2x32xf32> to vector<1x1x2x32xf32>
    tpu.vector_store %arg8[%c0_93, %285, %c0_94, %c0_95], %288 {strides = array<i32>} : memref<1x8x2x32xf32, #tpu.memory_space<vmem>>, vector<1x1x2x32xf32>,
    %c5_i32 = arith.constant 5 : i32
    %c1_i32_96 = arith.constant 1 : i32
    %289 = arith.subi %c1_i32_96, %arg0 : i32
    %290 = arith.muli %289, %c5_i32 : i32
    %c7_i32_97 = arith.constant 7 : i32
    %291 = arith.subi %c7_i32_97, %c5_i32 : i32
    %292 = arith.muli %arg0, %291 : i32
    %293 = arith.addi %290, %292 : i32
    %294 = arith.index_cast %293 : i32 to index
    %c0_98 = arith.constant 0 : index
    %c0_99 = arith.constant 0 : index
    %295 = vector.load %arg4[%294, %c0_98, %c0_99] : memref<8x2x128xbf16, #tpu.memory_space<vmem>>, vector<1x2x128xbf16>
    %296 = vector.shape_cast %295 : vector<1x2x128xbf16> to vector<2x128xbf16>
    %297 = arith.extf %296 : vector<2x128xbf16> to vector<2x128xf32>
    %298 = arith.truncf %269 : vector<2x32xf32> to vector<2x32xbf16>
    %cst_100 = arith.constant dense<0.000000e+00> : vector<2x128xf32>
    %299 = tpu.matmul %298, %6, %cst_100 {dimension_numbers = #tpu.dot_dimension_numbers<[1], [0], [0], [1], [0, 0, 1, 1], [], []>} : vector<2x32xbf16>, vector<32x128xbf16>, vector<2x128xf32> -> vector<2x128xf32>
    %300 = arith.addf %297, %299 : vector<2x128xf32>
    %301 = vector.extract_strided_slice %300 {offsets = [0, 0], sizes = [2, 32], strides = [1, 1]} : vector<2x128xf32> to vector<2x32xf32>
    %302 = arith.negf %301 : vector<2x32xf32>
    %303 = math.exp %302 : vector<2x32xf32>
    %cst_101 = arith.constant 1.000000e+00 : f32
    %304 = vector.broadcast %cst_101 : f32 to vector<2x32xf32>
    %305 = arith.addf %304, %303 : vector<2x32xf32>
    %306 = arith.divf %304, %305 : vector<2x32xf32>
    %307 = vector.extract_strided_slice %300 {offsets = [0, 32], sizes = [2, 32], strides = [1, 1]} : vector<2x128xf32> to vector<2x32xf32>
    %308 = arith.negf %307 : vector<2x32xf32>
    %309 = math.exp %308 : vector<2x32xf32>
    %cst_102 = arith.constant 1.000000e+00 : f32
    %310 = vector.broadcast %cst_102 : f32 to vector<2x32xf32>
    %311 = arith.addf %310, %309 : vector<2x32xf32>
    %312 = arith.divf %310, %311 : vector<2x32xf32>
    %313 = vector.extract_strided_slice %300 {offsets = [0, 64], sizes = [2, 32], strides = [1, 1]} : vector<2x128xf32> to vector<2x32xf32>
    %314 = math.tanh %313 : vector<2x32xf32>
    %315 = vector.extract_strided_slice %300 {offsets = [0, 96], sizes = [2, 32], strides = [1, 1]} : vector<2x128xf32> to vector<2x32xf32>
    %316 = arith.negf %315 : vector<2x32xf32>
    %317 = math.exp %316 : vector<2x32xf32>
    %cst_103 = arith.constant 1.000000e+00 : f32
    %318 = vector.broadcast %cst_103 : f32 to vector<2x32xf32>
    %319 = arith.addf %318, %317 : vector<2x32xf32>
    %320 = arith.divf %318, %319 : vector<2x32xf32>
    %321 = arith.mulf %312, %267 : vector<2x32xf32>
    %322 = arith.mulf %306, %314 : vector<2x32xf32>
    %323 = arith.addf %321, %322 : vector<2x32xf32>
    %324 = math.tanh %323 : vector<2x32xf32>
    %325 = arith.mulf %320, %324 : vector<2x32xf32>
    %326 = vector.broadcast %4 : f32 to vector<2x32xf32>
    %327 = arith.subf %325, %326 : vector<2x32xf32>
    %cst_104 = arith.constant 0.000000e+00 : f32
    %328 = vector.broadcast %cst_104 : f32 to vector<2x32xf32>
    %329 = arith.cmpf ogt, %327, %328 : vector<2x32xf32>
    %330 = arith.extui %329 : vector<2x32xi1> to vector<2x32xi32>
    %331 = arith.sitofp %330 : vector<2x32xi32> to vector<2x32xf32>
    %332 = arith.truncf %331 : vector<2x32xf32> to vector<2x32xbf16>
    %c0_105 = arith.constant 0 : index
    %333 = arith.index_cast %293 : i32 to index
    %c0_106 = arith.constant 0 : index
    %c0_107 = arith.constant 0 : index
    %334 = vector.load %arg6[%c0_105, %333, %c0_106, %c0_107] : memref<1x8x2x32xbf16, #tpu.memory_space<vmem>>, vector<1x1x2x32xbf16>
    %335 = vector.shape_cast %334 : vector<1x1x2x32xbf16> to vector<2x32xbf16>
    %336 = vector.shape_cast %332 : vector<2x32xbf16> to vector<1x1x2x32xbf16>
    tpu.vector_store %arg6[%c0_105, %333, %c0_106, %c0_107], %336 {strides = array<i32>} : memref<1x8x2x32xbf16, #tpu.memory_space<vmem>>, vector<1x1x2x32xbf16>,
    %c0_108 = arith.constant 0 : index
    %337 = arith.index_cast %293 : i32 to index
    %c0_109 = arith.constant 0 : index
    %c0_110 = arith.constant 0 : index
    %338 = vector.load %arg7[%c0_108, %337, %c0_109, %c0_110] : memref<1x8x2x32xf32, #tpu.memory_space<vmem>>, vector<1x1x2x32xf32>
    %339 = vector.shape_cast %338 : vector<1x1x2x32xf32> to vector<2x32xf32>
    %340 = vector.shape_cast %323 : vector<2x32xf32> to vector<1x1x2x32xf32>
    tpu.vector_store %arg7[%c0_108, %337, %c0_109, %c0_110], %340 {strides = array<i32>} : memref<1x8x2x32xf32, #tpu.memory_space<vmem>>, vector<1x1x2x32xf32>,
    %c0_111 = arith.constant 0 : index
    %341 = arith.index_cast %293 : i32 to index
    %c0_112 = arith.constant 0 : index
    %c0_113 = arith.constant 0 : index
    %342 = vector.load %arg8[%c0_111, %341, %c0_112, %c0_113] : memref<1x8x2x32xf32, #tpu.memory_space<vmem>>, vector<1x1x2x32xf32>
    %343 = vector.shape_cast %342 : vector<1x1x2x32xf32> to vector<2x32xf32>
    %344 = vector.shape_cast %325 : vector<2x32xf32> to vector<1x1x2x32xf32>
    tpu.vector_store %arg8[%c0_111, %341, %c0_112, %c0_113], %344 {strides = array<i32>} : memref<1x8x2x32xf32, #tpu.memory_space<vmem>>, vector<1x1x2x32xf32>,
    %c6_i32 = arith.constant 6 : i32
    %c1_i32_114 = arith.constant 1 : i32
    %345 = arith.subi %c1_i32_114, %arg0 : i32
    %346 = arith.muli %345, %c6_i32 : i32
    %c7_i32_115 = arith.constant 7 : i32
    %347 = arith.subi %c7_i32_115, %c6_i32 : i32
    %348 = arith.muli %arg0, %347 : i32
    %349 = arith.addi %346, %348 : i32
    %350 = arith.index_cast %349 : i32 to index
    %c0_116 = arith.constant 0 : index
    %c0_117 = arith.constant 0 : index
    %351 = vector.load %arg4[%350, %c0_116, %c0_117] : memref<8x2x128xbf16, #tpu.memory_space<vmem>>, vector<1x2x128xbf16>
    %352 = vector.shape_cast %351 : vector<1x2x128xbf16> to vector<2x128xbf16>
    %353 = arith.extf %352 : vector<2x128xbf16> to vector<2x128xf32>
    %354 = arith.truncf %325 : vector<2x32xf32> to vector<2x32xbf16>
    %cst_118 = arith.constant dense<0.000000e+00> : vector<2x128xf32>
    %355 = tpu.matmul %354, %6, %cst_118 {dimension_numbers = #tpu.dot_dimension_numbers<[1], [0], [0], [1], [0, 0, 1, 1], [], []>} : vector<2x32xbf16>, vector<32x128xbf16>, vector<2x128xf32> -> vector<2x128xf32>
    %356 = arith.addf %353, %355 : vector<2x128xf32>
    %357 = vector.extract_strided_slice %356 {offsets = [0, 0], sizes = [2, 32], strides = [1, 1]} : vector<2x128xf32> to vector<2x32xf32>
    %358 = arith.negf %357 : vector<2x32xf32>
    %359 = math.exp %358 : vector<2x32xf32>
    %cst_119 = arith.constant 1.000000e+00 : f32
    %360 = vector.broadcast %cst_119 : f32 to vector<2x32xf32>
    %361 = arith.addf %360, %359 : vector<2x32xf32>
    %362 = arith.divf %360, %361 : vector<2x32xf32>
    %363 = vector.extract_strided_slice %356 {offsets = [0, 32], sizes = [2, 32], strides = [1, 1]} : vector<2x128xf32> to vector<2x32xf32>
    %364 = arith.negf %363 : vector<2x32xf32>
    %365 = math.exp %364 : vector<2x32xf32>
    %cst_120 = arith.constant 1.000000e+00 : f32
    %366 = vector.broadcast %cst_120 : f32 to vector<2x32xf32>
    %367 = arith.addf %366, %365 : vector<2x32xf32>
    %368 = arith.divf %366, %367 : vector<2x32xf32>
    %369 = vector.extract_strided_slice %356 {offsets = [0, 64], sizes = [2, 32], strides = [1, 1]} : vector<2x128xf32> to vector<2x32xf32>
    %370 = math.tanh %369 : vector<2x32xf32>
    %371 = vector.extract_strided_slice %356 {offsets = [0, 96], sizes = [2, 32], strides = [1, 1]} : vector<2x128xf32> to vector<2x32xf32>
    %372 = arith.negf %371 : vector<2x32xf32>
    %373 = math.exp %372 : vector<2x32xf32>
    %cst_121 = arith.constant 1.000000e+00 : f32
    %374 = vector.broadcast %cst_121 : f32 to vector<2x32xf32>
    %375 = arith.addf %374, %373 : vector<2x32xf32>
    %376 = arith.divf %374, %375 : vector<2x32xf32>
    %377 = arith.mulf %368, %323 : vector<2x32xf32>
    %378 = arith.mulf %362, %370 : vector<2x32xf32>
    %379 = arith.addf %377, %378 : vector<2x32xf32>
    %380 = math.tanh %379 : vector<2x32xf32>
    %381 = arith.mulf %376, %380 : vector<2x32xf32>
    %382 = vector.broadcast %4 : f32 to vector<2x32xf32>
    %383 = arith.subf %381, %382 : vector<2x32xf32>
    %cst_122 = arith.constant 0.000000e+00 : f32
    %384 = vector.broadcast %cst_122 : f32 to vector<2x32xf32>
    %385 = arith.cmpf ogt, %383, %384 : vector<2x32xf32>
    %386 = arith.extui %385 : vector<2x32xi1> to vector<2x32xi32>
    %387 = arith.sitofp %386 : vector<2x32xi32> to vector<2x32xf32>
    %388 = arith.truncf %387 : vector<2x32xf32> to vector<2x32xbf16>
    %c0_123 = arith.constant 0 : index
    %389 = arith.index_cast %349 : i32 to index
    %c0_124 = arith.constant 0 : index
    %c0_125 = arith.constant 0 : index
    %390 = vector.load %arg6[%c0_123, %389, %c0_124, %c0_125] : memref<1x8x2x32xbf16, #tpu.memory_space<vmem>>, vector<1x1x2x32xbf16>
    %391 = vector.shape_cast %390 : vector<1x1x2x32xbf16> to vector<2x32xbf16>
    %392 = vector.shape_cast %388 : vector<2x32xbf16> to vector<1x1x2x32xbf16>
    tpu.vector_store %arg6[%c0_123, %389, %c0_124, %c0_125], %392 {strides = array<i32>} : memref<1x8x2x32xbf16, #tpu.memory_space<vmem>>, vector<1x1x2x32xbf16>,
    %c0_126 = arith.constant 0 : index
    %393 = arith.index_cast %349 : i32 to index
    %c0_127 = arith.constant 0 : index
    %c0_128 = arith.constant 0 : index
    %394 = vector.load %arg7[%c0_126, %393, %c0_127, %c0_128] : memref<1x8x2x32xf32, #tpu.memory_space<vmem>>, vector<1x1x2x32xf32>
    %395 = vector.shape_cast %394 : vector<1x1x2x32xf32> to vector<2x32xf32>
    %396 = vector.shape_cast %379 : vector<2x32xf32> to vector<1x1x2x32xf32>
    tpu.vector_store %arg7[%c0_126, %393, %c0_127, %c0_128], %396 {strides = array<i32>} : memref<1x8x2x32xf32, #tpu.memory_space<vmem>>, vector<1x1x2x32xf32>,
    %c0_129 = arith.constant 0 : index
    %397 = arith.index_cast %349 : i32 to index
    %c0_130 = arith.constant 0 : index
    %c0_131 = arith.constant 0 : index
    %398 = vector.load %arg8[%c0_129, %397, %c0_130, %c0_131] : memref<1x8x2x32xf32, #tpu.memory_space<vmem>>, vector<1x1x2x32xf32>
    %399 = vector.shape_cast %398 : vector<1x1x2x32xf32> to vector<2x32xf32>
    %400 = vector.shape_cast %381 : vector<2x32xf32> to vector<1x1x2x32xf32>
    tpu.vector_store %arg8[%c0_129, %397, %c0_130, %c0_131], %400 {strides = array<i32>} : memref<1x8x2x32xf32, #tpu.memory_space<vmem>>, vector<1x1x2x32xf32>,
    %c7_i32_132 = arith.constant 7 : i32
    %c1_i32_133 = arith.constant 1 : i32
    %401 = arith.subi %c1_i32_133, %arg0 : i32
    %402 = arith.muli %401, %c7_i32_132 : i32
    %c7_i32_134 = arith.constant 7 : i32
    %403 = arith.subi %c7_i32_134, %c7_i32_132 : i32
    %404 = arith.muli %arg0, %403 : i32
    %405 = arith.addi %402, %404 : i32
    %406 = arith.index_cast %405 : i32 to index
    %c0_135 = arith.constant 0 : index
    %c0_136 = arith.constant 0 : index
    %407 = vector.load %arg4[%406, %c0_135, %c0_136] : memref<8x2x128xbf16, #tpu.memory_space<vmem>>, vector<1x2x128xbf16>
    %408 = vector.shape_cast %407 : vector<1x2x128xbf16> to vector<2x128xbf16>
    %409 = arith.extf %408 : vector<2x128xbf16> to vector<2x128xf32>
    %410 = arith.truncf %381 : vector<2x32xf32> to vector<2x32xbf16>
    %cst_137 = arith.constant dense<0.000000e+00> : vector<2x128xf32>
    %411 = tpu.matmul %410, %6, %cst_137 {dimension_numbers = #tpu.dot_dimension_numbers<[1], [0], [0], [1], [0, 0, 1, 1], [], []>} : vector<2x32xbf16>, vector<32x128xbf16>, vector<2x128xf32> -> vector<2x128xf32>
    %412 = arith.addf %409, %411 : vector<2x128xf32>
    %413 = vector.extract_strided_slice %412 {offsets = [0, 0], sizes = [2, 32], strides = [1, 1]} : vector<2x128xf32> to vector<2x32xf32>
    %414 = arith.negf %413 : vector<2x32xf32>
    %415 = math.exp %414 : vector<2x32xf32>
    %cst_138 = arith.constant 1.000000e+00 : f32
    %416 = vector.broadcast %cst_138 : f32 to vector<2x32xf32>
    %417 = arith.addf %416, %415 : vector<2x32xf32>
    %418 = arith.divf %416, %417 : vector<2x32xf32>
    %419 = vector.extract_strided_slice %412 {offsets = [0, 32], sizes = [2, 32], strides = [1, 1]} : vector<2x128xf32> to vector<2x32xf32>
    %420 = arith.negf %419 : vector<2x32xf32>
    %421 = math.exp %420 : vector<2x32xf32>
    %cst_139 = arith.constant 1.000000e+00 : f32
    %422 = vector.broadcast %cst_139 : f32 to vector<2x32xf32>
    %423 = arith.addf %422, %421 : vector<2x32xf32>
    %424 = arith.divf %422, %423 : vector<2x32xf32>
    %425 = vector.extract_strided_slice %412 {offsets = [0, 64], sizes = [2, 32], strides = [1, 1]} : vector<2x128xf32> to vector<2x32xf32>
    %426 = math.tanh %425 : vector<2x32xf32>
    %427 = vector.extract_strided_slice %412 {offsets = [0, 96], sizes = [2, 32], strides = [1, 1]} : vector<2x128xf32> to vector<2x32xf32>
    %428 = arith.negf %427 : vector<2x32xf32>
    %429 = math.exp %428 : vector<2x32xf32>
    %cst_140 = arith.constant 1.000000e+00 : f32
    %430 = vector.broadcast %cst_140 : f32 to vector<2x32xf32>
    %431 = arith.addf %430, %429 : vector<2x32xf32>
    %432 = arith.divf %430, %431 : vector<2x32xf32>
    %433 = arith.mulf %424, %379 : vector<2x32xf32>
    %434 = arith.mulf %418, %426 : vector<2x32xf32>
    %435 = arith.addf %433, %434 : vector<2x32xf32>
    %436 = math.tanh %435 : vector<2x32xf32>
    %437 = arith.mulf %432, %436 : vector<2x32xf32>
    %438 = vector.broadcast %4 : f32 to vector<2x32xf32>
    %439 = arith.subf %437, %438 : vector<2x32xf32>
    %cst_141 = arith.constant 0.000000e+00 : f32
    %440 = vector.broadcast %cst_141 : f32 to vector<2x32xf32>
    %441 = arith.cmpf ogt, %439, %440 : vector<2x32xf32>
    %442 = arith.extui %441 : vector<2x32xi1> to vector<2x32xi32>
    %443 = arith.sitofp %442 : vector<2x32xi32> to vector<2x32xf32>
    %444 = arith.truncf %443 : vector<2x32xf32> to vector<2x32xbf16>
    %c0_142 = arith.constant 0 : index
    %445 = arith.index_cast %405 : i32 to index
    %c0_143 = arith.constant 0 : index
    %c0_144 = arith.constant 0 : index
    %446 = vector.load %arg6[%c0_142, %445, %c0_143, %c0_144] : memref<1x8x2x32xbf16, #tpu.memory_space<vmem>>, vector<1x1x2x32xbf16>
    %447 = vector.shape_cast %446 : vector<1x1x2x32xbf16> to vector<2x32xbf16>
    %448 = vector.shape_cast %444 : vector<2x32xbf16> to vector<1x1x2x32xbf16>
    tpu.vector_store %arg6[%c0_142, %445, %c0_143, %c0_144], %448 {strides = array<i32>} : memref<1x8x2x32xbf16, #tpu.memory_space<vmem>>, vector<1x1x2x32xbf16>,
    %c0_145 = arith.constant 0 : index
    %449 = arith.index_cast %405 : i32 to index
    %c0_146 = arith.constant 0 : index
    %c0_147 = arith.constant 0 : index
    %450 = vector.load %arg7[%c0_145, %449, %c0_146, %c0_147] : memref<1x8x2x32xf32, #tpu.memory_space<vmem>>, vector<1x1x2x32xf32>
    %451 = vector.shape_cast %450 : vector<1x1x2x32xf32> to vector<2x32xf32>
    %452 = vector.shape_cast %435 : vector<2x32xf32> to vector<1x1x2x32xf32>
    tpu.vector_store %arg7[%c0_145, %449, %c0_146, %c0_147], %452 {strides = array<i32>} : memref<1x8x2x32xf32, #tpu.memory_space<vmem>>, vector<1x1x2x32xf32>,
    %c0_148 = arith.constant 0 : index
    %453 = arith.index_cast %405 : i32 to index
    %c0_149 = arith.constant 0 : index
    %c0_150 = arith.constant 0 : index
    %454 = vector.load %arg8[%c0_148, %453, %c0_149, %c0_150] : memref<1x8x2x32xf32, #tpu.memory_space<vmem>>, vector<1x1x2x32xf32>
    %455 = vector.shape_cast %454 : vector<1x1x2x32xf32> to vector<2x32xf32>
    %456 = vector.shape_cast %437 : vector<2x32xf32> to vector<1x1x2x32xf32>
    tpu.vector_store %arg8[%c0_148, %453, %c0_149, %c0_150], %456 {strides = array<i32>} : memref<1x8x2x32xf32, #tpu.memory_space<vmem>>, vector<1x1x2x32xf32>,
    %c8_i32 = arith.constant 8 : i32
    %c0_151 = arith.constant 0 : index
    %c0_152 = arith.constant 0 : index
    %457 = vector.load %arg9[%c0_151, %c0_152] : memref<2x32xf32, #tpu.memory_space<vmem>>, vector<2x32xf32>
    tpu.vector_store %arg9[%c0_151, %c0_152], %435 {strides = array<i32>} : memref<2x32xf32, #tpu.memory_space<vmem>>, vector<2x32xf32>,
    %c0_153 = arith.constant 0 : index
    %c0_154 = arith.constant 0 : index
    %458 = vector.load %arg10[%c0_153, %c0_154] : memref<2x32xf32, #tpu.memory_space<vmem>>, vector<2x32xf32>
    tpu.vector_store %arg10[%c0_153, %c0_154], %437 {strides = array<i32>} : memref<2x32xf32, #tpu.memory_space<vmem>>, vector<2x32xf32>,
    return
  }
  func.func @transform_0(%arg0: i32, %arg1: i32, %arg2: i32) -> i32 {
    %c0_i32 = arith.constant 0 : i32
    %c0_i32_0 = arith.constant 0 : i32
    return %c0_i32 : i32
  }
  func.func @transform_1(%arg0: i32, %arg1: i32, %arg2: i32) -> (i32, i32, i32) {
    %c1_i32 = arith.constant 1 : i32
    %0 = arith.subi %c1_i32, %arg0 : i32
    %1 = arith.muli %0, %arg2 : i32
    %c0_i32 = arith.constant 0 : i32
    %2 = arith.subi %c0_i32, %arg2 : i32
    %3 = arith.muli %arg0, %2 : i32
    %4 = arith.addi %1, %3 : i32
    %c0_i32_0 = arith.constant 0 : i32
    return %4, %arg1, %arg0 : i32, i32, i32
  }
  func.func @transform_2(%arg0: i32, %arg1: i32, %arg2: i32) -> (i32, i32, i32) {
    %c0_i32 = arith.constant 0 : i32
    %c0_i32_0 = arith.constant 0 : i32
    %c0_i32_1 = arith.constant 0 : i32
    return %arg0, %c0_i32, %c0_i32_0 : i32, i32, i32
  }
  func.func @transform_3(%arg0: i32, %arg1: i32, %arg2: i32) -> (i32, i32, i32, i32) {
    %c1_i32 = arith.constant 1 : i32
    %0 = arith.subi %c1_i32, %arg0 : i32
    %1 = arith.muli %0, %arg2 : i32
    %c0_i32 = arith.constant 0 : i32
    %2 = arith.subi %c0_i32, %arg2 : i32
    %3 = arith.muli %arg0, %2 : i32
    %4 = arith.addi %1, %3 : i32
    %c0_i32_0 = arith.constant 0 : i32
    %c0_i32_1 = arith.constant 0 : i32
    return %arg0, %4, %arg1, %c0_i32_0 : i32, i32, i32, i32
  }
  func.func @transform_4(%arg0: i32, %arg1: i32, %arg2: i32) -> (i32, i32, i32, i32) {
    %c1_i32 = arith.constant 1 : i32
    %0 = arith.subi %c1_i32, %arg0 : i32
    %1 = arith.muli %0, %arg2 : i32
    %c0_i32 = arith.constant 0 : i32
    %2 = arith.subi %c0_i32, %arg2 : i32
    %3 = arith.muli %arg0, %2 : i32
    %4 = arith.addi %1, %3 : i32
    %c0_i32_0 = arith.constant 0 : i32
    %c0_i32_1 = arith.constant 0 : i32
    return %arg0, %4, %arg1, %c0_i32_0 : i32, i32, i32, i32
  }
  func.func @transform_5(%arg0: i32, %arg1: i32, %arg2: i32) -> (i32, i32, i32, i32) {
    %c1_i32 = arith.constant 1 : i32
    %0 = arith.subi %c1_i32, %arg0 : i32
    %1 = arith.muli %0, %arg2 : i32
    %c0_i32 = arith.constant 0 : i32
    %2 = arith.subi %c0_i32, %arg2 : i32
    %3 = arith.muli %arg0, %2 : i32
    %4 = arith.addi %1, %3 : i32
    %c0_i32_0 = arith.constant 0 : i32
    %c0_i32_1 = arith.constant 0 : i32
    return %arg0, %4, %arg1, %c0_i32_0 : i32, i32, i32, i32
  }
}

</mosaic_0001>

<bundles_post_ra>
// kernel: spiking_encoder_forward.7
= control target key start
LH: loop header
LB: loop body
LE: loop exit
PB: predicated region body
PF: predicated region fallthrough
CT: control target
= control target key end

     0   :  { %v250_v0 = vmov 0.0   ;;  %vm251_vm0 = vmmov 0   ;;  %v252_v5 = vmov 0   ;;  %vm53_vm1 = vcmask 130048   ;;  %s334_s2 = inlined_call_operand.vmem [shape: bf16[32,32], index: 2, kind: input, shape index: {}]   ;;  %s335_s3 = inlined_call_operand.vmem [shape: bf16[16,32], index: 3, kind: input, shape index: {}]   ;;  %s336_s1 = inlined_call_operand.vmem [shape: bf16[16,16], index: 1, kind: input, shape index: {}]   ;;  %s337_s5 = inlined_call_operand.<no memory space> [shape: f32[1,1], index: 5, kind: input, shape index: {}]   ;;  %s338_s0 = inlined_call_operand.vmem [shape: bf16[16,32], index: 0, kind: input, shape index: {}]   ;;  %s339_s4 = inlined_call_operand.vmem [shape: f32[1,32], index: 4, kind: input, shape index: {}]   ;;  %s340_s6 = inlined_call_operand.vmem [shape: f32[1,32], index: 6, kind: input, shape index: {}]   ;;  %s341_s7 = inlined_call_operand.vmem [shape: f32[1,32], index: 7, kind: input, shape index: {}]   ;;  %s342_s8 = inlined_call_operand.vmem [shape: f32[16,32], index: 8, kind: output, shape index: {}]  }
   0x1   :  { %229 = vmatprep.subr.bf16.mxu1 %v250_v0  ;;  %223 = vmatprep.subr.bf16.mxu0 %v250_v0  ;;  %v241_v1 = vld [vmem:[%s334_s2] sm:$0xff]   ;;  %v13_v2 = vstv %s337_s5  ;;  %v244_v6 = vld [vmem:[%s334_s2 + $0x8] sm:$0xff]   ;;  %vm115_vm2 = vcmask 261120  }
   0x2   :  { %v242_v3 = vld [vmem:[%s335_s3] sm:$0xff]   ;;  %225 = vmatprep.mubr.msk.bf16.mxu0 %vm251_vm0, %v250_v0  ;;  %233 = vmatprep.mubr.msk.bf16.mxu1 %vm251_vm0, %v250_v0  ;;  %14 = vst [vmem:[#allocation2] sm:$0x1] %v13_v2 }
   0x3   :  { %230 = vmatpush3.bf16.msra.mxu1 %v241_v1  ;;  %v243_v4 = vld [vmem:[%s336_s1] sm:$0xff]   ;;  %240 = vset.pattern.permute.xlu0 %v252_v5 }
   0x4   :  { %224 = vmatpush3.bf16.msra.mxu0 %v242_v3  ;;  %231 = vmatprep.subr.bf16.mxu1 %v250_v0  ;;  %v245_v7 = vld [vmem:[%s338_s0] sm:$0xff]  }
   0x5   :  { %v214_v14 = vld [vmem:[%s339_s4] ss:$0 sm:$0xff] }
   0x6   :  { %v216_v25 = vld [vmem:[%s340_s6] ss:$0 sm:$0xff] }
   0x7   :  { %226 = vmatmul.mubr.msk.bf16.vlgmr.msra.gmra.mrb[0].mxu0 %vm53_vm1, %v243_v4  ;;  %232 = vmatpush3.bf16.msra.mxu1 %v244_v6  ;;  %v217_v27 = vld [vmem:[%s341_s7] ss:$0 sm:$0xff] }
   0x9   :  { %v215_v8 = vld [vmem:[#allocation2] ss:$0 sm:$0xff] }
   0xa   :  { %234 = vmatmul.mubr.msk.bf16.vlgmr.msra.gmra.mrb[0].mxu1 %vm115_vm2, %v245_v7  ;;  %177 = vperm.xlu0 %240, %v215_v8  }
  0x89   :  { %v178_v18 = vpop.permute.xlu0 %177 }
  0xda   :  { %v91_v9 = vpop.f32.mrb[0].mxu0 }
  0xdb   :  { %v227_v10 = vpop.f32.mrb[1].mxu0 }
  0xdc   :  { %v94_v11 = vpop.f32.mrb[2].mxu0 }
  0xdd   :  { %v228_v12 = vpop.f32.mrb[3].mxu0  ;;  %v153_v13 = vpop.f32.mrb[0].mxu1 }
  0xde   :  { %v154_v15 = vadd.f32 %v153_v13, %v91_v9  ;;  %v235_v16 = vpop.f32.mrb[1].mxu1 }
  0xdf   :  { %v156_v17 = vpop.f32.mrb[2].mxu1 }
  0xe0   :  { %v157_v19 = vadd.f32 %v156_v17, %v94_v11  ;;  %v236_v20 = vpop.f32.mrb[3].mxu1  ;;  %v167_v21 = vadd.f32 %v214_v14, %v154_v15 }
  0xe2   :  { %v168_v22 = vadd.f32 %v214_v14, %v157_v19  ;;  %v180_v23 = vmul.f32 %v178_v18, %v167_v21 }
  0xe4   :  { %v181_v24 = vmul.f32 %v178_v18, %v168_v22  ;;  %246 = vtanh.f32 %v180_v23 }
  0xe6   :  { %248 = vtanh.f32 %v181_v24 }
  0xee   :  { %v247_v26 = vpop.eup %246 }
  0xef   :  { %v190_v28 = vmul.f32 %v247_v26, %v216_v25 }
  0xf0   :  { %v249_v29 = vpop.eup %248 }
  0xf1   :  { %v191_v30 = vmul.f32 %v249_v29, %v216_v25  ;;  %v199_v31 = vadd.f32 %v217_v27, %v190_v28 }
  0xf3   :  { %v200_v32 = vadd.f32 %v217_v27, %v191_v30  ;;  %201 = vst.msk [vmem:[%s342_s8] sm:$0xff] %vm115_vm2, %v199_v31 }
  0xf5   :  { %202 = vst.msk [vmem:[%s342_s8 + $0x8] sm:$0xff] %vm115_vm2, %v200_v32 }

// kernel: spiking_encoder_forward.10
= control target key start
LH: loop header
LB: loop body
LE: loop exit
PB: predicated region body
PF: predicated region fallthrough
CT: control target
= control target key end

     0   :  { %v289_v0 = vmov 0.0   ;;  %vm290_vm0 = vmmov 0   ;;  %v291_v5 = vmov 0   ;;  %vm139_vm1 = vcmask 261120   ;;  %s382_s3 = inlined_call_operand.vmem [shape: bf16[64,32], index: 3, kind: input, shape index: {}]   ;;  %s383_s2 = inlined_call_operand.vmem [shape: bf16[32,32], index: 2, kind: input, shape index: {}]   ;;  %s384_s5 = inlined_call_operand.<no memory space> [shape: f32[1,1], index: 5, kind: input, shape index: {}]   ;;  %s385_s0 = inlined_call_operand.vmem [shape: bf16[16,32], index: 0, kind: input, shape index: {}]   ;;  %s386_s1 = inlined_call_operand.vmem [shape: bf16[16,64], index: 1, kind: input, shape index: {}]   ;;  %s387_s4 = inlined_call_operand.vmem [shape: f32[1,32], index: 4, kind: input, shape index: {}]   ;;  %s388_s6 = inlined_call_operand.vmem [shape: f32[1,32], index: 6, kind: input, shape index: {}]   ;;  %s389_s7 = inlined_call_operand.vmem [shape: f32[1,32], index: 7, kind: input, shape index: {}]   ;;  %s390_s8 = inlined_call_operand.vmem [shape: f32[16,32], index: 8, kind: output, shape index: {}]  }
   0x1   :  { %253 = vmatprep.subr.bf16.mxu0 %v289_v0  ;;  %v277_v1 = vld [vmem:[%s382_s3] sm:$0xff]   ;;  %265 = vmatprep.subr.bf16.mxu1 %v289_v0  ;;  %v13_v2 = vstv %s384_s5  ;;  %v278_v3 = vld [vmem:[%s382_s3 + $0x8] sm:$0xff]   ;;  %v280_v7 = vld [vmem:[%s382_s3 + $0x10] sm:$0xff]   ;;  %vm77_vm2 = vcmask 523264  }
   0x2   :  { %269 = vmatprep.mubr.msk.bf16.mxu1 %vm290_vm0, %v289_v0  ;;  %261 = vmatprep.mubr.msk.bf16.mxu0 %vm290_vm0, %v289_v0  ;;  %14 = vst [vmem:[#allocation2] sm:$0x1] %v13_v2  ;;  %v279_v4 = vld [vmem:[%s383_s2] sm:$0xff]   ;;  %v281_v6 = vld [vmem:[%s383_s2 + $0x8] sm:$0xff]   ;;  %v282_v10 = vld [vmem:[%s382_s3 + $0x18] sm:$0xff]  }
   0x3   :  { %254 = vmatpush3.bf16.msra.mxu0 %v277_v1  ;;  %276 = vset.pattern.permute.xlu0 %v291_v5  ;;  %v283_v8 = vld [vmem:[%s385_s0] sm:$0xff]  }
   0x4   :  { %255 = vmatprep.subr.bf16.mxu0 %v289_v0  ;;  %266 = vmatpush3.bf16.msra.mxu1 %v279_v4  ;;  %v284_v11 = vld [vmem:[%s386_s1] sm:$0xff]  }
   0x5   :  { %267 = vmatprep.subr.bf16.mxu1 %v289_v0  ;;  %v241_v17 = vld [vmem:[%s387_s4] ss:$0 sm:$0xff] }
   0x6   :  { %v243_v28 = vld [vmem:[%s388_s6] ss:$0 sm:$0xff] }
   0x7   :  { %256 = vmatpush3.bf16.msra.mxu0 %v278_v3  ;;  %v244_v30 = vld [vmem:[%s389_s7] ss:$0 sm:$0xff] }
   0x8   :  { %257 = vmatprep.subr.bf16.mxu0 %v289_v0  ;;  %268 = vmatpush3.bf16.msra.mxu1 %v281_v6 }
   0x9   :  { %v242_v9 = vld [vmem:[#allocation2] ss:$0 sm:$0xff] }
   0xa   :  { %201 = vperm.xlu0 %276, %v242_v9  }
   0xb   :  { %258 = vmatpush3.bf16.msra.mxu0 %v280_v7  ;;  %270 = vmatmul.mubr.msk.bf16.vlgmr.msra.gmra.mrb[0].mxu1 %vm139_vm1, %v283_v8 }
   0xc   :  { %259 = vmatprep.subr.bf16.mxu0 %v289_v0 }
   0xf   :  { %260 = vmatpush3.bf16.msra.mxu0 %v282_v10 }
  0x12   :  { %262 = vmatmul.mubr.msk.bf16.vlgmr.msra.gmra.mrb[0].mxu0 %vm77_vm2, %v284_v11 }
  0x89   :  { %v202_v21 = vpop.permute.xlu0 %201 }
  0xde   :  { %v177_v12 = vpop.f32.mrb[0].mxu1 }
  0xdf   :  { %v271_v13 = vpop.f32.mrb[1].mxu1 }
  0xe0   :  { %v180_v14 = vpop.f32.mrb[2].mxu1 }
  0xe1   :  { %v272_v15 = vpop.f32.mrb[3].mxu1 }
  0xe5   :  { %v115_v16 = vpop.f32.mrb[0].mxu0 }
  0xe6   :  { %v178_v18 = vadd.f32 %v177_v12, %v115_v16  ;;  %v263_v19 = vpop.f32.mrb[1].mxu0 }
  0xe7   :  { %v118_v20 = vpop.f32.mrb[2].mxu0 }
  0xe8   :  { %v181_v22 = vadd.f32 %v180_v14, %v118_v20  ;;  %v264_v23 = vpop.f32.mrb[3].mxu0  ;;  %v191_v24 = vadd.f32 %v241_v17, %v178_v18 }
  0xea   :  { %v192_v25 = vadd.f32 %v241_v17, %v181_v22  ;;  %v204_v26 = vmul.f32 %v202_v21, %v191_v24 }
  0xec   :  { %v205_v27 = vmul.f32 %v202_v21, %v192_v25  ;;  %285 = vtanh.f32 %v204_v26 }
  0xee   :  { %287 = vtanh.f32 %v205_v27 }
  0xf6   :  { %v286_v29 = vpop.eup %285 }
  0xf7   :  { %v214_v31 = vmul.f32 %v286_v29, %v243_v28 }
  0xf8   :  { %v288_v32 = vpop.eup %287 }
  0xf9   :  { %v215_v33 = vmul.f32 %v288_v32, %v243_v28  ;;  %v223_v34 = vadd.f32 %v244_v30, %v214_v31 }
  0xfb   :  { %v224_v35 = vadd.f32 %v244_v30, %v215_v33  ;;  %225 = vst.msk [vmem:[%s390_s8] sm:$0xff] %vm139_vm1, %v223_v34 }
  0xfd   :  { %226 = vst.msk [vmem:[%s390_s8 + $0x8] sm:$0xff] %vm139_vm1, %v224_v35 }

// kernel: spiking_encoder_forward.6
= control target key start
LH: loop header
LB: loop body
LE: loop exit
PB: predicated region body
PF: predicated region fallthrough
CT: control target
= control target key end

     0   :  { %8 = vsyncpa [#allocation5], 0  ;;  %s1780_s12 = smov 0   ;;  %s1782_s13 = smov 0   ;;  %s2145_s0 = inlined_call_operand.vmem [shape: f32[2], index: 0, kind: input, shape index: {}]   ;;  %s2146_s1 = inlined_call_operand.vmem [shape: bf16[8,2,256], index: 1, kind: input, shape index: {}]   ;;  %s2147_s2 = inlined_call_operand.vmem [shape: bf16[2,32,128], index: 2, kind: input, shape index: {}]   ;;  %s2148_s3 = inlined_call_operand.vmem [shape: bf16[2,8,2,32], index: 3, kind: output, shape index: {}]  }
   0x1   :  { %s1784_s14 = smov 0   ;;  %s1786_s15 = smov 0  }
   0x2   :  { %s1788_s16 = smov 0  }
   0x3 LB: > { %s1435_s17 = sadd.s32 4294967295, %s1750_s16   ;;  %s33_s18 = sadd.s32 1, %s1746_s15  ;;  %s1750_s16 = sphi %s1788_s16, %s14_s16   ;;  %s1746_s15 = sphi %s1786_s15, %s2155_s15   ;;  %s1742_s14 = sphi %s1784_s14, %s2154_s14   ;;  %s1738_s13 = sphi %s1782_s13, %s2153_s13   ;;  %s1734_s12 = sphi %s1780_s12, %s2152_s12  }
   0x4   : > { %p35_p0 = scmp.ge.s32.totalorder %s33_s18, 2  ;;  %s75_s19 = sadd.s32 1, %s1738_s13 }
   0x5   : > { %p82_p1 = scmp.ne.s32.totalorder %s1738_s13, %s1734_s12  ;;  %p83_p2 = scmp.eq.s32.totalorder %s1750_s16, 0 }
   0x6   : > { %s2157_s18 = smov (%p35_p0, %s33_s18), 0  ;;  %p1437_p4 = scmp.ge.s32.totalorder %s1750_s16, 1 }
   0x7   : > { %p1813_p3 = por %p83_p2, %p82_p1  ;;  %s71_s21 = ssub.s32 %s1746_s15, %s2157_s18 }
   0x8   : > { %p165_p5 = scmp.lt.s32.totalorder %s1750_s16, 3  ;;  %p73_p6 = scmp.eq.s32.totalorder %s71_s21, 0 }
   0x9   : > { %p1825_p8 = scmp.eq.s32.totalorder %s1435_s17, 0  ;;  %s178_s27 = sshll.u32 %s2145_s0, 4  ;;  %s179_s27 = int_to_ptr.vmem [resolvable:$true] %s178_s27 }
   0xa   : > { %p1821_p7 = pnand %p1437_p4, %p165_p5  ;;  %s1693_s28 = scalar_lea.vmem %s179_s27, 16 }
   0xb   : > { %s1830_s24 = scalar_select %p73_p6, %s1738_s13, %s75_s19  }
   0xc   : > { %p1573_p9 = pneg %p1821_p7  ;;  %p1694_p11 = scmp.ne.s32.totalorder %s179_s27, %s1693_s28 }
   0xd   : > { %p1701_p1 = scmp.lt.s32.totalorder %s179_s27, %s179_s27  ;;  %p1702_p2 = scmp.lt.s32.totalorder %s1693_s28, %s1693_s28 }
   0xe   : > { %p1574_p10 = pnand %p1825_p8, %p1573_p9 }
   0xf   : > { %p1703_p4 = por %p1702_p2, %p1701_p1 }
  0x10   : > { %p1695_p12 = pneg %p1574_p10 }
  0x12   : > { %p1696_p13 = pnand %p1695_p12, %p1694_p11 }
  0x14   : > { %p1697_p0 = pneg %p1696_p13 }
  0x16   : > { %p1704_p5 = pnand %p1703_p4, %p1697_p0 }
  0x18   : > { %1707 = shalt.err (!%p1704_p5)
}
  0x19   : > { %s1752_s29 = smov [#allocation4]   ;;  %p1439_p6 = scmp.ge.s32.totalorder %s1750_s16, 2 }
  0x1a   : > { %1576 = dma.vmem_to_smem (!%p1574_p10), %s179_s27, 16, %s1752_s29, [#allocation5]  }
  0x1b   : > { %185 = sbr.rel (%p1439_p6) target bundleno = 42 (0x2a), region = 20 }
  0x22   : > { %188 = sbr.rel (!%p1813_p3) target bundleno = 42 (0x2a), region = 24  ;;  %s190_s30 = sand.u32 (%p1813_p3), 1, %s1738_s13  }
  0x23   : > { %s203_s6 = scalar_lea.vmem (%p1813_p3), %s2146_s1, %s1746_s15  ;;  %s1440_s7 = sshll.u32 (%p1813_p3), %s190_s30, 3 }
  0x24   : > { %v219_v0 = vld [vmem:[%s203_s6] sm:$0x1] (%p1813_p3)  ;;  %v221_v1 = vld [vmem:[%s203_s6 + $0x2] sm:$0x1] (%p1813_p3)  ;;  %v223_v2 = vld [vmem:[%s203_s6 + $0x4] sm:$0x1] (%p1813_p3) }
  0x25   : > { %v225_v3 = vld [vmem:[%s203_s6 + $0x6] sm:$0x1] (%p1813_p3)  ;;  %s192_s8 = scalar_lea.vmem (%p1813_p3), [#allocation6], %s1440_s7  ;;  %v227_v4 = vld [vmem:[%s203_s6 + $0x8] sm:$0x1] (%p1813_p3) }
  0x26   : > { %220 = vst [vmem:[%s192_s8] sm:$0x1] (%p1813_p3), %v219_v0  ;;  %222 = vst [vmem:[%s192_s8 + $0x1] sm:$0x1] (%p1813_p3), %v221_v1  ;;  %v229_v5 = vld [vmem:[%s203_s6 + $0xa] sm:$0x1] (%p1813_p3) }
  0x27   : > { %224 = vst [vmem:[%s192_s8 + $0x2] sm:$0x1] (%p1813_p3), %v223_v2  ;;  %226 = vst [vmem:[%s192_s8 + $0x3] sm:$0x1] (%p1813_p3), %v225_v3  ;;  %v231_v6 = vld [vmem:[%s203_s6 + $0xc] sm:$0x1] (%p1813_p3) }
  0x28   : > { %228 = vst [vmem:[%s192_s8 + $0x4] sm:$0x1] (%p1813_p3), %v227_v4  ;;  %230 = vst [vmem:[%s192_s8 + $0x5] sm:$0x1] (%p1813_p3), %v229_v5  ;;  %v233_v7 = vld [vmem:[%s203_s6 + $0xe] sm:$0x1] (%p1813_p3) }
  0x29   : > { %232 = vst [vmem:[%s192_s8 + $0x6] sm:$0x1] %v231_v6  ;;  %234 = vst [vmem:[%s192_s8 + $0x7] sm:$0x1] %v233_v7 }
  0x2a PF: > { %284 = sbr.rel (%p1821_p7) target bundleno = 5713 (0x1651), region = 69 }
  0x31   : > { %1729 = dma.done.wait (%p1825_p8), [#allocation5], 16  }
  0x32   : > { %1731 = vsyncadd (%p1825_p8), [#allocation5], 4294967280  ;;  %s291_s9 = sand.u32 1, %s1734_s12  }
  0x33   : > { %s1443_s10 = sshll.u32 %s291_s9, 3 }
  0x34   : > { %s1854_s11 = scalar_lea.vmem [#allocation6], %s1443_s10 }
  0x35   : > { %297 = sfence }
  0x36   : > { %p337_p3 = scmp.lt.s32.totalorder %s1742_s14, 1  ;;  %vm369_vm0 = vcmask 254976   ;;  %v1753_v8 = vmov 0.0   ;;  %vm1754_vm1 = vmmov 0   ;;  %vm396_vm2 = vcmask 261120   ;;  %s379_s22 = smul.u32 7, %s1742_s14 }
  0x37   : > { %1505 = vmatprep.subr.bf16.mxu0 %v1753_v8  ;;  %1509 = vmatprep.mubr.msk.bf16.mxu0 %vm1754_vm1, %v1753_v8  ;;  %371 = vst.msk [vmem:[#allocation3] sm:$0x3] %vm369_vm0, %v1753_v8  ;;  %370 = vst.msk [vmem:[#allocation2] sm:$0x3] %vm369_vm0, %v1753_v8  ;;  %s1755_s25 = smov 64   ;;  %s1756_s26 = smov 32  }
  0x38   : > { %s1865_s12 = scalar_select %p337_p3, %s1742_s14, 1  ;;  %1513 = vmatprep.subr.bf16.mxu1 %v1753_v8  ;;  %1517 = vmatprep.mubr.msk.bf16.mxu1 %vm1754_vm1, %v1753_v8  ;;  %vm501_vm8 = vcmask 253952  }
  0x39   : > { %s380_s23 = scalar_lea.vmem %s1854_s11, %s379_s22 [#allocation6]  ;;  %s504_s27 = smul.u32 6, %s1742_s14 }
  0x3a   : > { %s1480_s17 = sshll.u32 %s1865_s12, 4  ;;  %v381_v13 = vld [vmem:[%s380_s23] sm:$0x1]  ;;  %s1915_s28 = ssub.s32 1, %s1742_s14 }
  0x3b   : > { %s341_s21 = scalar_lea.vmem %s2147_s2, %s1480_s17  ;;  %v382_v14 = vunpack.c.l.bf16 %v381_v13  ;;  %s1918_s29 = sadd.s32 %s504_s27, %s1915_s28 }
  0x3c   : > { %v1874_v9 = vld [vmem:[%s341_s21] sm:$0xff]   ;;  %v1877_v10 = vld [vmem:[%s341_s21 + $0x8] sm:$0xff]   ;;  %s506_s30 = scalar_lea.vmem %s1854_s11, %s1918_s29 [#allocation6]  ;;  %s607_s4 = smul.u32 5, %s1742_s14 }
  0x3d   : > { %1506 = vmatpush3.bf16.msra.mxu0 %v1874_v9  ;;  %1514 = vmatpush3.bf16.msra.mxu1 %v1874_v9  ;;  %v507_v37 = vld [vmem:[%s506_s30] sm:$0x1]  ;;  %s1456_s5 = sshll.u32 %s1915_s28, 1  ;;  %s709_s8 = smul.u32 3, %s1915_s28 }
  0x3e   : > { %v378_v11 = vld [vmem:[#allocation3] sm:$0x3]  ;;  %1507 = vmatprep.subr.bf16.mxu0 %v1753_v8  ;;  %1515 = vmatprep.subr.bf16.mxu1 %v1753_v8  ;;  %v1451_v21 = vld.sshfl [vmem:[#allocation2] sm:$0x3 pattern:$0x76325410]  ;;  %v508_v38 = vunpack.c.l.bf16 %v507_v37  ;;  %s1939_s6 = sadd.s32 %s1456_s5, %s607_s4 }
  0x3f   : > { %v383_v12 = vpack.c.bf16 %v378_v11, %v378_v11  ;;  %s609_s7 = scalar_lea.vmem %s1854_s11, %s1939_s6 [#allocation6]  ;;  %s1460_s9 = sshll.u32 %s1742_s14, 2 }
  0x40   : > { %v610_v59 = vld [vmem:[%s609_s7] sm:$0x1]  ;;  %s1960_s10 = sadd.s32 %s1460_s9, %s709_s8  ;;  %s813_s19 = smul.u32 3, %s1742_s14 }
  0x41   : > { %1508 = vmatpush3.bf16.msra.mxu0 %v1877_v10  ;;  %1516 = vmatpush3.bf16.msra.mxu1 %v1877_v10  ;;  %v611_v60 = vunpack.c.l.bf16 %v610_v59  ;;  %s712_s17 = scalar_lea.vmem %s1854_s11, %s1960_s10 [#allocation6]  ;;  %s1464_s20 = sshll.u32 %s1915_s28, 2 }
  0x42   : > { %1521 = vmatprep.subr.bf16.mxu0 %v1753_v8  ;;  %1529 = vmatprep.subr.bf16.mxu1 %v1753_v8  ;;  %s1980_s21 = sadd.s32 %s1464_s20, %s813_s19  ;;  %s915_s27 = smul.u32 5, %s1915_s28 }
  0x43   : > { %s815_s23 = scalar_lea.vmem %s1854_s11, %s1980_s21 [#allocation6]  ;;  %s1468_s30 = sshll.u32 %s1742_s14, 1 }
  0x44   : > { %1510 = vmatmul.mubr.msk.bf16.vlgmr.msra.gmra.mrb[0].mxu0 %vm396_vm2, %v383_v12  ;;  %s2000_s4 = sadd.s32 %s1468_s30, %s915_s27  ;;  %s1018_s7 = smul.u32 6, %s1915_s28 }
  0x45   : > { %1522 = vmatpush3.bf16.msra.mxu0 %v1874_v9  ;;  %1525 = vmatprep.mubr.msk.bf16.mxu0 %vm1754_vm1, %v1753_v8  ;;  %s918_s5 = scalar_lea.vmem %s1854_s11, %s2000_s4 [#allocation6]  ;;  %s372_s20 = sld [smem:[#allocation4 + %s1742_s14]] }
  0x46   : > { %1523 = vmatprep.subr.bf16.mxu0 %v1753_v8  ;;  %s2015_s8 = sadd.s32 %s1742_s14, %s1018_s7 }
  0x47   : > { %s1020_s9 = scalar_lea.vmem %s1854_s11, %s2015_s8 [#allocation6] }
  0x49   : > { %1524 = vmatpush3.bf16.msra.mxu0 %v1877_v10 }
  0x4a   : > { %1537 = vmatprep.subr.bf16.mxu0 %v1753_v8 }
 0x117   : > { %v434_v15 = vpop.f32.mrb[0].mxu0 }
 0x118   : > { %v440_v16 = vadd.f32 %v434_v15, %v382_v14  ;;  %v1511_v17 = vpop.f32.mrb[1].mxu0 }
 0x119   : > { %v437_v18 = vpop.f32.mrb[2].mxu0 }
 0x11a   : > { %1629 = vtanh.f32 %v440_v16  ;;  %v1512_v19 = vpop.f32.mrb[3].mxu0  ;;  %v1450_v22 = vmul.f32 -1.442695, %v440_v16 }
 0x11c   : > { %1631 = vpow2.f32 %v1450_v22 }
 0x124   : > { %v1630_v20 = vpop.eup %1629 }
 0x125   : > { %461 = vrot.lane.b32.xlu0 %v1630_v20, %s1755_s25  ;;  %v713_v20 = vld [vmem:[%s712_s17] sm:$0x1]  ;;  %s1120_s17 = smul.u32 7, %s1915_s28 }
 0x126   : > { %v1632_v23 = vpop.eup %1631 }
 0x127   : > { %v444_v24 = vadd.f32 1.0, %v1632_v23  ;;  %s1121_s19 = scalar_lea.vmem %s1854_s11, %s1120_s17 [#allocation6]  ;;  %s1446_s11 = sshll.u32 %s1865_s12, 3 }
 0x128   : > { %s2070_s30 = scalar_lea.vmem %s2148_s3, %s1446_s11 }
 0x129   : > { %456 = vrot.lane.b32.xlu0 %v1451_v21, %s1756_s26  ;;  %1633 = vrcp.f32 %v444_v24  ;;  %v714_v21 = vunpack.c.l.bf16 %v713_v20  ;;  %s500_s12 = scalar_lea.vmem %s2070_s30, %s379_s22  ;;  %s604_s14 = scalar_lea.vmem %s2070_s30, %s1918_s29 }
 0x12a   : > { %s707_s22 = scalar_lea.vmem %s2070_s30, %s1939_s6  ;;  %s913_s7 = scalar_lea.vmem %s2070_s30, %s1980_s21 }
 0x12b   : > { %s1016_s29 = scalar_lea.vmem %s2070_s30, %s2000_s4  ;;  %s1118_s6 = scalar_lea.vmem %s2070_s30, %s2015_s8 }
 0x133   : > { %v1634_v25 = vpop.eup %1633 }
 0x197   : > { %v462_v26 = vpop.permute.xlu0 %461 }
 0x198   : > { %v464_v27 = vmul.f32 %v1634_v25, %v462_v26 }
 0x19a   : > { %466 = vrot.lane.b32.xlu1 %v464_v27, %s1756_s26 }
 0x19b   : > { %v457_v28 = vpop.permute.xlu0 %456 }
 0x19c   : > { %v459_v29 = vmul.f32 %v1634_v25, %v457_v28 }
 0x20c   : > { %v467_v30 = vpop.permute.xlu1 %466 }
 0x20d   : > { %v469_v31 = vadd.f32 %v467_v30, %v459_v29 }
 0x20f   : > { %1635 = vtanh.f32 %v469_v31 }
 0x219   : > { %v1636_v32 = vpop.eup %1635 }
 0x21a   : > { %472 = vrot.lane.b32.xlu1 %v1636_v32, %s1755_s25 }
 0x28c   : > { %v473_v33 = vpop.permute.xlu1 %472 }
 0x28d   : > { %v1901_v34 = vmul.f32 %v1634_v25, %v473_v33 }
 0x28f   : > { %v509_v35 = vpack.c.bf16 %v1901_v34, %v1901_v34 }
 0x291   : > { %511 = vrot.lane.b32.xlu0 %v509_v35, %s1756_s26 }
 0x303   : > { %v512_v36 = vpop.permute.xlu0 %511 }
 0x304   : > { %1518 = vmatmul.mubr.msk.bf16.vlgmr.msra.gmra.mrb[0].mxu1 %vm396_vm2, %v512_v36 }
 0x305   : > { %1530 = vmatpush3.bf16.msra.mxu1 %v1874_v9  ;;  %1533 = vmatprep.mubr.msk.bf16.mxu1 %vm1754_vm1, %v1753_v8 }
 0x306   : > { %1531 = vmatprep.subr.bf16.mxu1 %v1753_v8 }
 0x309   : > { %1532 = vmatpush3.bf16.msra.mxu1 %v1877_v10 }
 0x30a   : > { %1545 = vmatprep.subr.bf16.mxu1 %v1753_v8 }
 0x3d7   : > { %v550_v39 = vpop.f32.mrb[0].mxu1 }
 0x3d8   : > { %v556_v40 = vadd.f32 %v550_v39, %v508_v38  ;;  %v1519_v41 = vpop.f32.mrb[1].mxu1 }
 0x3d9   : > { %v553_v42 = vpop.f32.mrb[2].mxu1 }
 0x3da   : > { %1637 = vtanh.f32 %v556_v40  ;;  %v1520_v43 = vpop.f32.mrb[3].mxu1  ;;  %v1454_v45 = vmul.f32 -1.442695, %v556_v40 }
 0x3db   : > { %v816_v43 = vld [vmem:[%s815_s23] sm:$0x1] }
 0x3dc   : > { %1639 = vpow2.f32 %v1454_v45 }
 0x3e4   : > { %v1638_v44 = vpop.eup %1637 }
 0x3e5   : > { %566 = vrot.lane.b32.xlu1 %v1638_v44, %s1755_s25  ;;  %v817_v44 = vunpack.c.l.bf16 %v816_v43 }
 0x3e6   : > { %v1640_v46 = vpop.eup %1639 }
 0x3e7   : > { %v560_v47 = vadd.f32 1.0, %v1640_v46 }
 0x3e9   : > { %1641 = vrcp.f32 %v560_v47 }
 0x3f3   : > { %v1642_v48 = vpop.eup %1641 }
 0x3f4   : > { %v564_v51 = vmul.f32 %v1642_v48, %v469_v31 }
 0x457   : > { %v567_v49 = vpop.permute.xlu1 %566 }
 0x458   : > { %v569_v50 = vmul.f32 %v1642_v48, %v567_v49 }
 0x45a   : > { %571 = vrot.lane.b32.xlu0 %v569_v50, %s1756_s26 }
 0x4cc   : > { %v572_v52 = vpop.permute.xlu0 %571 }
 0x4cd   : > { %v574_v53 = vadd.f32 %v572_v52, %v564_v51 }
 0x4cf   : > { %1643 = vtanh.f32 %v574_v53 }
 0x4d9   : > { %v1644_v54 = vpop.eup %1643 }
 0x4da   : > { %577 = vrot.lane.b32.xlu1 %v1644_v54, %s1755_s25 }
 0x54c   : > { %v578_v55 = vpop.permute.xlu1 %577 }
 0x54d   : > { %v1925_v56 = vmul.f32 %v1642_v48, %v578_v55 }
 0x54f   : > { %v612_v57 = vpack.c.bf16 %v1925_v56, %v1925_v56 }
 0x551   : > { %614 = vrot.lane.b32.xlu0 %v612_v57, %s1756_s26 }
 0x5c3   : > { %v615_v58 = vpop.permute.xlu0 %614 }
 0x5c4   : > { %1526 = vmatmul.mubr.msk.bf16.vlgmr.msra.gmra.mrb[4].mxu0 %vm396_vm2, %v615_v58 }
 0x5c5   : > { %1538 = vmatpush3.bf16.msra.mxu0 %v1874_v9  ;;  %1541 = vmatprep.mubr.msk.bf16.mxu0 %vm1754_vm1, %v1753_v8 }
 0x5c6   : > { %1539 = vmatprep.subr.bf16.mxu0 %v1753_v8 }
 0x5c9   : > { %1540 = vmatpush3.bf16.msra.mxu0 %v1877_v10 }
 0x5ca   : > { %1553 = vmatprep.subr.bf16.mxu0 %v1753_v8 }
 0x697   : > { %v653_v61 = vpop.f32.mrb[4].mxu0 }
 0x698   : > { %v659_v62 = vadd.f32 %v653_v61, %v611_v60  ;;  %v1527_v63 = vpop.f32.mrb[5].mxu0 }
 0x699   : > { %v656_v0 = vpop.f32.mrb[6].mxu0 }
 0x69a   : > { %1645 = vtanh.f32 %v659_v62  ;;  %v1528_v1 = vpop.f32.mrb[7].mxu0  ;;  %v1458_v3 = vmul.f32 -1.442695, %v659_v62 }
 0x69c   : > { %1647 = vpow2.f32 %v1458_v3 }
 0x6a4   : > { %v1646_v2 = vpop.eup %1645 }
 0x6a5   : > { %669 = vrot.lane.b32.xlu1 %v1646_v2, %s1755_s25  ;;  %v919_v2 = vld [vmem:[%s918_s5] sm:$0x1]  ;;  %s1759_s5 = smov 96  }
 0x6a6   : > { %v1648_v4 = vpop.eup %1647  ;;  %v920_v3 = vunpack.c.l.bf16 %v919_v2 }
 0x6a7   : > { %v663_v5 = vadd.f32 1.0, %v1648_v4 }
 0x6a9   : > { %1649 = vrcp.f32 %v663_v5 }
 0x6b3   : > { %v1650_v6 = vpop.eup %1649 }
 0x6b4   : > { %v667_v12 = vmul.f32 %v1650_v6, %v574_v53 }
 0x717   : > { %v670_v7 = vpop.permute.xlu1 %669 }
 0x718   : > { %v672_v11 = vmul.f32 %v1650_v6, %v670_v7 }
 0x71a   : > { %674 = vrot.lane.b32.xlu0 %v672_v11, %s1756_s26 }
 0x78c   : > { %v675_v13 = vpop.permute.xlu0 %674 }
 0x78d   : > { %v677_v14 = vadd.f32 %v675_v13, %v667_v12 }
 0x78f   : > { %1651 = vtanh.f32 %v677_v14 }
 0x799   : > { %v1652_v15 = vpop.eup %1651 }
 0x79a   : > { %680 = vrot.lane.b32.xlu1 %v1652_v15, %s1755_s25 }
 0x80c   : > { %v681_v16 = vpop.permute.xlu1 %680 }
 0x80d   : > { %v1946_v17 = vmul.f32 %v1650_v6, %v681_v16 }
 0x80f   : > { %v715_v18 = vpack.c.bf16 %v1946_v17, %v1946_v17 }
 0x811   : > { %717 = vrot.lane.b32.xlu0 %v715_v18, %s1756_s26 }
 0x883   : > { %v718_v19 = vpop.permute.xlu0 %717 }
 0x884   : > { %1534 = vmatmul.mubr.msk.bf16.vlgmr.msra.gmra.mrb[4].mxu1 %vm396_vm2, %v718_v19 }
 0x885   : > { %1546 = vmatpush3.bf16.msra.mxu1 %v1874_v9  ;;  %1549 = vmatprep.mubr.msk.bf16.mxu1 %vm1754_vm1, %v1753_v8 }
 0x886   : > { %1547 = vmatprep.subr.bf16.mxu1 %v1753_v8 }
 0x889   : > { %1548 = vmatpush3.bf16.msra.mxu1 %v1877_v10 }
 0x88a   : > { %1561 = vmatprep.subr.bf16.mxu1 %v1753_v8 }
 0x957   : > { %v756_v22 = vpop.f32.mrb[4].mxu1 }
 0x958   : > { %v762_v23 = vadd.f32 %v756_v22, %v714_v21  ;;  %v1535_v24 = vpop.f32.mrb[5].mxu1 }
 0x959   : > { %v759_v25 = vpop.f32.mrb[6].mxu1 }
 0x95a   : > { %1653 = vtanh.f32 %v762_v23  ;;  %v1536_v26 = vpop.f32.mrb[7].mxu1  ;;  %v1462_v28 = vmul.f32 -1.442695, %v762_v23 }
 0x95b   : > { %v1021_v26 = vld [vmem:[%s1020_s9] sm:$0x1] }
 0x95c   : > { %1655 = vpow2.f32 %v1462_v28 }
 0x964   : > { %v1654_v27 = vpop.eup %1653 }
 0x965   : > { %772 = vrot.lane.b32.xlu1 %v1654_v27, %s1755_s25  ;;  %v1022_v27 = vunpack.c.l.bf16 %v1021_v26 }
 0x966   : > { %v1656_v29 = vpop.eup %1655 }
 0x967   : > { %v766_v30 = vadd.f32 1.0, %v1656_v29 }
 0x969   : > { %1657 = vrcp.f32 %v766_v30 }
 0x973   : > { %v1658_v31 = vpop.eup %1657 }
 0x974   : > { %v770_v35 = vmul.f32 %v1658_v31, %v677_v14 }
 0x9d7   : > { %v773_v32 = vpop.permute.xlu1 %772 }
 0x9d8   : > { %v775_v33 = vmul.f32 %v1658_v31, %v773_v32 }
 0x9da   : > { %777 = vrot.lane.b32.xlu0 %v775_v33, %s1756_s26 }
 0xa4c   : > { %v778_v36 = vpop.permute.xlu0 %777 }
 0xa4d   : > { %v780_v37 = vadd.f32 %v778_v36, %v770_v35 }
 0xa4f   : > { %1659 = vtanh.f32 %v780_v37 }
 0xa59   : > { %v1660_v38 = vpop.eup %1659 }
 0xa5a   : > { %783 = vrot.lane.b32.xlu1 %v1660_v38, %s1755_s25 }
 0xacc   : > { %v784_v39 = vpop.permute.xlu1 %783 }
 0xacd   : > { %v1967_v40 = vmul.f32 %v1658_v31, %v784_v39 }
 0xacf   : > { %v818_v41 = vpack.c.bf16 %v1967_v40, %v1967_v40 }
 0xad1   : > { %820 = vrot.lane.b32.xlu0 %v818_v41, %s1756_s26 }
 0xb43   : > { %v821_v42 = vpop.permute.xlu0 %820 }
 0xb44   : > { %1542 = vmatmul.mubr.msk.bf16.vlgmr.msra.gmra.mrb[8].mxu0 %vm396_vm2, %v821_v42 }
 0xb45   : > { %1554 = vmatpush3.bf16.msra.mxu0 %v1874_v9  ;;  %1557 = vmatprep.mubr.msk.bf16.mxu0 %vm1754_vm1, %v1753_v8 }
 0xb46   : > { %1555 = vmatprep.subr.bf16.mxu0 %v1753_v8 }
 0xb49   : > { %1556 = vmatpush3.bf16.msra.mxu0 %v1877_v10 }
 0xc17   : > { %v859_v45 = vpop.f32.mrb[8].mxu0 }
 0xc18   : > { %v865_v46 = vadd.f32 %v859_v45, %v817_v44  ;;  %v1543_v47 = vpop.f32.mrb[9].mxu0 }
 0xc19   : > { %v862_v48 = vpop.f32.mrb[10].mxu0 }
 0xc1a   : > { %1661 = vtanh.f32 %v865_v46  ;;  %v1544_v49 = vpop.f32.mrb[11].mxu0  ;;  %v1466_v51 = vmul.f32 -1.442695, %v865_v46 }
 0xc1c   : > { %1663 = vpow2.f32 %v1466_v51 }
 0xc24   : > { %v1662_v50 = vpop.eup %1661 }
 0xc25   : > { %875 = vrot.lane.b32.xlu1 %v1662_v50, %s1755_s25  ;;  %v1122_v50 = vld [vmem:[%s1121_s19] sm:$0x1] }
 0xc26   : > { %v1664_v52 = vpop.eup %1663  ;;  %v1123_v51 = vunpack.c.l.bf16 %v1122_v50 }
 0xc27   : > { %v869_v53 = vadd.f32 1.0, %v1664_v52 }
 0xc29   : > { %1665 = vrcp.f32 %v869_v53 }
 0xc33   : > { %v1666_v54 = vpop.eup %1665 }
 0xc34   : > { %v873_v58 = vmul.f32 %v1666_v54, %v780_v37 }
 0xc97   : > { %v876_v55 = vpop.permute.xlu1 %875 }
 0xc98   : > { %v878_v57 = vmul.f32 %v1666_v54, %v876_v55 }
 0xc9a   : > { %880 = vrot.lane.b32.xlu0 %v878_v57, %s1756_s26 }
 0xd0c   : > { %v881_v59 = vpop.permute.xlu0 %880 }
 0xd0d   : > { %v883_v60 = vadd.f32 %v881_v59, %v873_v58 }
 0xd0f   : > { %1667 = vtanh.f32 %v883_v60 }
 0xd19   : > { %v1668_v61 = vpop.eup %1667 }
 0xd1a   : > { %886 = vrot.lane.b32.xlu1 %v1668_v61, %s1755_s25  ;;  %v2033_v61 = vstv %s372_s20 }
 0xd8c   : > { %v887_v62 = vpop.permute.xlu1 %886 }
 0xd8d   : > { %v1987_v63 = vmul.f32 %v1666_v54, %v887_v62 }
 0xd8f   : > { %v921_v0 = vpack.c.bf16 %v1987_v63, %v1987_v63 }
 0xd91   : > { %923 = vrot.lane.b32.xlu0 %v921_v0, %s1756_s26  ;;  %v477_v0 = vsub.f32 %v1901_v34, %v2033_v61 }
 0xd93   : > { %vm478_vm3 = vcmp.gt.f32.partialorder %v477_v0, 0.0 }
 0xe03   : > { %v924_v1 = vpop.permute.xlu0 %923 }
 0xe04   : > { %1550 = vmatmul.mubr.msk.bf16.vlgmr.msra.gmra.mrb[8].mxu1 %vm396_vm2, %v924_v1  ;;  %v1757_v1 = vmov 1966171168  }
 0xe05   : > { %1562 = vmatpush3.bf16.msra.mxu1 %v1874_v9  ;;  %1565 = vmatprep.mubr.msk.bf16.mxu1 %vm1754_vm1, %v1753_v8  ;;  %v484_v2 = vunpack.c.l.s4 %v1757_v1 }
 0xe06   : > { %1563 = vmatprep.subr.bf16.mxu1 %v1753_v8 }
 0xe09   : > { %1564 = vmatpush3.bf16.msra.mxu1 %v1877_v10 }
 0xed7   : > { %v962_v4 = vpop.f32.mrb[8].mxu1 }
 0xed8   : > { %v968_v5 = vadd.f32 %v962_v4, %v920_v3  ;;  %v1551_v6 = vpop.f32.mrb[9].mxu1  ;;  %v486_v3 = vlaneseq  ;;  %v684_v4 = vsub.f32 %v1946_v17, %v2033_v61 }
 0xed9   : > { %v965_v7 = vpop.f32.mrb[10].mxu1 }
 0xeda   : > { %1669 = vtanh.f32 %v968_v5  ;;  %v1552_v9 = vpop.f32.mrb[11].mxu1  ;;  %v1470_v12 = vmul.f32 -1.442695, %v968_v5  ;;  %v485_v5 = vunpack.c.0.s8 %v484_v2  ;;  %v487_v6 = vshrl.u32 %v486_v3, 7 }
 0xedb   : > { %v1452_v7 = vsel %vm478_vm3, 1.0, %v1753_v8  ;;  %vm685_vm4 = vcmp.gt.f32.partialorder %v684_v4, 0.0  ;;  %v890_v9 = vsub.f32 %v1987_v63, %v2033_v61 }
 0xedc   : > { %1671 = vpow2.f32 %v1470_v12  ;;  %v2042_v12 = vsub.s32 %v485_v5, %v487_v6  ;;  %v1459_v34 = vsel %vm685_vm4, 1.0, %v1753_v8 }
 0xedd   : > { %vm891_vm5 = vcmp.gt.f32.partialorder %v890_v9, 0.0  ;;  %v688_v17 = vpack.c.bf16 %v1459_v34, %v1459_v34 }
 0xee4   : > { %v1670_v11 = vpop.eup %1669 }
 0xee5   : > { %978 = vrot.lane.b32.xlu1 %v1670_v11, %s1755_s25  ;;  %v481_v11 = vpack.c.bf16 %v1452_v7, %v1452_v7 }
 0xee6   : > { %v1672_v10 = vpop.eup %1671 }
 0xee7   : > { %v972_v13 = vadd.f32 1.0, %v1672_v10 }
 0xee9   : > { %1673 = vrcp.f32 %v972_v13 }
 0xef3   : > { %v1674_v14 = vpop.eup %1673 }
 0xef4   : > { %v976_v18 = vmul.f32 %v1674_v14, %v883_v60 }
 0xf57   : > { %v979_v15 = vpop.permute.xlu1 %978 }
 0xf58   : > { %v981_v16 = vmul.f32 %v1674_v14, %v979_v15 }
 0xf5a   : > { %983 = vrot.lane.b32.xlu0 %v981_v16, %s1756_s26  ;;  %v489_v16 = vrot.slane %v481_v11, %v2042_v12 }
 0xfcc   : > { %v984_v19 = vpop.permute.xlu0 %983 }
 0xfcd   : > { %v986_v20 = vadd.f32 %v984_v19, %v976_v18  ;;  %v1467_v18 = vsel %vm891_vm5, 1.0, %v1753_v8  ;;  %v496_v19 = vrot.slane %v489_v16, %v2042_v12 }
 0xfce   : > { %v894_v63 = vpack.c.bf16 %v1467_v18, %v1467_v18 }
 0xfcf   : > { %1675 = vtanh.f32 %v986_v20 }
 0xfd9   : > { %v1676_v21 = vpop.eup %1675 }
 0xfda   : > { %989 = vrot.lane.b32.xlu1 %v1676_v21, %s1755_s25 }
0x104c   : > { %v990_v22 = vpop.permute.xlu1 %989 }
0x104d   : > { %v2007_v23 = vmul.f32 %v1674_v14, %v990_v22 }
0x104f   : > { %v1023_v24 = vpack.c.bf16 %v2007_v23, %v2007_v23 }
0x1051   : > { %1025 = vrot.lane.b32.xlu0 %v1023_v24, %s1756_s26 }
0x10c3   : > { %v1026_v25 = vpop.permute.xlu0 %1025 }
0x10c4   : > { %1558 = vmatmul.mubr.msk.bf16.vlgmr.msra.gmra.mrb[12].mxu0 %vm396_vm2, %v1026_v25  ;;  %v902_v25 = vrot.slane %v894_v63, %v2042_v12 }
0x10c6   : > { %v909_v26 = vrot.slane %v902_v25, %v2042_v12 }
0x1197   : > { %v1064_v28 = vpop.f32.mrb[12].mxu0 }
0x1198   : > { %v1070_v29 = vadd.f32 %v1064_v28, %v1022_v27  ;;  %v1559_v30 = vpop.f32.mrb[13].mxu0 }
0x1199   : > { %v1067_v31 = vpop.f32.mrb[14].mxu0 }
0x119a   : > { %1677 = vtanh.f32 %v1070_v29  ;;  %v1560_v32 = vpop.f32.mrb[15].mxu0  ;;  %v1473_v35 = vmul.f32 -1.442695, %v1070_v29  ;;  %v1758_v29 = vmov 1983009808  }
0x119b   : > { %v1223_v30 = vunpack.c.l.s4 %v1758_v29  ;;  %v581_v32 = vsub.f32 %v1925_v56, %v2033_v61 }
0x119c   : > { %1679 = vpow2.f32 %v1473_v35 }
0x119d   : > { %v1224_v31 = vunpack.c.0.s8 %v1223_v30  ;;  %vm582_vm7 = vcmp.gt.f32.partialorder %v581_v32, 0.0 }
0x11a4   : > { %v1678_v33 = vpop.eup %1677 }
0x11a5   : > { %1080 = vrot.lane.b32.xlu1 %v1678_v33, %s1755_s25  ;;  %v2072_v33 = vsub.s32 %v1224_v31, %v487_v6 }
0x11a6   : > { %v1680_v36 = vpop.eup %1679 }
0x11a7   : > { %v1074_v37 = vadd.f32 1.0, %v1680_v36 }
0x11a9   : > { %1681 = vrcp.f32 %v1074_v37 }
0x11b3   : > { %v1682_v38 = vpop.eup %1681 }
0x11b4   : > { %v1078_v42 = vmul.f32 %v1682_v38, %v986_v20  ;;  %v696_v20 = vrot.slane %v688_v17, %v2042_v12 }
0x11b6   : > { %v703_v24 = vrot.slane %v696_v20, %v2042_v12 }
0x1217   : > { %v1081_v39 = vpop.permute.xlu1 %1080 }
0x1218   : > { %v1083_v41 = vmul.f32 %v1682_v38, %v1081_v39 }
0x121a   : > { %1085 = vrot.lane.b32.xlu0 %v1083_v41, %s1756_s26  ;;  %v1455_v41 = vsel %vm582_vm7, 1.0, %v1753_v8 }
0x128c   : > { %v1086_v43 = vpop.permute.xlu0 %1085 }
0x128d   : > { %v2021_v44 = vadd.f32 %v1086_v43, %v1078_v42  ;;  %v993_v42 = vsub.f32 %v2007_v23, %v2033_v61  ;;  %v585_v43 = vpack.c.bf16 %v1455_v41, %v1455_v41 }
0x128f   : > { %1683 = vtanh.f32 %v2021_v44  ;;  %vm994_vm10 = vcmp.gt.f32.partialorder %v993_v42, 0.0 }
0x1299   : > { %v1684_v45 = vpop.eup %1683 }
0x129a   : > { %1091 = vrot.lane.b32.xlu1 %v1684_v45, %s1755_s25  ;;  %v593_v45 = vrot.slane %v585_v43, %v2042_v12 }
0x130c   : > { %v1092_v46 = vpop.permute.xlu1 %1091 }
0x130d   : > { %v1094_v47 = vmul.f32 %v1682_v38, %v1092_v46  ;;  %v787_v38 = vsub.f32 %v1967_v40, %v2033_v61 }
0x130f   : > { %v1124_v48 = vpack.c.bf16 %v1094_v47, %v1094_v47  ;;  %v1095_v10 = vsub.f32 %v1094_v47, %v2033_v61  ;;  %vm788_vm9 = vcmp.gt.f32.partialorder %v787_v38, 0.0  ;;  %v1471_v47 = vsel %vm994_vm10, 1.0, %v1753_v8 }
0x1310   : > { %v1463_v40 = vsel %vm788_vm9, 1.0, %v1753_v8 }
0x1311   : > { %1126 = vrot.lane.b32.xlu0 %v1124_v48, %s1756_s26  ;;  %vm1096_vm6 = vcmp.gt.f32.partialorder %v1095_v10, 0.0  ;;  %v997_v48 = vpack.c.bf16 %v1471_v47, %v1471_v47 }
0x1312   : > { %v1474_v21 = vsel %vm1096_vm6, 1.0, %v1753_v8 }
0x1313   : > { %v1099_v22 = vpack.c.bf16 %v1474_v21, %v1474_v21 }
0x1315   : > { %v1107_v27 = vrot.slane %v1099_v22, %v2042_v12 }
0x1317   : > { %v1114_v28 = vrot.slane %v1107_v27, %v2042_v12 }
0x1383   : > { %v1127_v49 = vpop.permute.xlu0 %1126 }
0x1384   : > { %1566 = vmatmul.mubr.msk.bf16.vlgmr.msra.gmra.mrb[12].mxu1 %vm396_vm2, %v1127_v49  ;;  %v600_v49 = vrot.slane %v593_v45, %v2042_v12 }
0x1457   : > { %v1165_v52 = vpop.f32.mrb[12].mxu1 }
0x1458   : > { %v1171_v53 = vadd.f32 %v1165_v52, %v1123_v51  ;;  %v1567_v54 = vpop.f32.mrb[13].mxu1  ;;  %v1005_v51 = vrot.slane %v997_v48, %v2042_v12 }
0x1459   : > { %v1168_v55 = vpop.f32.mrb[14].mxu1 }
0x145a   : > { %1685 = vtanh.f32 %v1171_v53  ;;  %v1568_v57 = vpop.f32.mrb[15].mxu1  ;;  %v1476_v59 = vmul.f32 -1.442695, %v1171_v53  ;;  %v1012_v52 = vrot.slane %v1005_v51, %v2042_v12 }
0x145c   : > { %1687 = vpow2.f32 %v1476_v59 }
0x1464   : > { %v1686_v58 = vpop.eup %1685 }
0x1465   : > { %1181 = vrot.lane.b32.xlu1 %v1686_v58, %s1755_s25 }
0x1466   : > { %v1688_v60 = vpop.eup %1687 }
0x1467   : > { %v1175_v62 = vadd.f32 1.0, %v1688_v60 }
0x1469   : > { %1689 = vrcp.f32 %v1175_v62 }
0x1473   : > { %v2046_v13 = vpop.eup %1689 }
0x1474   : > { %v1179_v35 = vmul.f32 %v2046_v13, %v2021_v44  ;;  %v791_v44 = vpack.c.bf16 %v1463_v40, %v1463_v40 }
0x1476   : > { %v799_v23 = vrot.slane %v791_v44, %v2042_v12 }
0x1478   : > { %v806_v50 = vrot.slane %v799_v23, %v2042_v12 }
0x14d7   : > { %v1182_v14 = vpop.permute.xlu1 %1181 }
0x14d8   : > { %v1184_v15 = vmul.f32 %v2046_v13, %v1182_v14 }
0x14da   : > { %1186 = vrot.lane.b32.xlu0 %v1184_v15, %s1756_s26 }
0x14de   : > { %497 = vrot.lane.b32.xlu0 %v496_v19, %s1756_s26 }
0x14e2   : > { %704 = vrot.lane.b32.xlu0 %v703_v24, %s1756_s26 }
0x14e6   : > { %910 = vrot.lane.b32.xlu0 %v909_v26, %s1756_s26 }
0x14ea   : > { %1115 = vrot.lane.b32.xlu0 %v1114_v28, %s1756_s26 }
0x154c   : > { %v1187_v36 = vpop.permute.xlu0 %1186 }
0x154d   : > { %v1189_v37 = vadd.f32 %v1187_v36, %v1179_v35 }
0x154f   : > { %1691 = vtanh.f32 %v1189_v37  ;;  %v1228_v56 = vrot.slane %v1189_v37, %v2072_v33 }
0x1550   : > { %v498_v39 = vpop.permute.xlu0 %497 }
0x1551   : > { %502 = vst.msk [vmem:[%s500_s12] sm:$0x1] %vm501_vm8, %v498_v39  ;;  %1229 = vrot.lane.b32.xlu0 %v1228_v56, %s1759_s5 }
0x1554   : > { %v705_v53 = vpop.permute.xlu0 %704 }
0x1558   : > { %v911_v54 = vpop.permute.xlu0 %910 }
0x1559   : > { %v1692_v46 = vpop.eup %1691 }
0x155a   : > { %1192 = vrot.lane.b32.xlu1 %v1692_v46, %s1755_s25  ;;  %s810_s25 = scalar_lea.vmem %s2070_s30, %s1960_s10  ;;  %s1219_s10 = scalar_lea.vmem %s2070_s30, %s1120_s17 }
0x155c   : > { %v1116_v55 = vpop.permute.xlu0 %1115 }
0x155e   : > { %601 = vrot.lane.b32.xlu1 %v600_v49, %s1756_s26 }
0x1562   : > { %807 = vrot.lane.b32.xlu1 %v806_v50, %s1756_s26 }
0x1566   : > { %1013 = vrot.lane.b32.xlu1 %v1012_v52, %s1756_s26 }
0x15c3   : > { %v1230_v57 = vpop.permute.xlu0 %1229 }
0x15c4   : > { %1233 = vst.msk [vmem:[#allocation2] sm:$0x3] %vm369_vm0, %v1230_v57 }
0x15cc   : > { %v1193_v58 = vpop.permute.xlu1 %1192 }
0x15cd   : > { %v1195_v59 = vmul.f32 %v2046_v13, %v1193_v58 }
0x15cf   : > { %v1196_v60 = vsub.f32 %v1195_v59, %v2033_v61 }
0x15d0   : > { %v602_v62 = vpop.permute.xlu1 %601 }
0x15d1   : > { %vm1197_vm11 = vcmp.gt.f32.partialorder %v1196_v60, 0.0  ;;  %605 = vst.msk [vmem:[%s604_s14] sm:$0x1] %vm501_vm8, %v602_v62 }
0x15d2   : > { %v1477_v0 = vsel %vm1197_vm11, 1.0, %v1753_v8  ;;  %708 = vst.msk [vmem:[%s707_s22] sm:$0x1] %vm501_vm8, %v705_v53  ;;  %v1241_v8 = vrot.slane %v1195_v59, %v2072_v33 }
0x15d3   : > { %v1200_v1 = vpack.c.bf16 %v1477_v0, %v1477_v0 }
0x15d4   : > { %v808_v2 = vpop.permute.xlu1 %807 }
0x15d5   : > { %811 = vst.msk [vmem:[%s810_s25] sm:$0x1] %vm501_vm8, %v808_v2  ;;  %v1208_v3 = vrot.slane %v1200_v1, %v2042_v12 }
0x15d6   : > { %914 = vst.msk [vmem:[%s913_s7] sm:$0x1] %vm501_vm8, %v911_v54 }
0x15d7   : > { %v1215_v61 = vrot.slane %v1208_v3, %v2042_v12 }
0x15d8   : > { %v1014_v4 = vpop.permute.xlu1 %1013 }
0x15d9   : > { %1017 = vst.msk [vmem:[%s1016_s29] sm:$0x1] %vm501_vm8, %v1014_v4  ;;  %1216 = vrot.lane.b32.xlu1 %v1215_v61, %s1756_s26 }
0x15da   : > { %1119 = vst.msk [vmem:[%s1118_s6] sm:$0x1] %vm501_vm8, %v1116_v55 }
0x15dd   : > { %1242 = vrot.lane.b32.xlu1 %v1241_v8, %s1756_s26 }
0x164b   : > { %v1217_v5 = vpop.permute.xlu1 %1216 }
0x164c   : > { %1220 = vst.msk [vmem:[%s1219_s10] sm:$0x1] %vm501_vm8, %v1217_v5 }
0x164f   : > { %v1243_v6 = vpop.permute.xlu1 %1242 }
0x1650   : > { %1245 = vst.msk [vmem:[#allocation3] sm:$0x3] %vm369_vm0, %v1243_v6 }
0x1651 PF: > { %s14_s16 = sadd.s32 1, %s1750_s16   ;;  %s2152_s12 = smov %s1738_s13 }
0x1652   : > { %p11_p7 = scmp.ge.s32.totalorder %s14_s16, 4   ;;  %s2153_s13 = smov %s1830_s24 }
0x1653   : > { %s2154_s14 = smov %s1746_s15  ;;  %s2155_s15 = smov %s2157_s18 }
0x1654   :  { %13 = sbr.rel (!%p11_p7) target bundleno = 3 (0x3), region = 136 }
0x165b   :  { %1295 = vsyncpa [#allocation5], 1 }
0x165c   :  { %1297 = vsyncpa [#allocation5 + $0x1], 1 }

// kernel: spiking_encoder_forward.9
= control target key start
LH: loop header
LB: loop body
LE: loop exit
PB: predicated region body
PF: predicated region fallthrough
CT: control target
= control target key end

     0   :  { %vm138_vm0 = vcmask 254976   ;;  %v1600_v0 = vmov 0.0   ;;  %vm1601_vm1 = vmmov 0   ;;  %vm165_vm2 = vcmask 261120   ;;  %s1602_s23 = smov 64   ;;  %s1603_s24 = smov 32   ;;  %s2024_s2 = inlined_call_operand.vmem [shape: bf16[1,32,128], index: 2, kind: input, shape index: {}]   ;;  %s2025_s1 = inlined_call_operand.vmem [shape: bf16[8,2,128], index: 1, kind: input, shape index: {}]   ;;  %s2026_s0 = inlined_call_operand.<no memory space> [shape: f32[1], index: 0, kind: input, shape index: {}]   ;;  %s2027_s3 = inlined_call_operand.vmem [shape: bf16[1,8,2,32], index: 3, kind: output, shape index: {0}]   ;;  %s2028_s5 = inlined_call_operand.vmem [shape: f32[1,8,2,32], index: 5, kind: output, shape index: {2}]   ;;  %s2029_s4 = inlined_call_operand.vmem [shape: f32[1,8,2,32], index: 4, kind: output, shape index: {1}]  }
   0x1   :  { %1463 = vmatprep.subr.bf16.mxu0 %v1600_v0  ;;  %v1641_v1 = vld [vmem:[%s2024_s2] sm:$0xff]   ;;  %1467 = vmatprep.mubr.msk.bf16.mxu0 %vm1601_vm1, %v1600_v0  ;;  %140 = vst.msk [vmem:[#allocation3] sm:$0x3] %vm138_vm0, %v1600_v0  ;;  %139 = vst.msk [vmem:[#allocation2] sm:$0x3] %vm138_vm0, %v1600_v0  ;;  %v1656_v2 = vld [vmem:[%s2024_s2 + $0x8] sm:$0xff]  }
   0x2   :  { %1471 = vmatprep.subr.bf16.mxu1 %v1600_v0  ;;  %1475 = vmatprep.mubr.msk.bf16.mxu1 %vm1601_vm1, %v1600_v0  ;;  %v150_v5 = vld [vmem:[%s2025_s1] sm:$0x1]  ;;  %v1390_v29 = vld [vmem:[%s2025_s1 + $0x1] sm:$0x1]  ;;  %v1397_v51 = vld [vmem:[%s2025_s1 + $0x2] sm:$0x1] }
   0x3   :  { %1464 = vmatpush3.bf16.msra.mxu0 %v1641_v1  ;;  %1472 = vmatpush3.bf16.msra.mxu1 %v1641_v1  ;;  %v151_v6 = vunpack.c.l.bf16 %v150_v5  ;;  %v305_v30 = vunpack.c.l.bf16 %v1390_v29  ;;  %v435_v52 = vunpack.c.l.bf16 %v1397_v51  ;;  %vm270_vm7 = vcmask 253952  }
   0x4   :  { %1465 = vmatprep.subr.bf16.mxu0 %v1600_v0  ;;  %1473 = vmatprep.subr.bf16.mxu1 %v1600_v0 }
   0x7   :  { %1466 = vmatpush3.bf16.msra.mxu0 %v1656_v2  ;;  %1474 = vmatpush3.bf16.msra.mxu1 %v1656_v2 }
   0x8   :  { %v147_v3 = vld [vmem:[#allocation3] sm:$0x3]  ;;  %1479 = vmatprep.subr.bf16.mxu0 %v1600_v0  ;;  %1487 = vmatprep.subr.bf16.mxu1 %v1600_v0  ;;  %v1388_v13 = vld.sshfl [vmem:[#allocation2] sm:$0x3 pattern:$0x76325410] }
   0x9   :  { %v152_v4 = vpack.c.bf16 %v147_v3, %v147_v3 }
   0xb   :  { %1468 = vmatmul.mubr.msk.bf16.vlgmr.msra.gmra.mrb[0].mxu0 %vm165_vm2, %v152_v4 }
   0xc   :  { %1480 = vmatpush3.bf16.msra.mxu0 %v1641_v1  ;;  %1483 = vmatprep.mubr.msk.bf16.mxu0 %vm1601_vm1, %v1600_v0 }
   0xd   :  { %1481 = vmatprep.subr.bf16.mxu0 %v1600_v0 }
  0x10   :  { %1482 = vmatpush3.bf16.msra.mxu0 %v1656_v2 }
  0x11   :  { %1495 = vmatprep.subr.bf16.mxu0 %v1600_v0 }
  0xde   :  { %v203_v7 = vpop.f32.mrb[0].mxu0 }
  0xdf   :  { %v209_v8 = vadd.f32 %v203_v7, %v151_v6  ;;  %v1469_v9 = vpop.f32.mrb[1].mxu0 }
  0xe0   :  { %v206_v10 = vpop.f32.mrb[2].mxu0 }
  0xe1   :  { %1536 = vtanh.f32 %v209_v8  ;;  %v1470_v11 = vpop.f32.mrb[3].mxu0  ;;  %v1387_v14 = vmul.f32 -1.442695, %v209_v8 }
  0xe3   :  { %1538 = vpow2.f32 %v1387_v14 }
  0xeb   :  { %v1537_v12 = vpop.eup %1536 }
  0xec   :  { %230 = vrot.lane.b32.xlu0 %v1537_v12, %s1602_s23  ;;  %v1404_v12 = vld [vmem:[%s2025_s1 + $0x3] sm:$0x1] }
  0xed   :  { %v1539_v15 = vpop.eup %1538 }
  0xee   :  { %v213_v16 = vadd.f32 1.0, %v1539_v15 }
  0xf0   :  { %225 = vrot.lane.b32.xlu0 %v1388_v13, %s1603_s24  ;;  %1540 = vrcp.f32 %v213_v16  ;;  %v565_v13 = vunpack.c.l.bf16 %v1404_v12 }
  0xfa   :  { %v1541_v17 = vpop.eup %1540 }
 0x15e   :  { %v231_v18 = vpop.permute.xlu0 %230 }
 0x15f   :  { %v233_v19 = vmul.f32 %v1541_v17, %v231_v18 }
 0x161   :  { %235 = vrot.lane.b32.xlu1 %v233_v19, %s1603_s24 }
 0x162   :  { %v226_v20 = vpop.permute.xlu0 %225 }
 0x163   :  { %v228_v21 = vmul.f32 %v1541_v17, %v226_v20 }
 0x1d3   :  { %v236_v22 = vpop.permute.xlu1 %235 }
 0x1d4   :  { %v1678_v23 = vadd.f32 %v236_v22, %v228_v21 }
 0x1d6   :  { %1542 = vtanh.f32 %v1678_v23 }
 0x1e0   :  { %v1543_v24 = vpop.eup %1542 }
 0x1e1   :  { %241 = vrot.lane.b32.xlu1 %v1543_v24, %s1602_s23 }
 0x253   :  { %v242_v25 = vpop.permute.xlu1 %241 }
 0x254   :  { %v1682_v26 = vmul.f32 %v1541_v17, %v242_v25 }
 0x256   :  { %v306_v27 = vpack.c.bf16 %v1682_v26, %v1682_v26 }
 0x258   :  { %308 = vrot.lane.b32.xlu0 %v306_v27, %s1603_s24 }
 0x2ca   :  { %v309_v28 = vpop.permute.xlu0 %308 }
 0x2cb   :  { %1476 = vmatmul.mubr.msk.bf16.vlgmr.msra.gmra.mrb[0].mxu1 %vm165_vm2, %v309_v28 }
 0x2cc   :  { %1488 = vmatpush3.bf16.msra.mxu1 %v1641_v1  ;;  %1491 = vmatprep.mubr.msk.bf16.mxu1 %vm1601_vm1, %v1600_v0 }
 0x2cd   :  { %1489 = vmatprep.subr.bf16.mxu1 %v1600_v0 }
 0x2d0   :  { %1490 = vmatpush3.bf16.msra.mxu1 %v1656_v2 }
 0x2d1   :  { %1503 = vmatprep.subr.bf16.mxu1 %v1600_v0 }
 0x39e   :  { %v347_v31 = vpop.f32.mrb[0].mxu1 }
 0x39f   :  { %v353_v32 = vadd.f32 %v347_v31, %v305_v30  ;;  %v1477_v33 = vpop.f32.mrb[1].mxu1 }
 0x3a0   :  { %v350_v34 = vpop.f32.mrb[2].mxu1 }
 0x3a1   :  { %1544 = vtanh.f32 %v353_v32  ;;  %v1478_v35 = vpop.f32.mrb[3].mxu1  ;;  %v1392_v37 = vmul.f32 -1.442695, %v353_v32 }
 0x3a3   :  { %1546 = vpow2.f32 %v1392_v37 }
 0x3ab   :  { %v1545_v36 = vpop.eup %1544 }
 0x3ac   :  { %363 = vrot.lane.b32.xlu1 %v1545_v36, %s1602_s23  ;;  %v1411_v36 = vld [vmem:[%s2025_s1 + $0x4] sm:$0x1] }
 0x3ad   :  { %v1547_v38 = vpop.eup %1546  ;;  %v695_v37 = vunpack.c.l.bf16 %v1411_v36 }
 0x3ae   :  { %v357_v39 = vadd.f32 1.0, %v1547_v38 }
 0x3b0   :  { %1548 = vrcp.f32 %v357_v39 }
 0x3ba   :  { %v1549_v40 = vpop.eup %1548 }
 0x3bb   :  { %v361_v43 = vmul.f32 %v1549_v40, %v1678_v23 }
 0x41e   :  { %v364_v41 = vpop.permute.xlu1 %363 }
 0x41f   :  { %v366_v42 = vmul.f32 %v1549_v40, %v364_v41 }
 0x421   :  { %368 = vrot.lane.b32.xlu0 %v366_v42, %s1603_s24 }
 0x493   :  { %v369_v44 = vpop.permute.xlu0 %368 }
 0x494   :  { %v1700_v45 = vadd.f32 %v369_v44, %v361_v43 }
 0x496   :  { %1550 = vtanh.f32 %v1700_v45 }
 0x4a0   :  { %v1551_v46 = vpop.eup %1550 }
 0x4a1   :  { %374 = vrot.lane.b32.xlu1 %v1551_v46, %s1602_s23 }
 0x513   :  { %v375_v47 = vpop.permute.xlu1 %374 }
 0x514   :  { %v1704_v48 = vmul.f32 %v1549_v40, %v375_v47 }
 0x516   :  { %v436_v49 = vpack.c.bf16 %v1704_v48, %v1704_v48 }
 0x518   :  { %438 = vrot.lane.b32.xlu0 %v436_v49, %s1603_s24 }
 0x58a   :  { %v439_v50 = vpop.permute.xlu0 %438 }
 0x58b   :  { %1484 = vmatmul.mubr.msk.bf16.vlgmr.msra.gmra.mrb[4].mxu0 %vm165_vm2, %v439_v50 }
 0x58c   :  { %1496 = vmatpush3.bf16.msra.mxu0 %v1641_v1  ;;  %1499 = vmatprep.mubr.msk.bf16.mxu0 %vm1601_vm1, %v1600_v0 }
 0x58d   :  { %1497 = vmatprep.subr.bf16.mxu0 %v1600_v0 }
 0x590   :  { %1498 = vmatpush3.bf16.msra.mxu0 %v1656_v2 }
 0x591   :  { %1511 = vmatprep.subr.bf16.mxu0 %v1600_v0 }
 0x65e   :  { %v477_v53 = vpop.f32.mrb[4].mxu0 }
 0x65f   :  { %v483_v54 = vadd.f32 %v477_v53, %v435_v52  ;;  %v1485_v55 = vpop.f32.mrb[5].mxu0 }
 0x660   :  { %v480_v56 = vpop.f32.mrb[6].mxu0 }
 0x661   :  { %1552 = vtanh.f32 %v483_v54  ;;  %v1486_v57 = vpop.f32.mrb[7].mxu0  ;;  %v1399_v59 = vmul.f32 -1.442695, %v483_v54 }
 0x663   :  { %1554 = vpow2.f32 %v1399_v59 }
 0x66b   :  { %v1553_v58 = vpop.eup %1552 }
 0x66c   :  { %493 = vrot.lane.b32.xlu1 %v1553_v58, %s1602_s23 }
 0x66d   :  { %v1555_v60 = vpop.eup %1554 }
 0x66e   :  { %v487_v61 = vadd.f32 1.0, %v1555_v60  ;;  %v1418_v60 = vld [vmem:[%s2025_s1 + $0x5] sm:$0x1] }
 0x670   :  { %1556 = vrcp.f32 %v487_v61  ;;  %v825_v61 = vunpack.c.l.bf16 %v1418_v60 }
 0x67a   :  { %v1557_v62 = vpop.eup %1556 }
 0x67b   :  { %v491_v4 = vmul.f32 %v1557_v62, %v1700_v45 }
 0x6de   :  { %v494_v63 = vpop.permute.xlu1 %493 }
 0x6df   :  { %v496_v3 = vmul.f32 %v1557_v62, %v494_v63 }
 0x6e1   :  { %498 = vrot.lane.b32.xlu0 %v496_v3, %s1603_s24 }
 0x753   :  { %v499_v5 = vpop.permute.xlu0 %498 }
 0x754   :  { %v1722_v6 = vadd.f32 %v499_v5, %v491_v4 }
 0x756   :  { %1558 = vtanh.f32 %v1722_v6 }
 0x760   :  { %v1559_v7 = vpop.eup %1558 }
 0x761   :  { %504 = vrot.lane.b32.xlu1 %v1559_v7, %s1602_s23 }
 0x7d3   :  { %v505_v8 = vpop.permute.xlu1 %504 }
 0x7d4   :  { %v1726_v9 = vmul.f32 %v1557_v62, %v505_v8 }
 0x7d6   :  { %v566_v10 = vpack.c.bf16 %v1726_v9, %v1726_v9 }
 0x7d8   :  { %568 = vrot.lane.b32.xlu0 %v566_v10, %s1603_s24 }
 0x84a   :  { %v569_v11 = vpop.permute.xlu0 %568 }
 0x84b   :  { %1492 = vmatmul.mubr.msk.bf16.vlgmr.msra.gmra.mrb[4].mxu1 %vm165_vm2, %v569_v11 }
 0x84c   :  { %1504 = vmatpush3.bf16.msra.mxu1 %v1641_v1  ;;  %1507 = vmatprep.mubr.msk.bf16.mxu1 %vm1601_vm1, %v1600_v0 }
 0x84d   :  { %1505 = vmatprep.subr.bf16.mxu1 %v1600_v0 }
 0x850   :  { %1506 = vmatpush3.bf16.msra.mxu1 %v1656_v2 }
 0x851   :  { %1519 = vmatprep.subr.bf16.mxu1 %v1600_v0 }
 0x91e   :  { %v607_v14 = vpop.f32.mrb[4].mxu1 }
 0x91f   :  { %v613_v15 = vadd.f32 %v607_v14, %v565_v13  ;;  %v1493_v16 = vpop.f32.mrb[5].mxu1 }
 0x920   :  { %v610_v17 = vpop.f32.mrb[6].mxu1 }
 0x921   :  { %1560 = vtanh.f32 %v613_v15  ;;  %v1494_v18 = vpop.f32.mrb[7].mxu1  ;;  %v1406_v20 = vmul.f32 -1.442695, %v613_v15 }
 0x923   :  { %1562 = vpow2.f32 %v1406_v20 }
 0x92b   :  { %v1561_v19 = vpop.eup %1560 }
 0x92c   :  { %623 = vrot.lane.b32.xlu1 %v1561_v19, %s1602_s23 }
 0x92d   :  { %v1563_v21 = vpop.eup %1562 }
 0x92e   :  { %v617_v22 = vadd.f32 1.0, %v1563_v21  ;;  %v1425_v21 = vld [vmem:[%s2025_s1 + $0x6] sm:$0x1] }
 0x930   :  { %1564 = vrcp.f32 %v617_v22  ;;  %v954_v22 = vunpack.c.l.bf16 %v1425_v21 }
 0x93a   :  { %v1565_v24 = vpop.eup %1564 }
 0x93b   :  { %v621_v28 = vmul.f32 %v1565_v24, %v1722_v6 }
 0x99e   :  { %v624_v25 = vpop.permute.xlu1 %623 }
 0x99f   :  { %v626_v27 = vmul.f32 %v1565_v24, %v624_v25 }
 0x9a1   :  { %628 = vrot.lane.b32.xlu0 %v626_v27, %s1603_s24 }
 0xa13   :  { %v629_v29 = vpop.permute.xlu0 %628 }
 0xa14   :  { %v1744_v30 = vadd.f32 %v629_v29, %v621_v28 }
 0xa16   :  { %1566 = vtanh.f32 %v1744_v30 }
 0xa20   :  { %v1567_v31 = vpop.eup %1566 }
 0xa21   :  { %634 = vrot.lane.b32.xlu1 %v1567_v31, %s1602_s23 }
 0xa93   :  { %v635_v32 = vpop.permute.xlu1 %634 }
 0xa94   :  { %v1748_v33 = vmul.f32 %v1565_v24, %v635_v32 }
 0xa96   :  { %v696_v34 = vpack.c.bf16 %v1748_v33, %v1748_v33 }
 0xa98   :  { %698 = vrot.lane.b32.xlu0 %v696_v34, %s1603_s24 }
 0xb0a   :  { %v699_v35 = vpop.permute.xlu0 %698 }
 0xb0b   :  { %1500 = vmatmul.mubr.msk.bf16.vlgmr.msra.gmra.mrb[8].mxu0 %vm165_vm2, %v699_v35 }
 0xb0c   :  { %1512 = vmatpush3.bf16.msra.mxu0 %v1641_v1  ;;  %1515 = vmatprep.mubr.msk.bf16.mxu0 %vm1601_vm1, %v1600_v0 }
 0xb0d   :  { %1513 = vmatprep.subr.bf16.mxu0 %v1600_v0 }
 0xb10   :  { %1514 = vmatpush3.bf16.msra.mxu0 %v1656_v2 }
 0xbde   :  { %v737_v38 = vpop.f32.mrb[8].mxu0 }
 0xbdf   :  { %v743_v39 = vadd.f32 %v737_v38, %v695_v37  ;;  %v1501_v40 = vpop.f32.mrb[9].mxu0 }
 0xbe0   :  { %v740_v41 = vpop.f32.mrb[10].mxu0 }
 0xbe1   :  { %1568 = vtanh.f32 %v743_v39  ;;  %v1502_v42 = vpop.f32.mrb[11].mxu0  ;;  %v1413_v44 = vmul.f32 -1.442695, %v743_v39 }
 0xbe3   :  { %1570 = vpow2.f32 %v1413_v44 }
 0xbeb   :  { %v1569_v43 = vpop.eup %1568 }
 0xbec   :  { %753 = vrot.lane.b32.xlu1 %v1569_v43, %s1602_s23 }
 0xbed   :  { %v1571_v46 = vpop.eup %1570 }
 0xbee   :  { %v747_v47 = vadd.f32 1.0, %v1571_v46 }
 0xbf0   :  { %1572 = vrcp.f32 %v747_v47 }
 0xbfa   :  { %v1573_v49 = vpop.eup %1572 }
 0xbfb   :  { %v751_v52 = vmul.f32 %v1573_v49, %v1744_v30 }
 0xc5e   :  { %v754_v50 = vpop.permute.xlu1 %753 }
 0xc5f   :  { %v756_v51 = vmul.f32 %v1573_v49, %v754_v50 }
 0xc61   :  { %758 = vrot.lane.b32.xlu0 %v756_v51, %s1603_s24 }
 0xcd3   :  { %v759_v53 = vpop.permute.xlu0 %758 }
 0xcd4   :  { %v1765_v54 = vadd.f32 %v759_v53, %v751_v52 }
 0xcd6   :  { %1574 = vtanh.f32 %v1765_v54 }
 0xce0   :  { %v1575_v55 = vpop.eup %1574 }
 0xce1   :  { %764 = vrot.lane.b32.xlu1 %v1575_v55, %s1602_s23 }
 0xd53   :  { %v765_v56 = vpop.permute.xlu1 %764 }
 0xd54   :  { %v1769_v57 = vmul.f32 %v1573_v49, %v765_v56  ;;  %v1432_v49 = vld [vmem:[%s2025_s1 + $0x7] sm:$0x1] }
 0xd55   :  { %v1082_v50 = vunpack.c.l.bf16 %v1432_v49 }
 0xd56   :  { %v826_v58 = vpack.c.bf16 %v1769_v57, %v1769_v57 }
 0xd58   :  { %828 = vrot.lane.b32.xlu0 %v826_v58, %s1603_s24 }
 0xdca   :  { %v829_v59 = vpop.permute.xlu0 %828 }
 0xdcb   :  { %1508 = vmatmul.mubr.msk.bf16.vlgmr.msra.gmra.mrb[8].mxu1 %vm165_vm2, %v829_v59 }
 0xdcc   :  { %1520 = vmatpush3.bf16.msra.mxu1 %v1641_v1  ;;  %1523 = vmatprep.mubr.msk.bf16.mxu1 %vm1601_vm1, %v1600_v0 }
 0xdcd   :  { %1521 = vmatprep.subr.bf16.mxu1 %v1600_v0 }
 0xdd0   :  { %1522 = vmatpush3.bf16.msra.mxu1 %v1656_v2 }
 0xe9e   :  { %v867_v62 = vpop.f32.mrb[8].mxu1 }
 0xe9f   :  { %v873_v63 = vadd.f32 %v867_v62, %v825_v61  ;;  %v1509_v3 = vpop.f32.mrb[9].mxu1  ;;  %v1819_v61 = vstv %s2026_s0  ;;  %s1606_s0 = smov 96  }
 0xea0   :  { %v870_v4 = vpop.f32.mrb[10].mxu1  ;;  %v1604_v3 = vmov 1966171168  }
 0xea1   :  { %1576 = vtanh.f32 %v873_v63  ;;  %v1510_v5 = vpop.f32.mrb[11].mxu1  ;;  %v1420_v1 = vmul.f32 -1.442695, %v873_v63  ;;  %v246_v63 = vsub.f32 %v1682_v26, %v1819_v61  ;;  %v253_v4 = vunpack.c.l.s4 %v1604_v3 }
 0xea2   :  { %v255_v5 = vlaneseq }
 0xea3   :  { %1578 = vpow2.f32 %v1420_v1  ;;  %vm247_vm3 = vcmp.gt.f32.partialorder %v246_v63, 0.0 }
 0xea4   :  { %v1389_v1 = vsel %vm247_vm3, 1.0, %v1600_v0 }
 0xeab   :  { %v1577_v7 = vpop.eup %1576 }
 0xeac   :  { %883 = vrot.lane.b32.xlu1 %v1577_v7, %s1602_s23  ;;  %v254_v7 = vunpack.c.0.s8 %v253_v4 }
 0xead   :  { %v1579_v8 = vpop.eup %1578 }
 0xeae   :  { %v877_v10 = vadd.f32 1.0, %v1579_v8  ;;  %v256_v8 = vshrl.u32 %v255_v5, 7 }
 0xeb0   :  { %1580 = vrcp.f32 %v877_v10  ;;  %v250_v10 = vpack.c.bf16 %v1389_v1, %v1389_v1 }
 0xeba   :  { %v1581_v2 = vpop.eup %1580 }
 0xebb   :  { %v881_v13 = vmul.f32 %v1581_v2, %v1765_v54 }
 0xf1e   :  { %v884_v11 = vpop.permute.xlu1 %883 }
 0xf1f   :  { %v886_v12 = vmul.f32 %v1581_v2, %v884_v11  ;;  %v508_v11 = vsub.f32 %v1726_v9, %v1819_v61 }
 0xf21   :  { %888 = vrot.lane.b32.xlu0 %v886_v12, %s1603_s24  ;;  %v1605_v12 = vmov 1983009808   ;;  %vm509_vm4 = vcmp.gt.f32.partialorder %v508_v11, 0.0 }
 0xf93   :  { %v889_v14 = vpop.permute.xlu0 %888 }
 0xf94   :  { %v1786_v15 = vadd.f32 %v889_v14, %v881_v13  ;;  %v274_v13 = vunpack.c.l.s4 %v1605_v12 }
 0xf96   :  { %1582 = vtanh.f32 %v1786_v15 }
 0xfa0   :  { %v1583_v16 = vpop.eup %1582 }
 0xfa1   :  { %894 = vrot.lane.b32.xlu1 %v1583_v16, %s1602_s23 }
0x1013   :  { %v895_v17 = vpop.permute.xlu1 %894 }
0x1014   :  { %v1790_v18 = vmul.f32 %v1581_v2, %v895_v17  ;;  %v1824_v2 = vsub.s32 %v254_v7, %v256_v8 }
0x1016   :  { %v955_v19 = vpack.c.bf16 %v1790_v18, %v1790_v18  ;;  %v898_v1 = vsub.f32 %v1790_v18, %v1819_v61 }
0x1018   :  { %957 = vrot.lane.b32.xlu0 %v955_v19, %s1603_s24  ;;  %v258_v19 = vrot.slane %v250_v10, %v1824_v2  ;;  %vm899_vm10 = vcmp.gt.f32.partialorder %v898_v1, 0.0 }
0x101a   :  { %v265_v21 = vrot.slane %v258_v19, %v1824_v2 }
0x108a   :  { %v958_v20 = vpop.permute.xlu0 %957 }
0x108b   :  { %1516 = vmatmul.mubr.msk.bf16.vlgmr.msra.gmra.mrb[12].mxu0 %vm165_vm2, %v958_v20  ;;  %v275_v20 = vunpack.c.0.s8 %v274_v13  ;;  %v1421_v13 = vsel %vm899_vm10, 1.0, %v1600_v0 }
0x115e   :  { %v996_v24 = vpop.f32.mrb[12].mxu0 }
0x115f   :  { %v1002_v25 = vadd.f32 %v996_v24, %v954_v22  ;;  %v1517_v27 = vpop.f32.mrb[13].mxu0  ;;  %v1400_v22 = vsel %vm509_vm4, 1.0, %v1600_v0  ;;  %v1836_v24 = vsub.s32 %v275_v20, %v256_v8 }
0x1160   :  { %v999_v28 = vpop.f32.mrb[14].mxu0 }
0x1161   :  { %1584 = vtanh.f32 %v1002_v25  ;;  %v1518_v29 = vpop.f32.mrb[15].mxu0  ;;  %v1427_v32 = vmul.f32 -1.442695, %v1002_v25  ;;  %v512_v25 = vpack.c.bf16 %v1400_v22, %v1400_v22  ;;  %v294_v27 = vrot.slane %v1682_v26, %v1836_v24 }
0x1162   :  { %v768_v28 = vsub.f32 %v1769_v57, %v1819_v61  ;;  %v410_v29 = vrot.slane %v1700_v45, %v1836_v24  ;;  %v670_v45 = vrot.slane %v1744_v30, %v1836_v24  ;;  %v930_v30 = vrot.slane %v1786_v15, %v1836_v24 }
0x1163   :  { %1586 = vpow2.f32 %v1427_v32  ;;  %v424_v7 = vrot.slane %v1704_v48, %v1836_v24  ;;  %v540_v10 = vrot.slane %v1722_v6, %v1836_v24  ;;  %v902_v6 = vpack.c.bf16 %v1421_v13, %v1421_v13 }
0x1164   :  { %vm769_vm5 = vcmp.gt.f32.partialorder %v768_v28, 0.0  ;;  %v800_v20 = vrot.slane %v1765_v54, %v1836_v24  ;;  %v944_v54 = vrot.slane %v1790_v18, %v1836_v24 }
0x116b   :  { %v1585_v31 = vpop.eup %1584 }
0x116c   :  { %1012 = vrot.lane.b32.xlu1 %v1585_v31, %s1602_s23  ;;  %v520_v31 = vrot.slane %v512_v25, %v1824_v2 }
0x116d   :  { %v1587_v34 = vpop.eup %1586 }
0x116e   :  { %v1006_v35 = vadd.f32 1.0, %v1587_v34  ;;  %v527_v32 = vrot.slane %v520_v31, %v1824_v2  ;;  %v1414_v34 = vsel %vm769_vm5, 1.0, %v1600_v0 }
0x116f   :  { %v772_v26 = vpack.c.bf16 %v1414_v34, %v1414_v34 }
0x1170   :  { %1588 = vrcp.f32 %v1006_v35  ;;  %v554_v35 = vrot.slane %v1726_v9, %v1836_v24 }
0x117a   :  { %v1589_v36 = vpop.eup %1588 }
0x117b   :  { %v1010_v39 = vmul.f32 %v1589_v36, %v1786_v15  ;;  %v378_v15 = vsub.f32 %v1704_v48, %v1819_v61 }
0x117d   :  { %vm379_vm8 = vcmp.gt.f32.partialorder %v378_v15, 0.0 }
0x11de   :  { %v1013_v37 = vpop.permute.xlu1 %1012 }
0x11df   :  { %v1015_v38 = vmul.f32 %v1589_v36, %v1013_v37  ;;  %v780_v37 = vrot.slane %v772_v26, %v1824_v2 }
0x11e1   :  { %1017 = vrot.lane.b32.xlu0 %v1015_v38, %s1603_s24  ;;  %v787_v38 = vrot.slane %v780_v37, %v1824_v2 }
0x1253   :  { %v1018_v40 = vpop.permute.xlu0 %1017 }
0x1254   :  { %v1802_v41 = vadd.f32 %v1018_v40, %v1010_v39  ;;  %v814_v40 = vrot.slane %v1769_v57, %v1836_v24 }
0x1256   :  { %1590 = vtanh.f32 %v1802_v41  ;;  %v1059_v25 = vrot.slane %v1802_v41, %v1836_v24 }
0x1260   :  { %v1591_v42 = vpop.eup %1590 }
0x1261   :  { %1023 = vrot.lane.b32.xlu1 %v1591_v42, %s1602_s23 }
0x12d3   :  { %v1024_v43 = vpop.permute.xlu1 %1023 }
0x12d4   :  { %v1806_v44 = vmul.f32 %v1589_v36, %v1024_v43 }
0x12d6   :  { %v1083_v46 = vpack.c.bf16 %v1806_v44, %v1806_v44  ;;  %v1027_v36 = vsub.f32 %v1806_v44, %v1819_v61 }
0x12d8   :  { %1085 = vrot.lane.b32.xlu0 %v1083_v46, %s1603_s24  ;;  %vm1028_vm6 = vcmp.gt.f32.partialorder %v1027_v36, 0.0  ;;  %v1073_v46 = vrot.slane %v1806_v44, %v1836_v24 }
0x12d9   :  { %v1428_v39 = vsel %vm1028_vm6, 1.0, %v1600_v0 }
0x12da   :  { %v1031_v9 = vpack.c.bf16 %v1428_v39, %v1428_v39 }
0x12dc   :  { %v1039_v42 = vrot.slane %v1031_v9, %v1824_v2 }
0x12de   :  { %v1046_v43 = vrot.slane %v1039_v42, %v1824_v2 }
0x134a   :  { %v1086_v47 = vpop.permute.xlu0 %1085 }
0x134b   :  { %1524 = vmatmul.mubr.msk.bf16.vlgmr.msra.gmra.mrb[12].mxu1 %vm165_vm2, %v1086_v47 }
0x141e   :  { %v1124_v51 = vpop.f32.mrb[12].mxu1 }
0x141f   :  { %v1130_v52 = vadd.f32 %v1124_v51, %v1082_v50  ;;  %v1525_v53 = vpop.f32.mrb[13].mxu1 }
0x1420   :  { %v1127_v55 = vpop.f32.mrb[14].mxu1 }
0x1421   :  { %1592 = vtanh.f32 %v1130_v52  ;;  %v1526_v56 = vpop.f32.mrb[15].mxu1  ;;  %v1434_v59 = vmul.f32 -1.442695, %v1130_v52  ;;  %v1393_v52 = vsel %vm379_vm8, 1.0, %v1600_v0 }
0x1422   :  { %v382_v53 = vpack.c.bf16 %v1393_v52, %v1393_v52 }
0x1423   :  { %1594 = vpow2.f32 %v1434_v59 }
0x142b   :  { %v1593_v58 = vpop.eup %1592 }
0x142c   :  { %1140 = vrot.lane.b32.xlu1 %v1593_v58, %s1602_s23  ;;  %v638_v58 = vsub.f32 %v1748_v33, %v1819_v61 }
0x142d   :  { %v1595_v60 = vpop.eup %1594 }
0x142e   :  { %v1134_v62 = vadd.f32 1.0, %v1595_v60  ;;  %v279_v60 = vrot.slane %v1678_v23, %v1836_v24  ;;  %vm639_vm9 = vcmp.gt.f32.partialorder %v638_v58, 0.0 }
0x142f   :  { %v1407_v4 = vsel %vm639_vm9, 1.0, %v1600_v0 }
0x1430   :  { %1596 = vrcp.f32 %v1134_v62  ;;  %v390_v62 = vrot.slane %v382_v53, %v1824_v2  ;;  %v642_v23 = vpack.c.bf16 %v1407_v4, %v1407_v4 }
0x1432   :  { %v397_v3 = vrot.slane %v390_v62, %v1824_v2  ;;  %v650_v11 = vrot.slane %v642_v23, %v1824_v2 }
0x1434   :  { %v657_v12 = vrot.slane %v650_v11, %v1824_v2 }
0x143a   :  { %v1828_v14 = vpop.eup %1596 }
0x143b   :  { %v1138_v57 = vmul.f32 %v1828_v14, %v1802_v41 }
0x149e   :  { %v1141_v16 = vpop.permute.xlu1 %1140 }
0x149f   :  { %v1143_v17 = vmul.f32 %v1828_v14, %v1141_v16 }
0x14a1   :  { %1145 = vrot.lane.b32.xlu0 %v1143_v17, %s1603_s24  ;;  %v684_v17 = vrot.slane %v1748_v33, %v1836_v24 }
0x14a5   :  { %266 = vrot.lane.b32.xlu0 %v265_v21, %s1603_s24  ;;  %v910_v21 = vrot.slane %v902_v6, %v1824_v2 }
0x14a7   :  { %v917_v22 = vrot.slane %v910_v21, %v1824_v2 }
0x14a9   :  { %295 = vrot.lane.b32.xlu0 %v294_v27, %s1603_s24 }
0x14ad   :  { %411 = vrot.lane.b32.xlu0 %v410_v29, %s1606_s0 }
0x14b1   :  { %528 = vrot.lane.b32.xlu0 %v527_v32, %s1603_s24 }
0x14b5   :  { %555 = vrot.lane.b32.xlu0 %v554_v35, %s1603_s24 }
0x14b9   :  { %671 = vrot.lane.b32.xlu0 %v670_v45, %s1606_s0 }
0x14bd   :  { %788 = vrot.lane.b32.xlu0 %v787_v38, %s1603_s24 }
0x14c1   :  { %815 = vrot.lane.b32.xlu0 %v814_v40, %s1603_s24 }
0x14c5   :  { %931 = vrot.lane.b32.xlu0 %v930_v30, %s1606_s0 }
0x14c9   :  { %1047 = vrot.lane.b32.xlu0 %v1046_v43, %s1603_s24 }
0x14cd   :  { %1074 = vrot.lane.b32.xlu0 %v1073_v46, %s1603_s24 }
0x1513   :  { %v1146_v47 = vpop.permute.xlu0 %1145 }
0x1514   :  { %v1148_v49 = vadd.f32 %v1146_v47, %v1138_v57 }
0x1516   :  { %1598 = vtanh.f32 %v1148_v49  ;;  %v1187_v50 = vrot.slane %v1148_v49, %v1836_v24 }
0x1517   :  { %v267_v51 = vpop.permute.xlu0 %266 }
0x1518   :  { %271 = vst.msk [vmem:[%s2027_s3] sm:$0x1] %vm270_vm7, %v267_v51  ;;  %1188 = vrot.lane.b32.xlu0 %v1187_v50, %s1606_s0 }
0x151b   :  { %v296_v44 = vpop.permute.xlu0 %295 }
0x151c   :  { %299 = vst.msk [vmem:[%s2028_s5] sm:$0x3] %vm138_vm0, %v296_v44 }
0x151f   :  { %v412_v55 = vpop.permute.xlu0 %411 }
0x1520   :  { %v1599_v56 = vpop.eup %1598  ;;  %1395 = vst.msk [vmem:[%s2029_s4 + $0x2] sm:$0x3] %vm138_vm0, %v412_v55 }
0x1521   :  { %1151 = vrot.lane.b32.xlu1 %v1599_v56, %s1602_s23 }
0x1523   :  { %v529_v59 = vpop.permute.xlu0 %528 }
0x1524   :  { %1401 = vst.msk [vmem:[%s2027_s3 + $0x2] sm:$0x1] %vm270_vm7, %v529_v59 }
0x1525   :  { %280 = vrot.lane.b32.xlu1 %v279_v60, %s1606_s0 }
0x1527   :  { %v556_v63 = vpop.permute.xlu0 %555 }
0x1528   :  { %1403 = vst.msk [vmem:[%s2028_s5 + $0x4] sm:$0x3] %vm138_vm0, %v556_v63 }
0x1529   :  { %398 = vrot.lane.b32.xlu1 %v397_v3, %s1603_s24 }
0x152b   :  { %v672_v5 = vpop.permute.xlu0 %671 }
0x152c   :  { %1409 = vst.msk [vmem:[%s2029_s4 + $0x6] sm:$0x3] %vm138_vm0, %v672_v5 }
0x152d   :  { %425 = vrot.lane.b32.xlu1 %v424_v7, %s1603_s24 }
0x152f   :  { %v789_v8 = vpop.permute.xlu0 %788 }
0x1530   :  { %1415 = vst.msk [vmem:[%s2027_s3 + $0x4] sm:$0x1] %vm270_vm7, %v789_v8 }
0x1531   :  { %541 = vrot.lane.b32.xlu1 %v540_v10, %s1606_s0 }
0x1533   :  { %v816_v48 = vpop.permute.xlu0 %815 }
0x1534   :  { %1417 = vst.msk [vmem:[%s2028_s5 + $0x8] sm:$0x3] %vm138_vm0, %v816_v48 }
0x1535   :  { %658 = vrot.lane.b32.xlu1 %v657_v12, %s1603_s24 }
0x1537   :  { %v932_v16 = vpop.permute.xlu0 %931 }
0x1538   :  { %1423 = vst.msk [vmem:[%s2029_s4 + $0xa] sm:$0x3] %vm138_vm0, %v932_v16 }
0x1539   :  { %685 = vrot.lane.b32.xlu1 %v684_v17, %s1603_s24 }
0x153b   :  { %v1048_v19 = vpop.permute.xlu0 %1047 }
0x153c   :  { %1429 = vst.msk [vmem:[%s2027_s3 + $0x6] sm:$0x1] %vm270_vm7, %v1048_v19 }
0x153d   :  { %801 = vrot.lane.b32.xlu1 %v800_v20, %s1606_s0 }
0x153f   :  { %v1075_v33 = vpop.permute.xlu0 %1074 }
0x1540   :  { %1431 = vst.msk [vmem:[%s2028_s5 + $0xc] sm:$0x3] %vm138_vm0, %v1075_v33 }
0x1541   :  { %918 = vrot.lane.b32.xlu1 %v917_v22, %s1603_s24 }
0x1545   :  { %945 = vrot.lane.b32.xlu1 %v944_v54, %s1603_s24 }
0x1549   :  { %1060 = vrot.lane.b32.xlu1 %v1059_v25, %s1606_s0 }
0x158a   :  { %v1189_v27 = vpop.permute.xlu0 %1188 }
0x158b   :  { %1437 = vst.msk [vmem:[%s2029_s4 + $0xe] sm:$0x3] %vm138_vm0, %v1189_v27  ;;  %1207 = vst.msk [vmem:[#allocation2] sm:$0x3] %vm138_vm0, %v1189_v27 }
0x1593   :  { %v1152_v28 = vpop.permute.xlu1 %1151 }
0x1594   :  { %v1154_v29 = vmul.f32 %v1828_v14, %v1152_v28 }
0x1596   :  { %v1155_v18 = vsub.f32 %v1154_v29, %v1819_v61 }
0x1597   :  { %v281_v31 = vpop.permute.xlu1 %280 }
0x1598   :  { %vm1156_vm11 = vcmp.gt.f32.partialorder %v1155_v18, 0.0  ;;  %286 = vst.msk [vmem:[%s2029_s4] sm:$0x3] %vm138_vm0, %v281_v31 }
0x1599   :  { %v1435_v41 = vsel %vm1156_vm11, 1.0, %v1600_v0  ;;  %v1201_v0 = vrot.slane %v1154_v29, %v1836_v24 }
0x159a   :  { %v1159_v32 = vpack.c.bf16 %v1435_v41, %v1435_v41 }
0x159b   :  { %v399_v34 = vpop.permute.xlu1 %398 }
0x159c   :  { %1394 = vst.msk [vmem:[%s2027_s3 + $0x1] sm:$0x1] %vm270_vm7, %v399_v34  ;;  %v1167_v14 = vrot.slane %v1159_v32, %v1824_v2 }
0x159e   :  { %v1174_v61 = vrot.slane %v1167_v14, %v1824_v2 }
0x159f   :  { %v426_v26 = vpop.permute.xlu1 %425 }
0x15a0   :  { %1396 = vst.msk [vmem:[%s2028_s5 + $0x2] sm:$0x3] %vm138_vm0, %v426_v26  ;;  %1175 = vrot.lane.b32.xlu1 %v1174_v61, %s1603_s24 }
0x15a3   :  { %v542_v35 = vpop.permute.xlu1 %541 }
0x15a4   :  { %1402 = vst.msk [vmem:[%s2029_s4 + $0x4] sm:$0x3] %vm138_vm0, %v542_v35  ;;  %1202 = vrot.lane.b32.xlu1 %v1201_v0, %s1603_s24 }
0x15a7   :  { %v659_v36 = vpop.permute.xlu1 %658 }
0x15a8   :  { %1408 = vst.msk [vmem:[%s2027_s3 + $0x3] sm:$0x1] %vm270_vm7, %v659_v36 }
0x15ab   :  { %v686_v2 = vpop.permute.xlu1 %685 }
0x15ac   :  { %1410 = vst.msk [vmem:[%s2028_s5 + $0x6] sm:$0x3] %vm138_vm0, %v686_v2 }
0x15af   :  { %v802_v24 = vpop.permute.xlu1 %801 }
0x15b0   :  { %1416 = vst.msk [vmem:[%s2029_s4 + $0x8] sm:$0x3] %vm138_vm0, %v802_v24 }
0x15b3   :  { %v919_v45 = vpop.permute.xlu1 %918 }
0x15b4   :  { %1422 = vst.msk [vmem:[%s2027_s3 + $0x5] sm:$0x1] %vm270_vm7, %v919_v45 }
0x15b7   :  { %v946_v37 = vpop.permute.xlu1 %945 }
0x15b8   :  { %1424 = vst.msk [vmem:[%s2028_s5 + $0xa] sm:$0x3] %vm138_vm0, %v946_v37 }
0x15bb   :  { %v1061_v38 = vpop.permute.xlu1 %1060 }
0x15bc   :  { %1430 = vst.msk [vmem:[%s2029_s4 + $0xc] sm:$0x3] %vm138_vm0, %v1061_v38 }
0x1612   :  { %v1176_v39 = vpop.permute.xlu1 %1175 }
0x1613   :  { %1436 = vst.msk [vmem:[%s2027_s3 + $0x7] sm:$0x1] %vm270_vm7, %v1176_v39 }
0x1616   :  { %v1203_v9 = vpop.permute.xlu1 %1202 }
0x1617   :  { %1438 = vst.msk [vmem:[%s2028_s5 + $0xe] sm:$0x3] %vm138_vm0, %v1203_v9  ;;  %1208 = vst.msk [vmem:[#allocation3] sm:$0x3] %vm138_vm0, %v1203_v9 }

// kernel: spiking_encoder_forward.11
= control target key start
LH: loop header
LB: loop body
LE: loop exit
PB: predicated region body
PF: predicated region fallthrough
CT: control target
= control target key end

     0   :  { %v1600_v1 = vmov 0.0   ;;  %vm1601_vm0 = vmmov 0   ;;  %vm121_vm1 = vcmask 254976   ;;  %s2007_s0 = inlined_call_operand.<no memory space> [shape: f32[1], index: 0, kind: input, shape index: {}]   ;;  %s2008_s1 = inlined_call_operand.vmem [shape: bf16[8,2,128], index: 1, kind: input, shape index: {}]   ;;  %s2009_s2 = inlined_call_operand.vmem [shape: bf16[1,32,128], index: 2, kind: input, shape index: {}]   ;;  %s2010_s3 = inlined_call_operand.hbm [shape: bf16[1,8,2,32], index: 3, kind: output, shape index: {0}]   ;;  %s2011_s4 = inlined_call_operand.vmem [shape: f32[1,8,2,32], index: 4, kind: output, shape index: {1}]   ;;  %s2012_s5 = inlined_call_operand.vmem [shape: f32[1,8,2,32], index: 5, kind: output, shape index: {2}]  }
   0x1   :  { %v1643_v0 = vld [vmem:[%s2009_s2] sm:$0xff]   ;;  %1436 = vmatprep.subr.bf16.mxu0 %v1600_v1  ;;  %1444 = vmatprep.subr.bf16.mxu1 %v1600_v1  ;;  %v1651_v2 = vld [vmem:[%s2009_s2 + $0x8] sm:$0xff]  }
   0x2   :  { %1437 = vmatpush3.bf16.msra.mxu0 %v1643_v0  ;;  %1440 = vmatprep.mubr.msk.bf16.mxu0 %vm1601_vm0, %v1600_v1 }
   0x3   :  { %12 = vsyncpa [#allocation6], 0  ;;  %1438 = vmatprep.subr.bf16.mxu0 %v1600_v1  ;;  %123 = vst.msk [vmem:[#allocation3] sm:$0x3] %vm121_vm1, %v1600_v1  ;;  %1445 = vmatpush3.bf16.msra.mxu1 %v1643_v0  ;;  %vm148_vm2 = vcmask 261120   ;;  %s1602_s23 = smov 64  }
   0x4   :  { %122 = vst.msk [vmem:[#allocation2] sm:$0x3] %vm121_vm1, %v1600_v1  ;;  %1446 = vmatprep.subr.bf16.mxu1 %v1600_v1  ;;  %1448 = vmatprep.mubr.msk.bf16.mxu1 %vm1601_vm0, %v1600_v1  ;;  %v133_v5 = vld [vmem:[%s2008_s1] sm:$0x1]  ;;  %s1603_s24 = smov 32   ;;  %vm253_vm8 = vcmask 253952  }
   0x5   :  { %v134_v6 = vunpack.c.l.bf16 %v133_v5  ;;  %v1370_v29 = vld [vmem:[%s2008_s1 + $0x1] sm:$0x1]  ;;  %v1376_v51 = vld [vmem:[%s2008_s1 + $0x2] sm:$0x1]  ;;  %s1607_s16 = smov [#allocation5]  }
   0x6   :  { %1439 = vmatpush3.bf16.msra.mxu0 %v1651_v2  ;;  %v288_v30 = vunpack.c.l.bf16 %v1370_v29  ;;  %v418_v52 = vunpack.c.l.bf16 %v1376_v51  ;;  %s1225_s17 = sshll.u32 %s1607_s16, 4  ;;  %s1226_s17 = int_to_ptr.vmem [resolvable:$true] %s1225_s17 }
   0x7   :  { %1447 = vmatpush3.bf16.msra.mxu1 %v1651_v2  ;;  %1452 = vmatprep.subr.bf16.mxu0 %v1600_v1  ;;  %s1576_s18 = scalar_lea.vmem %s1226_s17, 128  ;;  %p1581_p1 = scmp.lt.s32.totalorder %s1226_s17, %s1226_s17 }
   0x8   :  { %1460 = vmatprep.subr.bf16.mxu1 %v1600_v1  ;;  %p1577_p0 = scmp.ne.s32.totalorder %s1226_s17, %s1576_s18  ;;  %p1582_p2 = scmp.lt.s32.totalorder %s1576_s18, %s1576_s18 }
   0xa   :  { %v130_v3 = vld [vmem:[#allocation3] sm:$0x3]  ;;  %p1583_p3 = por %p1582_p2, %p1581_p1 }
   0xb   :  { %v135_v4 = vpack.c.bf16 %v130_v3, %v130_v3  ;;  %v1368_v13 = vld.sshfl [vmem:[#allocation2] sm:$0x3 pattern:$0x76325410] }
   0xc   :  { %p1584_p4 = pnand %p1583_p3, %p1577_p0 }
   0xd   :  { %1441 = vmatmul.mubr.msk.bf16.vlgmr.msra.gmra.mrb[0].mxu0 %vm148_vm2, %v135_v4 }
   0xe   :  { %1453 = vmatpush3.bf16.msra.mxu0 %v1643_v0  ;;  %1456 = vmatprep.mubr.msk.bf16.mxu0 %vm1601_vm0, %v1600_v1 }
   0xf   :  { %1454 = vmatprep.subr.bf16.mxu0 %v1600_v1 }
  0x12   :  { %1455 = vmatpush3.bf16.msra.mxu0 %v1651_v2 }
  0x13   :  { %1468 = vmatprep.subr.bf16.mxu0 %v1600_v1 }
  0xe0   :  { %v186_v7 = vpop.f32.mrb[0].mxu0 }
  0xe1   :  { %v192_v8 = vadd.f32 %v186_v7, %v134_v6  ;;  %v1442_v9 = vpop.f32.mrb[1].mxu0 }
  0xe2   :  { %v189_v10 = vpop.f32.mrb[2].mxu0 }
  0xe3   :  { %1512 = vtanh.f32 %v192_v8  ;;  %v1443_v11 = vpop.f32.mrb[3].mxu0  ;;  %v1367_v14 = vmul.f32 -1.442695, %v192_v8 }
  0xe5   :  { %1514 = vpow2.f32 %v1367_v14 }
  0xed   :  { %v1513_v12 = vpop.eup %1512 }
  0xee   :  { %213 = vrot.lane.b32.xlu0 %v1513_v12, %s1602_s23  ;;  %v1382_v12 = vld [vmem:[%s2008_s1 + $0x3] sm:$0x1] }
  0xef   :  { %v1515_v15 = vpop.eup %1514 }
  0xf0   :  { %v196_v16 = vadd.f32 1.0, %v1515_v15 }
  0xf2   :  { %208 = vrot.lane.b32.xlu0 %v1368_v13, %s1603_s24  ;;  %1516 = vrcp.f32 %v196_v16  ;;  %v548_v13 = vunpack.c.l.bf16 %v1382_v12 }
  0xfc   :  { %v1517_v17 = vpop.eup %1516 }
 0x160   :  { %v214_v18 = vpop.permute.xlu0 %213 }
 0x161   :  { %v216_v19 = vmul.f32 %v1517_v17, %v214_v18 }
 0x163   :  { %218 = vrot.lane.b32.xlu1 %v216_v19, %s1603_s24 }
 0x164   :  { %v209_v20 = vpop.permute.xlu0 %208 }
 0x165   :  { %v211_v21 = vmul.f32 %v1517_v17, %v209_v20 }
 0x1d5   :  { %v219_v22 = vpop.permute.xlu1 %218 }
 0x1d6   :  { %v1681_v23 = vadd.f32 %v219_v22, %v211_v21 }
 0x1d8   :  { %1518 = vtanh.f32 %v1681_v23 }
 0x1e2   :  { %v1519_v24 = vpop.eup %1518 }
 0x1e3   :  { %224 = vrot.lane.b32.xlu1 %v1519_v24, %s1602_s23 }
 0x255   :  { %v225_v25 = vpop.permute.xlu1 %224 }
 0x256   :  { %v1685_v26 = vmul.f32 %v1517_v17, %v225_v25 }
 0x258   :  { %v289_v27 = vpack.c.bf16 %v1685_v26, %v1685_v26 }
 0x25a   :  { %291 = vrot.lane.b32.xlu0 %v289_v27, %s1603_s24 }
 0x2cc   :  { %v292_v28 = vpop.permute.xlu0 %291 }
 0x2cd   :  { %1449 = vmatmul.mubr.msk.bf16.vlgmr.msra.gmra.mrb[0].mxu1 %vm148_vm2, %v292_v28 }
 0x2ce   :  { %1461 = vmatpush3.bf16.msra.mxu1 %v1643_v0  ;;  %1464 = vmatprep.mubr.msk.bf16.mxu1 %vm1601_vm0, %v1600_v1 }
 0x2cf   :  { %1462 = vmatprep.subr.bf16.mxu1 %v1600_v1 }
 0x2d2   :  { %1463 = vmatpush3.bf16.msra.mxu1 %v1651_v2 }
 0x2d3   :  { %1476 = vmatprep.subr.bf16.mxu1 %v1600_v1 }
 0x3a0   :  { %v330_v31 = vpop.f32.mrb[0].mxu1 }
 0x3a1   :  { %v336_v32 = vadd.f32 %v330_v31, %v288_v30  ;;  %v1450_v33 = vpop.f32.mrb[1].mxu1 }
 0x3a2   :  { %v333_v34 = vpop.f32.mrb[2].mxu1 }
 0x3a3   :  { %1520 = vtanh.f32 %v336_v32  ;;  %v1451_v35 = vpop.f32.mrb[3].mxu1  ;;  %v1372_v37 = vmul.f32 -1.442695, %v336_v32 }
 0x3a5   :  { %1522 = vpow2.f32 %v1372_v37 }
 0x3ad   :  { %v1521_v36 = vpop.eup %1520 }
 0x3ae   :  { %346 = vrot.lane.b32.xlu1 %v1521_v36, %s1602_s23  ;;  %v1388_v36 = vld [vmem:[%s2008_s1 + $0x4] sm:$0x1] }
 0x3af   :  { %v1523_v38 = vpop.eup %1522  ;;  %v678_v37 = vunpack.c.l.bf16 %v1388_v36 }
 0x3b0   :  { %v340_v39 = vadd.f32 1.0, %v1523_v38 }
 0x3b2   :  { %1524 = vrcp.f32 %v340_v39 }
 0x3bc   :  { %v1525_v40 = vpop.eup %1524 }
 0x3bd   :  { %v344_v43 = vmul.f32 %v1525_v40, %v1681_v23 }
 0x420   :  { %v347_v41 = vpop.permute.xlu1 %346 }
 0x421   :  { %v349_v42 = vmul.f32 %v1525_v40, %v347_v41 }
 0x423   :  { %351 = vrot.lane.b32.xlu0 %v349_v42, %s1603_s24 }
 0x495   :  { %v352_v44 = vpop.permute.xlu0 %351 }
 0x496   :  { %v1703_v45 = vadd.f32 %v352_v44, %v344_v43 }
 0x498   :  { %1526 = vtanh.f32 %v1703_v45 }
 0x4a2   :  { %v1527_v46 = vpop.eup %1526 }
 0x4a3   :  { %357 = vrot.lane.b32.xlu1 %v1527_v46, %s1602_s23 }
 0x515   :  { %v358_v47 = vpop.permute.xlu1 %357 }
 0x516   :  { %v1707_v48 = vmul.f32 %v1525_v40, %v358_v47 }
 0x518   :  { %v419_v49 = vpack.c.bf16 %v1707_v48, %v1707_v48 }
 0x51a   :  { %421 = vrot.lane.b32.xlu0 %v419_v49, %s1603_s24 }
 0x58c   :  { %v422_v50 = vpop.permute.xlu0 %421 }
 0x58d   :  { %1457 = vmatmul.mubr.msk.bf16.vlgmr.msra.gmra.mrb[4].mxu0 %vm148_vm2, %v422_v50 }
 0x58e   :  { %1469 = vmatpush3.bf16.msra.mxu0 %v1643_v0  ;;  %1472 = vmatprep.mubr.msk.bf16.mxu0 %vm1601_vm0, %v1600_v1 }
 0x58f   :  { %1470 = vmatprep.subr.bf16.mxu0 %v1600_v1 }
 0x592   :  { %1471 = vmatpush3.bf16.msra.mxu0 %v1651_v2 }
 0x593   :  { %1484 = vmatprep.subr.bf16.mxu0 %v1600_v1 }
 0x660   :  { %v460_v53 = vpop.f32.mrb[4].mxu0 }
 0x661   :  { %v466_v54 = vadd.f32 %v460_v53, %v418_v52  ;;  %v1458_v55 = vpop.f32.mrb[5].mxu0 }
 0x662   :  { %v463_v56 = vpop.f32.mrb[6].mxu0 }
 0x663   :  { %1528 = vtanh.f32 %v466_v54  ;;  %v1459_v57 = vpop.f32.mrb[7].mxu0  ;;  %v1378_v59 = vmul.f32 -1.442695, %v466_v54 }
 0x665   :  { %1530 = vpow2.f32 %v1378_v59 }
 0x66d   :  { %v1529_v58 = vpop.eup %1528 }
 0x66e   :  { %476 = vrot.lane.b32.xlu1 %v1529_v58, %s1602_s23 }
 0x66f   :  { %v1531_v60 = vpop.eup %1530 }
 0x670   :  { %v470_v61 = vadd.f32 1.0, %v1531_v60  ;;  %v1394_v60 = vld [vmem:[%s2008_s1 + $0x5] sm:$0x1] }
 0x672   :  { %1532 = vrcp.f32 %v470_v61  ;;  %v808_v61 = vunpack.c.l.bf16 %v1394_v60 }
 0x67c   :  { %v1533_v62 = vpop.eup %1532 }
 0x67d   :  { %v474_v4 = vmul.f32 %v1533_v62, %v1703_v45 }
 0x6e0   :  { %v477_v63 = vpop.permute.xlu1 %476 }
 0x6e1   :  { %v479_v3 = vmul.f32 %v1533_v62, %v477_v63 }
 0x6e3   :  { %481 = vrot.lane.b32.xlu0 %v479_v3, %s1603_s24 }
 0x755   :  { %v482_v5 = vpop.permute.xlu0 %481 }
 0x756   :  { %v1725_v6 = vadd.f32 %v482_v5, %v474_v4 }
 0x758   :  { %1534 = vtanh.f32 %v1725_v6 }
 0x762   :  { %v1535_v7 = vpop.eup %1534 }
 0x763   :  { %487 = vrot.lane.b32.xlu1 %v1535_v7, %s1602_s23 }
 0x7d5   :  { %v488_v8 = vpop.permute.xlu1 %487 }
 0x7d6   :  { %v1729_v9 = vmul.f32 %v1533_v62, %v488_v8 }
 0x7d8   :  { %v549_v10 = vpack.c.bf16 %v1729_v9, %v1729_v9 }
 0x7da   :  { %551 = vrot.lane.b32.xlu0 %v549_v10, %s1603_s24 }
 0x84c   :  { %v552_v11 = vpop.permute.xlu0 %551 }
 0x84d   :  { %1465 = vmatmul.mubr.msk.bf16.vlgmr.msra.gmra.mrb[4].mxu1 %vm148_vm2, %v552_v11 }
 0x84e   :  { %1477 = vmatpush3.bf16.msra.mxu1 %v1643_v0  ;;  %1480 = vmatprep.mubr.msk.bf16.mxu1 %vm1601_vm0, %v1600_v1 }
 0x84f   :  { %1478 = vmatprep.subr.bf16.mxu1 %v1600_v1 }
 0x852   :  { %1479 = vmatpush3.bf16.msra.mxu1 %v1651_v2 }
 0x853   :  { %1492 = vmatprep.subr.bf16.mxu1 %v1600_v1 }
 0x920   :  { %v590_v14 = vpop.f32.mrb[4].mxu1 }
 0x921   :  { %v596_v15 = vadd.f32 %v590_v14, %v548_v13  ;;  %v1466_v16 = vpop.f32.mrb[5].mxu1 }
 0x922   :  { %v593_v17 = vpop.f32.mrb[6].mxu1 }
 0x923   :  { %1536 = vtanh.f32 %v596_v15  ;;  %v1467_v18 = vpop.f32.mrb[7].mxu1  ;;  %v1384_v20 = vmul.f32 -1.442695, %v596_v15 }
 0x925   :  { %1538 = vpow2.f32 %v1384_v20 }
 0x92d   :  { %v1537_v19 = vpop.eup %1536 }
 0x92e   :  { %606 = vrot.lane.b32.xlu1 %v1537_v19, %s1602_s23 }
 0x92f   :  { %v1539_v21 = vpop.eup %1538 }
 0x930   :  { %v600_v22 = vadd.f32 1.0, %v1539_v21  ;;  %v1400_v21 = vld [vmem:[%s2008_s1 + $0x6] sm:$0x1] }
 0x932   :  { %1540 = vrcp.f32 %v600_v22  ;;  %v937_v22 = vunpack.c.l.bf16 %v1400_v21 }
 0x93c   :  { %v1541_v24 = vpop.eup %1540 }
 0x93d   :  { %v604_v28 = vmul.f32 %v1541_v24, %v1725_v6 }
 0x9a0   :  { %v607_v25 = vpop.permute.xlu1 %606 }
 0x9a1   :  { %v609_v27 = vmul.f32 %v1541_v24, %v607_v25 }
 0x9a3   :  { %611 = vrot.lane.b32.xlu0 %v609_v27, %s1603_s24 }
 0xa15   :  { %v612_v29 = vpop.permute.xlu0 %611 }
 0xa16   :  { %v1747_v30 = vadd.f32 %v612_v29, %v604_v28 }
 0xa18   :  { %1542 = vtanh.f32 %v1747_v30 }
 0xa22   :  { %v1543_v31 = vpop.eup %1542 }
 0xa23   :  { %617 = vrot.lane.b32.xlu1 %v1543_v31, %s1602_s23 }
 0xa95   :  { %v618_v32 = vpop.permute.xlu1 %617 }
 0xa96   :  { %v1751_v33 = vmul.f32 %v1541_v24, %v618_v32 }
 0xa98   :  { %v679_v34 = vpack.c.bf16 %v1751_v33, %v1751_v33 }
 0xa9a   :  { %681 = vrot.lane.b32.xlu0 %v679_v34, %s1603_s24 }
 0xb0c   :  { %v682_v35 = vpop.permute.xlu0 %681 }
 0xb0d   :  { %1473 = vmatmul.mubr.msk.bf16.vlgmr.msra.gmra.mrb[8].mxu0 %vm148_vm2, %v682_v35 }
 0xb0e   :  { %1485 = vmatpush3.bf16.msra.mxu0 %v1643_v0  ;;  %1488 = vmatprep.mubr.msk.bf16.mxu0 %vm1601_vm0, %v1600_v1 }
 0xb0f   :  { %1486 = vmatprep.subr.bf16.mxu0 %v1600_v1 }
 0xb12   :  { %1487 = vmatpush3.bf16.msra.mxu0 %v1651_v2 }
 0xbe0   :  { %v720_v38 = vpop.f32.mrb[8].mxu0 }
 0xbe1   :  { %v726_v39 = vadd.f32 %v720_v38, %v678_v37  ;;  %v1474_v40 = vpop.f32.mrb[9].mxu0 }
 0xbe2   :  { %v723_v41 = vpop.f32.mrb[10].mxu0 }
 0xbe3   :  { %1544 = vtanh.f32 %v726_v39  ;;  %v1475_v42 = vpop.f32.mrb[11].mxu0  ;;  %v1390_v44 = vmul.f32 -1.442695, %v726_v39 }
 0xbe5   :  { %1546 = vpow2.f32 %v1390_v44 }
 0xbed   :  { %v1545_v43 = vpop.eup %1544 }
 0xbee   :  { %736 = vrot.lane.b32.xlu1 %v1545_v43, %s1602_s23 }
 0xbef   :  { %v1547_v46 = vpop.eup %1546 }
 0xbf0   :  { %v730_v47 = vadd.f32 1.0, %v1547_v46 }
 0xbf2   :  { %1548 = vrcp.f32 %v730_v47 }
 0xbfc   :  { %v1549_v49 = vpop.eup %1548 }
 0xbfd   :  { %v734_v52 = vmul.f32 %v1549_v49, %v1747_v30 }
 0xc60   :  { %v737_v50 = vpop.permute.xlu1 %736 }
 0xc61   :  { %v739_v51 = vmul.f32 %v1549_v49, %v737_v50 }
 0xc63   :  { %741 = vrot.lane.b32.xlu0 %v739_v51, %s1603_s24 }
 0xcd5   :  { %v742_v53 = vpop.permute.xlu0 %741 }
 0xcd6   :  { %v1768_v54 = vadd.f32 %v742_v53, %v734_v52 }
 0xcd8   :  { %1550 = vtanh.f32 %v1768_v54 }
 0xce2   :  { %v1551_v55 = vpop.eup %1550 }
 0xce3   :  { %747 = vrot.lane.b32.xlu1 %v1551_v55, %s1602_s23 }
 0xd55   :  { %v748_v56 = vpop.permute.xlu1 %747 }
 0xd56   :  { %v1772_v57 = vmul.f32 %v1549_v49, %v748_v56  ;;  %v1406_v49 = vld [vmem:[%s2008_s1 + $0x7] sm:$0x1] }
 0xd57   :  { %v1065_v50 = vunpack.c.l.bf16 %v1406_v49 }
 0xd58   :  { %v809_v58 = vpack.c.bf16 %v1772_v57, %v1772_v57 }
 0xd5a   :  { %811 = vrot.lane.b32.xlu0 %v809_v58, %s1603_s24 }
 0xdcc   :  { %v812_v59 = vpop.permute.xlu0 %811 }
 0xdcd   :  { %1481 = vmatmul.mubr.msk.bf16.vlgmr.msra.gmra.mrb[8].mxu1 %vm148_vm2, %v812_v59 }
 0xdce   :  { %1493 = vmatpush3.bf16.msra.mxu1 %v1643_v0  ;;  %1496 = vmatprep.mubr.msk.bf16.mxu1 %vm1601_vm0, %v1600_v1 }
 0xdcf   :  { %1494 = vmatprep.subr.bf16.mxu1 %v1600_v1 }
 0xdd2   :  { %1495 = vmatpush3.bf16.msra.mxu1 %v1651_v2 }
 0xea0   :  { %v850_v62 = vpop.f32.mrb[8].mxu1 }
 0xea1   :  { %v856_v63 = vadd.f32 %v850_v62, %v808_v61  ;;  %v1482_v3 = vpop.f32.mrb[9].mxu1  ;;  %v1822_v61 = vstv %s2007_s0  ;;  %s1606_s0 = smov 96  }
 0xea2   :  { %v853_v4 = vpop.f32.mrb[10].mxu1  ;;  %v1604_v3 = vmov 1966171168  }
 0xea3   :  { %1552 = vtanh.f32 %v856_v63  ;;  %v1483_v5 = vpop.f32.mrb[11].mxu1  ;;  %v1396_v0 = vmul.f32 -1.442695, %v856_v63  ;;  %v229_v63 = vsub.f32 %v1685_v26, %v1822_v61  ;;  %v236_v4 = vunpack.c.l.s4 %v1604_v3 }
 0xea4   :  { %v491_v5 = vsub.f32 %v1729_v9, %v1822_v61 }
 0xea5   :  { %1554 = vpow2.f32 %v1396_v0  ;;  %vm230_vm3 = vcmp.gt.f32.partialorder %v229_v63, 0.0  ;;  %v237_v0 = vunpack.c.0.s8 %v236_v4 }
 0xea6   :  { %vm492_vm4 = vcmp.gt.f32.partialorder %v491_v5, 0.0 }
 0xead   :  { %v1553_v7 = vpop.eup %1552 }
 0xeae   :  { %866 = vrot.lane.b32.xlu1 %v1553_v7, %s1602_s23  ;;  %v238_v7 = vlaneseq }
 0xeaf   :  { %v1555_v8 = vpop.eup %1554 }
 0xeb0   :  { %v860_v10 = vadd.f32 1.0, %v1555_v8  ;;  %v1369_v8 = vsel %vm230_vm3, 1.0, %v1600_v1 }
 0xeb2   :  { %1556 = vrcp.f32 %v860_v10  ;;  %v751_v10 = vsub.f32 %v1772_v57, %v1822_v61 }
 0xeb4   :  { %vm752_vm5 = vcmp.gt.f32.partialorder %v751_v10, 0.0 }
 0xebc   :  { %v1557_v2 = vpop.eup %1556 }
 0xebd   :  { %v864_v13 = vmul.f32 %v1557_v2, %v1768_v54 }
 0xf20   :  { %v867_v11 = vpop.permute.xlu1 %866 }
 0xf21   :  { %v869_v12 = vmul.f32 %v1557_v2, %v867_v11  ;;  %v233_v11 = vpack.c.bf16 %v1369_v8, %v1369_v8 }
 0xf23   :  { %871 = vrot.lane.b32.xlu0 %v869_v12, %s1603_s24 }
 0xf95   :  { %v872_v14 = vpop.permute.xlu0 %871 }
 0xf96   :  { %v1789_v15 = vadd.f32 %v872_v14, %v864_v13  ;;  %v1379_v13 = vsel %vm492_vm4, 1.0, %v1600_v1 }
 0xf98   :  { %1558 = vtanh.f32 %v1789_v15 }
 0xfa2   :  { %v1559_v16 = vpop.eup %1558 }
 0xfa3   :  { %877 = vrot.lane.b32.xlu1 %v1559_v16, %s1602_s23 }
0x1015   :  { %v878_v17 = vpop.permute.xlu1 %877 }
0x1016   :  { %v1793_v18 = vmul.f32 %v1557_v2, %v878_v17  ;;  %v239_v2 = vshrl.u32 %v238_v7, 7 }
0x1018   :  { %v938_v19 = vpack.c.bf16 %v1793_v18, %v1793_v18  ;;  %v1831_v12 = vsub.s32 %v237_v0, %v239_v2 }
0x101a   :  { %940 = vrot.lane.b32.xlu0 %v938_v19, %s1603_s24  ;;  %v495_v19 = vpack.c.bf16 %v1379_v13, %v1379_v13  ;;  %v241_v21 = vrot.slane %v233_v11, %v1831_v12 }
0x108c   :  { %v941_v20 = vpop.permute.xlu0 %940 }
0x108d   :  { %1489 = vmatmul.mubr.msk.bf16.vlgmr.msra.gmra.mrb[12].mxu0 %vm148_vm2, %v941_v20 }
0x1160   :  { %v979_v24 = vpop.f32.mrb[12].mxu0 }
0x1161   :  { %v985_v25 = vadd.f32 %v979_v24, %v937_v22  ;;  %v1490_v27 = vpop.f32.mrb[13].mxu0  ;;  %v1391_v22 = vsel %vm752_vm5, 1.0, %v1600_v1 }
0x1162   :  { %v982_v28 = vpop.f32.mrb[14].mxu0  ;;  %v755_v24 = vpack.c.bf16 %v1391_v22, %v1391_v22  ;;  %v503_v27 = vrot.slane %v495_v19, %v1831_v12 }
0x1163   :  { %1560 = vtanh.f32 %v985_v25  ;;  %v1491_v29 = vpop.f32.mrb[15].mxu0  ;;  %v1402_v32 = vmul.f32 -1.442695, %v985_v25  ;;  %v248_v25 = vrot.slane %v241_v21, %v1831_v12 }
0x1165   :  { %1562 = vpow2.f32 %v1402_v32  ;;  %v763_v32 = vrot.slane %v755_v24, %v1831_v12 }
0x116d   :  { %v1561_v31 = vpop.eup %1560 }
0x116e   :  { %995 = vrot.lane.b32.xlu1 %v1561_v31, %s1602_s23  ;;  %v510_v31 = vrot.slane %v503_v27, %v1831_v12 }
0x116f   :  { %v1563_v34 = vpop.eup %1562 }
0x1170   :  { %v989_v35 = vadd.f32 1.0, %v1563_v34  ;;  %v1605_v34 = vmov 1983009808  }
0x1172   :  { %1564 = vrcp.f32 %v989_v35  ;;  %v257_v35 = vunpack.c.l.s4 %v1605_v34 }
0x117c   :  { %v1565_v36 = vpop.eup %1564 }
0x117d   :  { %v993_v39 = vmul.f32 %v1565_v36, %v1789_v15 }
0x11e0   :  { %v996_v37 = vpop.permute.xlu1 %995 }
0x11e1   :  { %v998_v38 = vmul.f32 %v1565_v36, %v996_v37 }
0x11e3   :  { %1000 = vrot.lane.b32.xlu0 %v998_v38, %s1603_s24  ;;  %v258_v38 = vunpack.c.0.s8 %v257_v35 }
0x1255   :  { %v1001_v40 = vpop.permute.xlu0 %1000 }
0x1256   :  { %v1805_v41 = vadd.f32 %v1001_v40, %v993_v39  ;;  %v1853_v40 = vsub.s32 %v258_v38, %v239_v2 }
0x1258   :  { %1566 = vtanh.f32 %v1805_v41  ;;  %v783_v49 = vrot.slane %v1768_v54, %v1853_v40  ;;  %v621_v54 = vsub.f32 %v1751_v33, %v1822_v61 }
0x125a   :  { %vm622_vm9 = vcmp.gt.f32.partialorder %v621_v54, 0.0 }
0x1262   :  { %v1567_v42 = vpop.eup %1566 }
0x1263   :  { %1006 = vrot.lane.b32.xlu1 %v1567_v42, %s1602_s23  ;;  %v262_v42 = vrot.slane %v1681_v23, %v1853_v40  ;;  %v913_v23 = vrot.slane %v1789_v15, %v1853_v40 }
0x12d5   :  { %v1007_v43 = vpop.permute.xlu1 %1006 }
0x12d6   :  { %v1809_v44 = vmul.f32 %v1565_v36, %v1007_v43  ;;  %v770_v36 = vrot.slane %v763_v32, %v1831_v12  ;;  %v393_v43 = vrot.slane %v1703_v45, %v1853_v40  ;;  %v1042_v45 = vrot.slane %v1805_v41, %v1853_v40 }
0x12d8   :  { %v1066_v46 = vpack.c.bf16 %v1809_v44, %v1809_v44  ;;  %v1010_v14 = vsub.f32 %v1809_v44, %v1822_v61 }
0x12da   :  { %1068 = vrot.lane.b32.xlu0 %v1066_v46, %s1603_s24  ;;  %vm1011_vm6 = vcmp.gt.f32.partialorder %v1010_v14, 0.0  ;;  %v523_v46 = vrot.slane %v1725_v6, %v1853_v40  ;;  %v361_v6 = vsub.f32 %v1707_v48, %v1822_v61 }
0x12db   :  { %v1403_v28 = vsel %vm1011_vm6, 1.0, %v1600_v1 }
0x12dc   :  { %v1014_v29 = vpack.c.bf16 %v1403_v28, %v1403_v28  ;;  %vm362_vm7 = vcmp.gt.f32.partialorder %v361_v6, 0.0 }
0x12de   :  { %v1022_v37 = vrot.slane %v1014_v29, %v1831_v12 }
0x12e0   :  { %v1029_v39 = vrot.slane %v1022_v37, %v1831_v12 }
0x134c   :  { %v1069_v47 = vpop.permute.xlu0 %1068 }
0x134d   :  { %1497 = vmatmul.mubr.msk.bf16.vlgmr.msra.gmra.mrb[12].mxu1 %vm148_vm2, %v1069_v47  ;;  %v653_v47 = vrot.slane %v1747_v30, %v1853_v40 }
0x1420   :  { %v1107_v51 = vpop.f32.mrb[12].mxu1 }
0x1421   :  { %v1113_v52 = vadd.f32 %v1107_v51, %v1065_v50  ;;  %v1498_v53 = vpop.f32.mrb[13].mxu1 }
0x1422   :  { %v1110_v55 = vpop.f32.mrb[14].mxu1  ;;  %v1373_v53 = vsel %vm362_vm7, 1.0, %v1600_v1 }
0x1423   :  { %1568 = vtanh.f32 %v1113_v52  ;;  %v1499_v56 = vpop.f32.mrb[15].mxu1  ;;  %v1408_v59 = vmul.f32 -1.442695, %v1113_v52  ;;  %v365_v55 = vpack.c.bf16 %v1373_v53, %v1373_v53 }
0x1425   :  { %1570 = vpow2.f32 %v1408_v59 }
0x142d   :  { %v1569_v58 = vpop.eup %1568 }
0x142e   :  { %1123 = vrot.lane.b32.xlu1 %v1569_v58, %s1602_s23  ;;  %v1385_v58 = vsel %vm622_vm9, 1.0, %v1600_v1 }
0x142f   :  { %v1571_v60 = vpop.eup %1570  ;;  %v625_v59 = vpack.c.bf16 %v1385_v58, %v1385_v58 }
0x1430   :  { %v1117_v62 = vadd.f32 1.0, %v1571_v60 }
0x1431   :  { %v633_v0 = vrot.slane %v625_v59, %v1831_v12 }
0x1432   :  { %1572 = vrcp.f32 %v1117_v62  ;;  %v373_v62 = vrot.slane %v365_v55, %v1831_v12 }
0x1433   :  { %v640_v10 = vrot.slane %v633_v0, %v1831_v12 }
0x1434   :  { %v380_v7 = vrot.slane %v373_v62, %v1831_v12 }
0x143c   :  { %v1836_v16 = vpop.eup %1572 }
0x143d   :  { %v1121_v50 = vmul.f32 %v1836_v16, %v1805_v41  ;;  %v881_v41 = vsub.f32 %v1793_v18, %v1822_v61 }
0x143f   :  { %vm882_vm10 = vcmp.gt.f32.partialorder %v881_v41, 0.0 }
0x1440   :  { %v1397_v3 = vsel %vm882_vm10, 1.0, %v1600_v1 }
0x1441   :  { %v885_v4 = vpack.c.bf16 %v1397_v3, %v1397_v3 }
0x1443   :  { %v893_v2 = vrot.slane %v885_v4, %v1831_v12 }
0x1445   :  { %v900_v13 = vrot.slane %v893_v2, %v1831_v12 }
0x14a0   :  { %v1124_v17 = vpop.permute.xlu1 %1123 }
0x14a1   :  { %v1126_v20 = vmul.f32 %v1836_v16, %v1124_v17  ;;  %v277_v17 = vrot.slane %v1685_v26, %v1853_v40  ;;  %v537_v26 = vrot.slane %v1729_v9, %v1853_v40  ;;  %v797_v9 = vrot.slane %v1772_v57, %v1853_v40 }
0x14a3   :  { %1128 = vrot.lane.b32.xlu0 %v1126_v20, %s1603_s24  ;;  %v407_v20 = vrot.slane %v1707_v48, %v1853_v40  ;;  %v667_v48 = vrot.slane %v1751_v33, %v1853_v40  ;;  %v927_v33 = vrot.slane %v1793_v18, %v1853_v40 }
0x14a7   :  { %249 = vrot.lane.b32.xlu0 %v248_v25, %s1603_s24  ;;  %v1056_v25 = vrot.slane %v1809_v44, %v1853_v40 }
0x14ab   :  { %511 = vrot.lane.b32.xlu0 %v510_v31, %s1603_s24 }
0x14af   :  { %771 = vrot.lane.b32.xlu0 %v770_v36, %s1603_s24 }
0x14b3   :  { %1030 = vrot.lane.b32.xlu0 %v1029_v39, %s1603_s24 }
0x14b7   :  { %263 = vrot.lane.b32.xlu0 %v262_v42, %s1606_s0 }
0x14bb   :  { %394 = vrot.lane.b32.xlu0 %v393_v43, %s1606_s0 }
0x14bf   :  { %524 = vrot.lane.b32.xlu0 %v523_v46, %s1606_s0 }
0x14c3   :  { %654 = vrot.lane.b32.xlu0 %v653_v47, %s1606_s0 }
0x14c7   :  { %784 = vrot.lane.b32.xlu0 %v783_v49, %s1606_s0 }
0x14cb   :  { %914 = vrot.lane.b32.xlu0 %v913_v23, %s1606_s0 }
0x14cf   :  { %1043 = vrot.lane.b32.xlu0 %v1042_v45, %s1606_s0 }
0x1515   :  { %v1129_v30 = vpop.permute.xlu0 %1128 }
0x1516   :  { %v1131_v51 = vadd.f32 %v1129_v30, %v1121_v50 }
0x1518   :  { %1574 = vtanh.f32 %v1131_v51  ;;  %v1170_v15 = vrot.slane %v1131_v51, %v1853_v40 }
0x1519   :  { %v250_v52 = vpop.permute.xlu0 %249 }
0x151a   :  { %254 = vst.msk [vmem:[#allocation5] sm:$0x1] %vm253_vm8, %v250_v52  ;;  %1171 = vrot.lane.b32.xlu0 %v1170_v15, %s1606_s0 }
0x151d   :  { %v512_v56 = vpop.permute.xlu0 %511 }
0x151e   :  { %515 = vst.msk [vmem:[#allocation5 + $0x2] sm:$0x1] %vm253_vm8, %v512_v56 }
0x1521   :  { %v772_v60 = vpop.permute.xlu0 %771 }
0x1522   :  { %v1575_v63 = vpop.eup %1574  ;;  %775 = vst.msk [vmem:[#allocation5 + $0x4] sm:$0x1] %vm253_vm8, %v772_v60 }
0x1523   :  { %1134 = vrot.lane.b32.xlu1 %v1575_v63, %s1602_s23 }
0x1525   :  { %v1031_v5 = vpop.permute.xlu0 %1030 }
0x1526   :  { %1034 = vst.msk [vmem:[#allocation5 + $0x6] sm:$0x1] %vm253_vm8, %v1031_v5 }
0x1527   :  { %381 = vrot.lane.b32.xlu1 %v380_v7, %s1603_s24 }
0x1529   :  { %v264_v8 = vpop.permute.xlu0 %263 }
0x152a   :  { %269 = vst.msk [vmem:[%s2011_s4] sm:$0x3] %vm121_vm1, %v264_v8 }
0x152b   :  { %641 = vrot.lane.b32.xlu1 %v640_v10, %s1603_s24 }
0x152d   :  { %v395_v11 = vpop.permute.xlu0 %394 }
0x152e   :  { %1374 = vst.msk [vmem:[%s2011_s4 + $0x2] sm:$0x3] %vm121_vm1, %v395_v11 }
0x152f   :  { %901 = vrot.lane.b32.xlu1 %v900_v13, %s1603_s24 }
0x1531   :  { %v525_v14 = vpop.permute.xlu0 %524 }
0x1532   :  { %1380 = vst.msk [vmem:[%s2011_s4 + $0x4] sm:$0x3] %vm121_vm1, %v525_v14 }
0x1533   :  { %278 = vrot.lane.b32.xlu1 %v277_v17, %s1603_s24 }
0x1535   :  { %v655_v19 = vpop.permute.xlu0 %654 }
0x1536   :  { %1386 = vst.msk [vmem:[%s2011_s4 + $0x6] sm:$0x3] %vm121_vm1, %v655_v19 }
0x1537   :  { %408 = vrot.lane.b32.xlu1 %v407_v20, %s1603_s24 }
0x1539   :  { %v785_v21 = vpop.permute.xlu0 %784 }
0x153a   :  { %1392 = vst.msk [vmem:[%s2011_s4 + $0x8] sm:$0x3] %vm121_vm1, %v785_v21 }
0x153b   :  { %538 = vrot.lane.b32.xlu1 %v537_v26, %s1603_s24 }
0x153d   :  { %v915_v22 = vpop.permute.xlu0 %914 }
0x153e   :  { %1398 = vst.msk [vmem:[%s2011_s4 + $0xa] sm:$0x3] %vm121_vm1, %v915_v22 }
0x153f   :  { %668 = vrot.lane.b32.xlu1 %v667_v48, %s1603_s24 }
0x1541   :  { %v1044_v24 = vpop.permute.xlu0 %1043 }
0x1542   :  { %1404 = vst.msk [vmem:[%s2011_s4 + $0xc] sm:$0x3] %vm121_vm1, %v1044_v24 }
0x1543   :  { %798 = vrot.lane.b32.xlu1 %v797_v9, %s1603_s24 }
0x1547   :  { %928 = vrot.lane.b32.xlu1 %v927_v33, %s1603_s24 }
0x154b   :  { %1057 = vrot.lane.b32.xlu1 %v1056_v25, %s1603_s24 }
0x158c   :  { %v1172_v27 = vpop.permute.xlu0 %1171 }
0x158d   :  { %1410 = vst.msk [vmem:[%s2011_s4 + $0xe] sm:$0x3] %vm121_vm1, %v1172_v27  ;;  %1190 = vst.msk [vmem:[#allocation2] sm:$0x3] %vm121_vm1, %v1172_v27 }
0x1595   :  { %v1135_v57 = vpop.permute.xlu1 %1134 }
0x1596   :  { %v1137_v28 = vmul.f32 %v1836_v16, %v1135_v57 }
0x1598   :  { %v1138_v18 = vsub.f32 %v1137_v28, %v1822_v61  ;;  %v1184_v61 = vrot.slane %v1137_v28, %v1853_v40 }
0x1599   :  { %v382_v29 = vpop.permute.xlu1 %381 }
0x159a   :  { %vm1139_vm11 = vcmp.gt.f32.partialorder %v1138_v18, 0.0  ;;  %385 = vst.msk [vmem:[#allocation5 + $0x1] sm:$0x1] %vm253_vm8, %v382_v29 }
0x159b   :  { %v1409_v44 = vsel %vm1139_vm11, 1.0, %v1600_v1 }
0x159c   :  { %v1142_v31 = vpack.c.bf16 %v1409_v44, %v1409_v44 }
0x159d   :  { %v642_v32 = vpop.permute.xlu1 %641 }
0x159e   :  { %645 = vst.msk [vmem:[#allocation5 + $0x3] sm:$0x1] %vm253_vm8, %v642_v32  ;;  %v1150_v34 = vrot.slane %v1142_v31, %v1831_v12 }
0x15a0   :  { %v1157_v35 = vrot.slane %v1150_v34, %v1831_v12 }
0x15a1   :  { %v902_v36 = vpop.permute.xlu1 %901 }
0x15a2   :  { %905 = vst.msk [vmem:[#allocation5 + $0x5] sm:$0x1] %vm253_vm8, %v902_v36  ;;  %1158 = vrot.lane.b32.xlu1 %v1157_v35, %s1603_s24 }
0x15a5   :  { %v279_v16 = vpop.permute.xlu1 %278 }
0x15a6   :  { %282 = vst.msk [vmem:[%s2012_s5] sm:$0x3] %vm121_vm1, %v279_v16  ;;  %1185 = vrot.lane.b32.xlu1 %v1184_v61, %s1603_s24 }
0x15a9   :  { %v409_v1 = vpop.permute.xlu1 %408 }
0x15aa   :  { %1375 = vst.msk [vmem:[%s2012_s5 + $0x2] sm:$0x3] %vm121_vm1, %v409_v1 }
0x15ad   :  { %v539_v12 = vpop.permute.xlu1 %538 }
0x15ae   :  { %1381 = vst.msk [vmem:[%s2012_s5 + $0x4] sm:$0x3] %vm121_vm1, %v539_v12 }
0x15b1   :  { %v669_v37 = vpop.permute.xlu1 %668 }
0x15b2   :  { %1387 = vst.msk [vmem:[%s2012_s5 + $0x6] sm:$0x3] %vm121_vm1, %v669_v37 }
0x15b5   :  { %v799_v38 = vpop.permute.xlu1 %798 }
0x15b6   :  { %1393 = vst.msk [vmem:[%s2012_s5 + $0x8] sm:$0x3] %vm121_vm1, %v799_v38 }
0x15b9   :  { %v929_v39 = vpop.permute.xlu1 %928 }
0x15ba   :  { %1399 = vst.msk [vmem:[%s2012_s5 + $0xa] sm:$0x3] %vm121_vm1, %v929_v39 }
0x15bd   :  { %v1058_v40 = vpop.permute.xlu1 %1057 }
0x15be   :  { %1405 = vst.msk [vmem:[%s2012_s5 + $0xc] sm:$0x3] %vm121_vm1, %v1058_v40 }
0x1614   :  { %v1159_v42 = vpop.permute.xlu1 %1158 }
0x1615   :  { %1162 = vst.msk [vmem:[#allocation5 + $0x7] sm:$0x1] %vm253_vm8, %v1159_v42 }
0x1616   :  { %1587 = shalt.err (!%p1584_p4)
}
0x1617   :  { %s1588_s21 = scalar_lea.hbm %s2010_s3, 128 }
0x1618   :  { %p1589_p5 = scmp.ne.s32.totalorder %s2010_s3, %s1588_s21  ;;  %p1592_p6 = scmp.lt.u32.totalorder %s1588_s21, %s2010_s3 }
0x161a   :  { %p1594_p7 = pnand %p1592_p6, %p1589_p5 }
0x161c   :  { %1597 = shalt.err (!%p1594_p7)
}
0x161d   :  { %s1608_s26 = smov 16   ;;  %s1609_s27 = smov 1   ;;  %v1186_v43 = vpop.permute.xlu1 %1185 }
0x161e   :  { %1231 = dma.vmem_to_hbm [thread:$0]  %s1226_s17, 128, %s2010_s3, [#allocation6], %s1608_s26, %s1608_s26, %s1609_s27   ;;  %1191 = vst.msk [vmem:[#allocation3] sm:$0x3] %vm121_vm1, %v1186_v43 }
0x161f   :  { %1411 = vst.msk [vmem:[%s2012_s5 + $0xe] sm:$0x3] %vm121_vm1, %v1186_v43 }
0x1620   :  { %1598 = dma.done.wait [#allocation6], 128  }
0x1621   :  { %1599 = vsyncadd [#allocation6], 4294967168 }
0x1622   :  { %1275 = vsyncpa [#allocation6], 1 }

</bundles_post_ra>
